<compile_context>
chip_gen: v7x
topology: tpu7x:2x2x1
jax: 0.10.0
libtpu: 0.0.40
codegen_flags: <defaults>
</compile_context>

<pallas_src>
import functools

import jax
import jax.numpy as jnp
from jax.experimental import pallas as pl
from jax.experimental.pallas import tpu as pltpu


# ----------------------------------------------------------------------------
# Fused Pallas kernel: all LSTM layers + full time recurrence (one batch group)
# ----------------------------------------------------------------------------
def _fused_lstm_kernel(x_ref, *rest, num_layers, batch, future, chunk_steps):
    """Fused multi-layer LSTM over one batch group.

    x_ref   : (T*Bg, D)        time-major input for this group
    per layer l (inputs):
      wih_l : (D_l, 4Hp)       gate-block-padded W_ih^T
      whh_l : (Hp,  4Hp)       gate-block-padded W_hh^T
      b_l   : (1,   4Hp)       gate-block-padded (b_ih + b_hh)
    out_ref : (future*Bg, Hp)  last-layer hidden states for the last `future` t
    ig_scr  : (T_c*Bg, 4Hp)    VMEM scratch: chunked input projection
    seq_scr : (T*Bg, Hp)       VMEM scratch: inter-layer hidden sequence
    """
    wih_refs = rest[0:3 * num_layers:3]
    whh_refs = rest[1:3 * num_layers:3]
    b_refs = rest[2:3 * num_layers:3]
    out_ref = rest[3 * num_layers]
    ig_scr = rest[3 * num_layers + 1]
    seq_scr = rest[3 * num_layers + 2]

    Bg = batch
    TBg = seq_scr.shape[0]
    Hp = seq_scr.shape[1]
    T = TBg // Bg
    T_c = chunk_steps
    n_chunks = (T + T_c - 1) // T_c
    t_start = T - future

    # Gate-selection lane mask, hoisted out of all loops: lanes [2Hp, 3Hp) are
    # the "g" gate (tanh via 2*sigmoid(2x)-1); everything else gets sigmoid.
    lane = jax.lax.broadcasted_iota(jnp.int32, (Bg, 4 * Hp), 1)
    g_mask = (lane >= 2 * Hp) & (lane < 3 * Hp)

    for l in range(num_layers):
        inp_ref = x_ref if l == 0 else seq_scr
        whh = whh_refs[l][...]          # (Hp, 4Hp), loop-invariant
        bias = b_refs[l][...]           # (1, 4Hp)

        h = jnp.zeros((Bg, Hp), jnp.float32)
        c = jnp.zeros((Bg, Hp), jnp.float32)

        for k in range(n_chunks):
            t0 = k * T_c
            rows = min(T_c, T - t0)
            base = t0 * Bg              # static (Python) row offset

            # Chunked, hoisted input projection: one bulk MXU matmul for this
            # time window instead of one tiny matmul per timestep.
            ig_scr[0:rows * Bg, :] = (
                jnp.dot(inp_ref[base:base + rows * Bg, :], wih_refs[l][...],
                        preferred_element_type=jnp.float32)
                + bias)

            def step(tl, carry):
                h, c = carry
                r_ig = pl.multiple_of(tl * Bg, Bg)
                gates = ig_scr[pl.ds(r_ig, Bg), :] + jnp.dot(
                    h, whh, preferred_element_type=jnp.float32)   # (Bg, 4Hp)

                # Single-sigmoid activation over the full gate tile.
                gates = jnp.where(g_mask, 2.0 * gates, gates)
                s = jax.nn.sigmoid(gates)
                act = jnp.where(g_mask, 2.0 * s - 1.0, s)

                i = act[:, 0 * Hp:1 * Hp]
                f = act[:, 1 * Hp:2 * Hp]
                g = act[:, 2 * Hp:3 * Hp]
                o = act[:, 3 * Hp:4 * Hp]

                c_new = f * c + i * g
                h_new = o * jnp.tanh(c_new)

                # Overwrite the (already consumed) input row with this layer's
                # hidden state (lane-dense, unmasked store since Hp % 128 == 0).
                r_abs = pl.multiple_of(base + tl * Bg, Bg)
                seq_scr[pl.ds(r_abs, Bg), :] = h_new
                return h_new, c_new

            h, c = jax.lax.fori_loop(0, rows, step, (h, c),
                                     unroll=min(8, rows))

    # Single bulk (static-slice) copy of the last `future` steps to the output.
    out_ref[...] = seq_scr[t_start * Bg:(t_start + future) * Bg, :]


def _vmem_budget_bytes(need_bytes):
    """Explicit scoped-VMEM request with headroom, capped below physical."""
    try:
        cap = int(pltpu.get_tpu_info().vmem_capacity_bytes)
    except Exception:
        cap = 128 << 20
    ceiling = int(cap * 0.75)                  # leave room for Mosaic internals
    budget = int(need_bytes * 1.25) + (2 << 20)
    budget = max(budget, 32 << 20)
    return min(budget, ceiling)


def fused_lstm_pallas(xg, layer_params, batch_g, future, groups, chunk_steps):
    """xg: (G, T*Bg, D) grouped, time-major input. Returns (G, future*Bg, Hp)."""
    G, TBg, D0 = xg.shape
    Bg = batch_g
    T = TBg // Bg
    Hp = layer_params[0][1].shape[0]           # whh_t: (Hp, 4Hp)
    num_layers = len(layer_params)
    T_c = min(T, chunk_steps)

    args = [xg]
    in_specs = [pl.BlockSpec((None, TBg, D0), lambda g: (g, 0, 0))]
    for (wih_t, whh_t, b) in layer_params:
        args.extend([wih_t, whh_t, b])
        in_specs.extend([
            pl.BlockSpec(wih_t.shape, lambda g: (0, 0)),
            pl.BlockSpec(whh_t.shape, lambda g: (0, 0)),
            pl.BlockSpec(b.shape, lambda g: (0, 0)),
        ])
    out_spec = pl.BlockSpec((None, future * Bg, Hp), lambda g: (g, 0, 0))

    # VMEM accounting (double-buffered pipeline blocks + scratch) with headroom.
    f32b = 4
    weight_bytes = sum(w.size + u.size + b.size
                       for (w, u, b) in layer_params) * f32b
    in_bytes = TBg * D0 * f32b
    out_bytes = future * Bg * Hp * f32b
    scratch_bytes = (T_c * Bg * 4 * Hp + TBg * Hp) * f32b
    need = 2 * (in_bytes + weight_bytes + out_bytes) + scratch_bytes

    kernel = functools.partial(
        _fused_lstm_kernel, num_layers=num_layers, batch=Bg, future=future,
        chunk_steps=T_c)

    return pl.pallas_call(
        kernel,
        out_shape=jax.ShapeDtypeStruct((G, future * Bg, Hp), jnp.float32),
        grid=(G,),
        in_specs=in_specs,
        out_specs=out_spec,
        scratch_shapes=[
            pltpu.VMEM((T_c * Bg, 4 * Hp), jnp.float32),  # chunked input proj
            pltpu.VMEM((TBg, Hp), jnp.float32),           # inter-layer hidden
        ],
        compiler_params=pltpu.CompilerParams(
            dimension_semantics=("parallel",),
            vmem_limit_bytes=_vmem_budget_bytes(need)),
    )(*args)


# ----------------------------------------------------------------------------
# Wrappers
# ----------------------------------------------------------------------------
def prepare_params(params, lane=128):
    """One-time param prep outside the forward path.

    Transposes weights, fuses biases, and pads the hidden dim GATE-BLOCKWISE to
    a multiple of 128 lanes (padded lanes carry exact zeros through the
    recurrence and are sliced off in the wrapper).
    """
    H = params["lstm"][0][1].shape[1]          # whh: (4H, H)
    Hp = ((H + lane - 1) // lane) * lane
    layers = []
    for li, (wih, whh, bih, bhh) in enumerate(params["lstm"]):
        d_in = wih.shape[1]
        d_in_p = d_in if li == 0 else Hp
        wih4 = jnp.pad(wih.reshape(4, H, d_in),
                       ((0, 0), (0, Hp - H), (0, d_in_p - d_in)))
        wih_t = wih4.reshape(4 * Hp, d_in_p).T          # (d_in_p, 4Hp)
        whh4 = jnp.pad(whh.reshape(4, H, H),
                       ((0, 0), (0, Hp - H), (0, Hp - H)))
        whh_t = whh4.reshape(4 * Hp, Hp).T              # (Hp, 4Hp)
        b4 = jnp.pad((bih + bhh).reshape(4, H), ((0, 0), (0, Hp - H)))
        b = b4.reshape(1, 4 * Hp)
        layers.append((wih_t, whh_t, b))
    w_fc, b_fc = params["fc"]
    return {"layers": tuple(layers), "fc": (w_fc.T, b_fc)}


@functools.partial(jax.jit, static_argnames=("future", "chunk_steps"))
def lstm_forward(x, prep, future, chunk_steps=64):
    """Forward pass matching the PyTorch module (bi=False, eval mode).

    x: (B, T, input_dim), batch-first like nn.LSTM(batch_first=True).
    Returns predictions: (B, future, output_dim).
    """
    B, T, D = x.shape
    future = min(future, T)                    # matches out[:, -future:, :]

    # Split the batch into G groups (one grid step each, marked "parallel" so
    # v7x's two TensorCores can take one group each); pad each group to the
    # fp32 sublane count (8) so every vreg / MXU row is used.
    G = 2 if B >= 16 else 1
    Bg = max(8, ((pl.cdiv(B, G) + 7) // 8) * 8)
    B_pad = G * Bg

    x_tm = jnp.swapaxes(x, 0, 1)               # (T, B, D) time-major
    if B_pad != B:
        x_tm = jnp.pad(x_tm, ((0, 0), (0, B_pad - B), (0, 0)))
    xg = (x_tm.reshape(T, G, Bg, D)
              .transpose(1, 0, 2, 3)
              .reshape(G, T * Bg, D))          # (G, T*Bg, D)

    out = fused_lstm_pallas(xg, prep["layers"], Bg, future, G, chunk_steps)

    Hp = out.shape[-1]
    H = prep["fc"][0].shape[0]
    h_tail = (out.reshape(G, future, Bg, Hp)
                 .transpose(1, 0, 2, 3)
                 .reshape(future, B_pad, Hp))[:, :B, :H]   # (future, B, H)
    h_tail = jnp.swapaxes(h_tail, 0, 1)                    # (B, future, H)

    # TODO(synk): tiny final Linear ((B*future, H) x (H, O)) left to XLA.
    w_fc_t, b_fc = prep["fc"]
    return h_tail @ w_fc_t + b_fc


# ----------------------------------------------------------------------------
# Pure-JAX reference (for correctness check)
# ----------------------------------------------------------------------------
def lstm_forward_ref(x, params, future):
    h_seq = x
    for (wih, whh, bih, bhh) in params["lstm"]:
        B = h_seq.shape[0]
        H = whh.shape[1]

        def step(carry, x_t):
            h, c = carry
            gates = x_t @ wih.T + h @ whh.T + bih + bhh
            i, f, g, o = jnp.split(gates, 4, axis=-1)
            i = jax.nn.sigmoid(i)
            f = jax.nn.sigmoid(f)
            g = jnp.tanh(g)
            o = jax.nn.sigmoid(o)
            c = f * c + i * g
            h = o * jnp.tanh(c)
            return (h, c), h

        h0 = jnp.zeros((B, H), jnp.float32)
        c0 = jnp.zeros((B, H), jnp.float32)
        _, ys = jax.lax.scan(step, (h0, c0), jnp.swapaxes(h_seq, 0, 1))
        h_seq = jnp.swapaxes(ys, 0, 1)
    w_fc, b_fc = params["fc"]
    return h_seq[:, -future:, :] @ w_fc.T + b_fc


# ----------------------------------------------------------------------------
# Parameter init (deterministic, mimics nn.LSTM / nn.Linear shapes)
# ----------------------------------------------------------------------------
def init_params(key, input_dim, hidden_dim, output_dim, num_layers):
    params = {"lstm": [], "fc": None}
    bound = 1.0 / jnp.sqrt(hidden_dim)
    for layer in range(num_layers):
        d_in = input_dim if layer == 0 else hidden_dim
        key, k1, k2, k3, k4 = jax.random.split(key, 5)
        wih = jax.random.uniform(k1, (4 * hidden_dim, d_in), jnp.float32,
                                 -bound, bound)
        whh = jax.random.uniform(k2, (4 * hidden_dim, hidden_dim), jnp.float32,
                                 -bound, bound)
        bih = jax.random.uniform(k3, (4 * hidden_dim,), jnp.float32,
                                 -bound, bound)
        bhh = jax.random.uniform(k4, (4 * hidden_dim,), jnp.float32,
                                 -bound, bound)
        params["lstm"].append((wih, whh, bih, bhh))
    key, k1, k2 = jax.random.split(key, 3)
    fc_bound = 1.0 / jnp.sqrt(hidden_dim)
    w_fc = jax.random.uniform(k1, (output_dim, hidden_dim), jnp.float32,
                              -fc_bound, fc_bound)
    b_fc = jax.random.uniform(k2, (output_dim,), jnp.float32,
                              -fc_bound, fc_bound)
    params["fc"] = (w_fc, b_fc)
    return params


# ----------------------------------------------------------------------------
if __name__ == "__main__":
    key = jax.random.PRNGKey(0)

    # ---- test 1: tiny config (single batch group, single time chunk) ------
    B, T, input_dim = 2, 8, 16
    hidden_dim, output_dim, num_layers = 32, 8, 2
    future = 4

    key, kx, kp = jax.random.split(key, 3)
    x = jax.random.normal(kx, (B, T, input_dim), jnp.float32)
    params = init_params(kp, input_dim, hidden_dim, output_dim, num_layers)
    prep = prepare_params(params)

    pred = jax.block_until_ready(lstm_forward(x, prep, future))
    ref = lstm_forward_ref(x, params, future)
    assert pred.shape == (B, future, output_dim), pred.shape
    assert jnp.allclose(pred, ref, atol=1e-4, rtol=1e-4), (
        float(jnp.max(jnp.abs(pred - ref))))

    # ---- test 2: batch split over 2 groups + ragged time chunks -----------
    B2, T2, D2 = 16, 10, 12
    H2, O2, L2 = 40, 5, 3
    future2 = 5

    key, kx2, kp2 = jax.random.split(key, 3)
    x2 = jax.random.normal(kx2, (B2, T2, D2), jnp.float32)
    params2 = init_params(kp2, D2, H2, O2, L2)
    prep2 = prepare_params(params2)

    pred2 = jax.block_until_ready(lstm_forward(x2, prep2, future2,
                                               chunk_steps=4))
    ref2 = lstm_forward_ref(x2, params2, future2)
    assert pred2.shape == (B2, future2, O2), pred2.shape
    assert jnp.allclose(pred2, ref2, atol=1e-4, rtol=1e-4), (
        float(jnp.max(jnp.abs(pred2 - ref2))))

    print("KERNEL_OK")
</pallas_src>

<mosaic_0001>
module attributes {stable_mosaic.version = 11 : i64} {
  func.func @_fused_lstm_kernel(%arg0: i32, %arg1: memref<1x64x16xf32, #tpu.memory_space<vmem>>, %arg2: memref<16x512xf32, #tpu.memory_space<vmem>>, %arg3: memref<128x512xf32, #tpu.memory_space<vmem>>, %arg4: memref<1x512xf32, #tpu.memory_space<vmem>>, %arg5: memref<128x512xf32, #tpu.memory_space<vmem>>, %arg6: memref<128x512xf32, #tpu.memory_space<vmem>>, %arg7: memref<1x512xf32, #tpu.memory_space<vmem>>, %arg8: memref<1x32x128xf32, #tpu.memory_space<vmem>>, %arg9: memref<64x512xf32, #tpu.memory_space<vmem>>, %arg10: memref<64x128xf32, #tpu.memory_space<vmem>>) attributes {dimension_semantics = [#tpu.dimension_semantics<parallel>], iteration_bounds = array<i64: 1>, scalar_prefetch = 0 : i64, scratch_operands = 2 : i64, tpu.core_type = #tpu.core_type<tc>, window_params = [{transform_indices = @transform_0, window_bounds = array<i64: 1, 64, 16>}, {pipeline_mode = #tpu.pipeline_mode<synchronous>, transform_indices = @transform_1, window_bounds = array<i64: 16, 512>}, {pipeline_mode = #tpu.pipeline_mode<synchronous>, transform_indices = @transform_2, window_bounds = array<i64: 128, 512>}, {pipeline_mode = #tpu.pipeline_mode<synchronous>, transform_indices = @transform_3, window_bounds = array<i64: 1, 512>}, {pipeline_mode = #tpu.pipeline_mode<synchronous>, transform_indices = @transform_4, window_bounds = array<i64: 128, 512>}, {pipeline_mode = #tpu.pipeline_mode<synchronous>, transform_indices = @transform_5, window_bounds = array<i64: 128, 512>}, {pipeline_mode = #tpu.pipeline_mode<synchronous>, transform_indices = @transform_6, window_bounds = array<i64: 1, 512>}, {transform_indices = @transform_7, window_bounds = array<i64: 1, 32, 128>}]} {
    %0 = tpu.iota {dimensions = array<i32: 1>} : vector<8x512xi32>
    %c256_i32 = arith.constant 256 : i32
    %1 = vector.broadcast %c256_i32 : i32 to vector<8x512xi32>
    %2 = arith.cmpi sge, %0, %1 : vector<8x512xi32>
    %c384_i32 = arith.constant 384 : i32
    %3 = vector.broadcast %c384_i32 : i32 to vector<8x512xi32>
    %4 = arith.cmpi slt, %0, %3 : vector<8x512xi32>
    %5 = arith.andi %2, %4 : vector<8x512xi1>
    %c0 = arith.constant 0 : index
    %c0_0 = arith.constant 0 : index
    %6 = vector.load %arg3[%c0, %c0_0] : memref<128x512xf32, #tpu.memory_space<vmem>>, vector<128x512xf32>
    %c0_1 = arith.constant 0 : index
    %c0_2 = arith.constant 0 : index
    %7 = vector.load %arg4[%c0_1, %c0_2] : memref<1x512xf32, #tpu.memory_space<vmem>>, vector<1x512xf32>
    %cst = arith.constant 0.000000e+00 : f32
    %8 = vector.broadcast %cst : f32 to vector<8x128xf32>
    %cst_3 = arith.constant 0.000000e+00 : f32
    %9 = vector.broadcast %cst_3 : f32 to vector<8x128xf32>
    %c0_4 = arith.constant 0 : index
    %c0_5 = arith.constant 0 : index
    %c0_6 = arith.constant 0 : index
    %10 = vector.load %arg1[%c0_4, %c0_5, %c0_6] : memref<1x64x16xf32, #tpu.memory_space<vmem>>, vector<1x64x16xf32>
    %11 = vector.shape_cast %10 : vector<1x64x16xf32> to vector<64x16xf32>
    %c0_7 = arith.constant 0 : index
    %c0_8 = arith.constant 0 : index
    %12 = vector.load %arg2[%c0_7, %c0_8] : memref<16x512xf32, #tpu.memory_space<vmem>>, vector<16x512xf32>
    %cst_9 = arith.constant dense<0.000000e+00> : vector<64x512xf32>
    %13 = tpu.matmul %11, %12, %cst_9 {dimension_numbers = #tpu.dot_dimension_numbers<[1], [0], [0], [1], [0, 0, 1, 1], [], []>} : vector<64x16xf32>, vector<16x512xf32>, vector<64x512xf32> -> vector<64x512xf32>
    %14 = vector.broadcast %7 : vector<1x512xf32> to vector<64x512xf32>
    %15 = arith.addf %13, %14 : vector<64x512xf32>
    %c0_10 = arith.constant 0 : index
    %c0_11 = arith.constant 0 : index
    %16 = vector.load %arg9[%c0_10, %c0_11] : memref<64x512xf32, #tpu.memory_space<vmem>>, vector<64x512xf32>
    tpu.vector_store %arg9[%c0_10, %c0_11], %15 {strides = array<i32>} : memref<64x512xf32, #tpu.memory_space<vmem>>, vector<64x512xf32>,
    %c0_i32 = arith.constant 0 : i32
    %c8_i32 = arith.constant 8 : i32
    %17 = arith.muli %c0_i32, %c8_i32 : i32
    %18 = tpu.assume_multiple %17, 8 : i32
    %19 = arith.index_cast %18 : i32 to index
    %c0_12 = arith.constant 0 : index
    %20 = vector.load %arg9[%19, %c0_12] : memref<64x512xf32, #tpu.memory_space<vmem>>, vector<8x512xf32>
    %cst_13 = arith.constant dense<0.000000e+00> : vector<8x512xf32>
    %21 = tpu.matmul %8, %6, %cst_13 {dimension_numbers = #tpu.dot_dimension_numbers<[1], [0], [0], [1], [0, 0, 1, 1], [], []>} : vector<8x128xf32>, vector<128x512xf32>, vector<8x512xf32> -> vector<8x512xf32>
    %22 = arith.addf %20, %21 : vector<8x512xf32>
    %cst_14 = arith.constant 2.000000e+00 : f32
    %23 = vector.broadcast %cst_14 : f32 to vector<8x512xf32>
    %24 = arith.mulf %23, %22 : vector<8x512xf32>
    %25 = arith.select %5, %24, %22 : vector<8x512xi1>, vector<8x512xf32>
    %26 = arith.negf %25 : vector<8x512xf32>
    %27 = math.exp %26 : vector<8x512xf32>
    %cst_15 = arith.constant 1.000000e+00 : f32
    %28 = vector.broadcast %cst_15 : f32 to vector<8x512xf32>
    %29 = arith.addf %28, %27 : vector<8x512xf32>
    %30 = arith.divf %28, %29 : vector<8x512xf32>
    %cst_16 = arith.constant 2.000000e+00 : f32
    %31 = vector.broadcast %cst_16 : f32 to vector<8x512xf32>
    %32 = arith.mulf %31, %30 : vector<8x512xf32>
    %cst_17 = arith.constant 1.000000e+00 : f32
    %33 = vector.broadcast %cst_17 : f32 to vector<8x512xf32>
    %34 = arith.subf %32, %33 : vector<8x512xf32>
    %35 = arith.select %5, %34, %30 : vector<8x512xi1>, vector<8x512xf32>
    %36 = vector.extract_strided_slice %35 {offsets = [0, 0], sizes = [8, 128], strides = [1, 1]} : vector<8x512xf32> to vector<8x128xf32>
    %37 = vector.extract_strided_slice %35 {offsets = [0, 128], sizes = [8, 128], strides = [1, 1]} : vector<8x512xf32> to vector<8x128xf32>
    %38 = vector.extract_strided_slice %35 {offsets = [0, 256], sizes = [8, 128], strides = [1, 1]} : vector<8x512xf32> to vector<8x128xf32>
    %39 = vector.extract_strided_slice %35 {offsets = [0, 384], sizes = [8, 128], strides = [1, 1]} : vector<8x512xf32> to vector<8x128xf32>
    %40 = arith.mulf %37, %9 : vector<8x128xf32>
    %41 = arith.mulf %36, %38 : vector<8x128xf32>
    %42 = arith.addf %40, %41 : vector<8x128xf32>
    %43 = math.tanh %42 : vector<8x128xf32>
    %44 = arith.mulf %39, %43 : vector<8x128xf32>
    %c8_i32_18 = arith.constant 8 : i32
    %45 = arith.muli %c0_i32, %c8_i32_18 : i32
    %c0_i32_19 = arith.constant 0 : i32
    %46 = arith.addi %c0_i32_19, %45 : i32
    %47 = tpu.assume_multiple %46, 8 : i32
    %48 = arith.index_cast %47 : i32 to index
    %c0_20 = arith.constant 0 : index
    %49 = vector.load %arg10[%48, %c0_20] : memref<64x128xf32, #tpu.memory_space<vmem>>, vector<8x128xf32>
    tpu.vector_store %arg10[%48, %c0_20], %44 {strides = array<i32>} : memref<64x128xf32, #tpu.memory_space<vmem>>, vector<8x128xf32>,
    %c1_i32 = arith.constant 1 : i32
    %c8_i32_21 = arith.constant 8 : i32
    %50 = arith.muli %c1_i32, %c8_i32_21 : i32
    %51 = tpu.assume_multiple %50, 8 : i32
    %52 = arith.index_cast %51 : i32 to index
    %c0_22 = arith.constant 0 : index
    %53 = vector.load %arg9[%52, %c0_22] : memref<64x512xf32, #tpu.memory_space<vmem>>, vector<8x512xf32>
    %cst_23 = arith.constant dense<0.000000e+00> : vector<8x512xf32>
    %54 = tpu.matmul %44, %6, %cst_23 {dimension_numbers = #tpu.dot_dimension_numbers<[1], [0], [0], [1], [0, 0, 1, 1], [], []>} : vector<8x128xf32>, vector<128x512xf32>, vector<8x512xf32> -> vector<8x512xf32>
    %55 = arith.addf %53, %54 : vector<8x512xf32>
    %cst_24 = arith.constant 2.000000e+00 : f32
    %56 = vector.broadcast %cst_24 : f32 to vector<8x512xf32>
    %57 = arith.mulf %56, %55 : vector<8x512xf32>
    %58 = arith.select %5, %57, %55 : vector<8x512xi1>, vector<8x512xf32>
    %59 = arith.negf %58 : vector<8x512xf32>
    %60 = math.exp %59 : vector<8x512xf32>
    %cst_25 = arith.constant 1.000000e+00 : f32
    %61 = vector.broadcast %cst_25 : f32 to vector<8x512xf32>
    %62 = arith.addf %61, %60 : vector<8x512xf32>
    %63 = arith.divf %61, %62 : vector<8x512xf32>
    %cst_26 = arith.constant 2.000000e+00 : f32
    %64 = vector.broadcast %cst_26 : f32 to vector<8x512xf32>
    %65 = arith.mulf %64, %63 : vector<8x512xf32>
    %cst_27 = arith.constant 1.000000e+00 : f32
    %66 = vector.broadcast %cst_27 : f32 to vector<8x512xf32>
    %67 = arith.subf %65, %66 : vector<8x512xf32>
    %68 = arith.select %5, %67, %63 : vector<8x512xi1>, vector<8x512xf32>
    %69 = vector.extract_strided_slice %68 {offsets = [0, 0], sizes = [8, 128], strides = [1, 1]} : vector<8x512xf32> to vector<8x128xf32>
    %70 = vector.extract_strided_slice %68 {offsets = [0, 128], sizes = [8, 128], strides = [1, 1]} : vector<8x512xf32> to vector<8x128xf32>
    %71 = vector.extract_strided_slice %68 {offsets = [0, 256], sizes = [8, 128], strides = [1, 1]} : vector<8x512xf32> to vector<8x128xf32>
    %72 = vector.extract_strided_slice %68 {offsets = [0, 384], sizes = [8, 128], strides = [1, 1]} : vector<8x512xf32> to vector<8x128xf32>
    %73 = arith.mulf %70, %42 : vector<8x128xf32>
    %74 = arith.mulf %69, %71 : vector<8x128xf32>
    %75 = arith.addf %73, %74 : vector<8x128xf32>
    %76 = math.tanh %75 : vector<8x128xf32>
    %77 = arith.mulf %72, %76 : vector<8x128xf32>
    %c8_i32_28 = arith.constant 8 : i32
    %78 = arith.muli %c1_i32, %c8_i32_28 : i32
    %c0_i32_29 = arith.constant 0 : i32
    %79 = arith.addi %c0_i32_29, %78 : i32
    %80 = tpu.assume_multiple %79, 8 : i32
    %81 = arith.index_cast %80 : i32 to index
    %c0_30 = arith.constant 0 : index
    %82 = vector.load %arg10[%81, %c0_30] : memref<64x128xf32, #tpu.memory_space<vmem>>, vector<8x128xf32>
    tpu.vector_store %arg10[%81, %c0_30], %77 {strides = array<i32>} : memref<64x128xf32, #tpu.memory_space<vmem>>, vector<8x128xf32>,
    %c2_i32 = arith.constant 2 : i32
    %c8_i32_31 = arith.constant 8 : i32
    %83 = arith.muli %c2_i32, %c8_i32_31 : i32
    %84 = tpu.assume_multiple %83, 8 : i32
    %85 = arith.index_cast %84 : i32 to index
    %c0_32 = arith.constant 0 : index
    %86 = vector.load %arg9[%85, %c0_32] : memref<64x512xf32, #tpu.memory_space<vmem>>, vector<8x512xf32>
    %cst_33 = arith.constant dense<0.000000e+00> : vector<8x512xf32>
    %87 = tpu.matmul %77, %6, %cst_33 {dimension_numbers = #tpu.dot_dimension_numbers<[1], [0], [0], [1], [0, 0, 1, 1], [], []>} : vector<8x128xf32>, vector<128x512xf32>, vector<8x512xf32> -> vector<8x512xf32>
    %88 = arith.addf %86, %87 : vector<8x512xf32>
    %cst_34 = arith.constant 2.000000e+00 : f32
    %89 = vector.broadcast %cst_34 : f32 to vector<8x512xf32>
    %90 = arith.mulf %89, %88 : vector<8x512xf32>
    %91 = arith.select %5, %90, %88 : vector<8x512xi1>, vector<8x512xf32>
    %92 = arith.negf %91 : vector<8x512xf32>
    %93 = math.exp %92 : vector<8x512xf32>
    %cst_35 = arith.constant 1.000000e+00 : f32
    %94 = vector.broadcast %cst_35 : f32 to vector<8x512xf32>
    %95 = arith.addf %94, %93 : vector<8x512xf32>
    %96 = arith.divf %94, %95 : vector<8x512xf32>
    %cst_36 = arith.constant 2.000000e+00 : f32
    %97 = vector.broadcast %cst_36 : f32 to vector<8x512xf32>
    %98 = arith.mulf %97, %96 : vector<8x512xf32>
    %cst_37 = arith.constant 1.000000e+00 : f32
    %99 = vector.broadcast %cst_37 : f32 to vector<8x512xf32>
    %100 = arith.subf %98, %99 : vector<8x512xf32>
    %101 = arith.select %5, %100, %96 : vector<8x512xi1>, vector<8x512xf32>
    %102 = vector.extract_strided_slice %101 {offsets = [0, 0], sizes = [8, 128], strides = [1, 1]} : vector<8x512xf32> to vector<8x128xf32>
    %103 = vector.extract_strided_slice %101 {offsets = [0, 128], sizes = [8, 128], strides = [1, 1]} : vector<8x512xf32> to vector<8x128xf32>
    %104 = vector.extract_strided_slice %101 {offsets = [0, 256], sizes = [8, 128], strides = [1, 1]} : vector<8x512xf32> to vector<8x128xf32>
    %105 = vector.extract_strided_slice %101 {offsets = [0, 384], sizes = [8, 128], strides = [1, 1]} : vector<8x512xf32> to vector<8x128xf32>
    %106 = arith.mulf %103, %75 : vector<8x128xf32>
    %107 = arith.mulf %102, %104 : vector<8x128xf32>
    %108 = arith.addf %106, %107 : vector<8x128xf32>
    %109 = math.tanh %108 : vector<8x128xf32>
    %110 = arith.mulf %105, %109 : vector<8x128xf32>
    %c8_i32_38 = arith.constant 8 : i32
    %111 = arith.muli %c2_i32, %c8_i32_38 : i32
    %c0_i32_39 = arith.constant 0 : i32
    %112 = arith.addi %c0_i32_39, %111 : i32
    %113 = tpu.assume_multiple %112, 8 : i32
    %114 = arith.index_cast %113 : i32 to index
    %c0_40 = arith.constant 0 : index
    %115 = vector.load %arg10[%114, %c0_40] : memref<64x128xf32, #tpu.memory_space<vmem>>, vector<8x128xf32>
    tpu.vector_store %arg10[%114, %c0_40], %110 {strides = array<i32>} : memref<64x128xf32, #tpu.memory_space<vmem>>, vector<8x128xf32>,
    %c3_i32 = arith.constant 3 : i32
    %c8_i32_41 = arith.constant 8 : i32
    %116 = arith.muli %c3_i32, %c8_i32_41 : i32
    %117 = tpu.assume_multiple %116, 8 : i32
    %118 = arith.index_cast %117 : i32 to index
    %c0_42 = arith.constant 0 : index
    %119 = vector.load %arg9[%118, %c0_42] : memref<64x512xf32, #tpu.memory_space<vmem>>, vector<8x512xf32>
    %cst_43 = arith.constant dense<0.000000e+00> : vector<8x512xf32>
    %120 = tpu.matmul %110, %6, %cst_43 {dimension_numbers = #tpu.dot_dimension_numbers<[1], [0], [0], [1], [0, 0, 1, 1], [], []>} : vector<8x128xf32>, vector<128x512xf32>, vector<8x512xf32> -> vector<8x512xf32>
    %121 = arith.addf %119, %120 : vector<8x512xf32>
    %cst_44 = arith.constant 2.000000e+00 : f32
    %122 = vector.broadcast %cst_44 : f32 to vector<8x512xf32>
    %123 = arith.mulf %122, %121 : vector<8x512xf32>
    %124 = arith.select %5, %123, %121 : vector<8x512xi1>, vector<8x512xf32>
    %125 = arith.negf %124 : vector<8x512xf32>
    %126 = math.exp %125 : vector<8x512xf32>
    %cst_45 = arith.constant 1.000000e+00 : f32
    %127 = vector.broadcast %cst_45 : f32 to vector<8x512xf32>
    %128 = arith.addf %127, %126 : vector<8x512xf32>
    %129 = arith.divf %127, %128 : vector<8x512xf32>
    %cst_46 = arith.constant 2.000000e+00 : f32
    %130 = vector.broadcast %cst_46 : f32 to vector<8x512xf32>
    %131 = arith.mulf %130, %129 : vector<8x512xf32>
    %cst_47 = arith.constant 1.000000e+00 : f32
    %132 = vector.broadcast %cst_47 : f32 to vector<8x512xf32>
    %133 = arith.subf %131, %132 : vector<8x512xf32>
    %134 = arith.select %5, %133, %129 : vector<8x512xi1>, vector<8x512xf32>
    %135 = vector.extract_strided_slice %134 {offsets = [0, 0], sizes = [8, 128], strides = [1, 1]} : vector<8x512xf32> to vector<8x128xf32>
    %136 = vector.extract_strided_slice %134 {offsets = [0, 128], sizes = [8, 128], strides = [1, 1]} : vector<8x512xf32> to vector<8x128xf32>
    %137 = vector.extract_strided_slice %134 {offsets = [0, 256], sizes = [8, 128], strides = [1, 1]} : vector<8x512xf32> to vector<8x128xf32>
    %138 = vector.extract_strided_slice %134 {offsets = [0, 384], sizes = [8, 128], strides = [1, 1]} : vector<8x512xf32> to vector<8x128xf32>
    %139 = arith.mulf %136, %108 : vector<8x128xf32>
    %140 = arith.mulf %135, %137 : vector<8x128xf32>
    %141 = arith.addf %139, %140 : vector<8x128xf32>
    %142 = math.tanh %141 : vector<8x128xf32>
    %143 = arith.mulf %138, %142 : vector<8x128xf32>
    %c8_i32_48 = arith.constant 8 : i32
    %144 = arith.muli %c3_i32, %c8_i32_48 : i32
    %c0_i32_49 = arith.constant 0 : i32
    %145 = arith.addi %c0_i32_49, %144 : i32
    %146 = tpu.assume_multiple %145, 8 : i32
    %147 = arith.index_cast %146 : i32 to index
    %c0_50 = arith.constant 0 : index
    %148 = vector.load %arg10[%147, %c0_50] : memref<64x128xf32, #tpu.memory_space<vmem>>, vector<8x128xf32>
    tpu.vector_store %arg10[%147, %c0_50], %143 {strides = array<i32>} : memref<64x128xf32, #tpu.memory_space<vmem>>, vector<8x128xf32>,
    %c4_i32 = arith.constant 4 : i32
    %c8_i32_51 = arith.constant 8 : i32
    %149 = arith.muli %c4_i32, %c8_i32_51 : i32
    %150 = tpu.assume_multiple %149, 8 : i32
    %151 = arith.index_cast %150 : i32 to index
    %c0_52 = arith.constant 0 : index
    %152 = vector.load %arg9[%151, %c0_52] : memref<64x512xf32, #tpu.memory_space<vmem>>, vector<8x512xf32>
    %cst_53 = arith.constant dense<0.000000e+00> : vector<8x512xf32>
    %153 = tpu.matmul %143, %6, %cst_53 {dimension_numbers = #tpu.dot_dimension_numbers<[1], [0], [0], [1], [0, 0, 1, 1], [], []>} : vector<8x128xf32>, vector<128x512xf32>, vector<8x512xf32> -> vector<8x512xf32>
    %154 = arith.addf %152, %153 : vector<8x512xf32>
    %cst_54 = arith.constant 2.000000e+00 : f32
    %155 = vector.broadcast %cst_54 : f32 to vector<8x512xf32>
    %156 = arith.mulf %155, %154 : vector<8x512xf32>
    %157 = arith.select %5, %156, %154 : vector<8x512xi1>, vector<8x512xf32>
    %158 = arith.negf %157 : vector<8x512xf32>
    %159 = math.exp %158 : vector<8x512xf32>
    %cst_55 = arith.constant 1.000000e+00 : f32
    %160 = vector.broadcast %cst_55 : f32 to vector<8x512xf32>
    %161 = arith.addf %160, %159 : vector<8x512xf32>
    %162 = arith.divf %160, %161 : vector<8x512xf32>
    %cst_56 = arith.constant 2.000000e+00 : f32
    %163 = vector.broadcast %cst_56 : f32 to vector<8x512xf32>
    %164 = arith.mulf %163, %162 : vector<8x512xf32>
    %cst_57 = arith.constant 1.000000e+00 : f32
    %165 = vector.broadcast %cst_57 : f32 to vector<8x512xf32>
    %166 = arith.subf %164, %165 : vector<8x512xf32>
    %167 = arith.select %5, %166, %162 : vector<8x512xi1>, vector<8x512xf32>
    %168 = vector.extract_strided_slice %167 {offsets = [0, 0], sizes = [8, 128], strides = [1, 1]} : vector<8x512xf32> to vector<8x128xf32>
    %169 = vector.extract_strided_slice %167 {offsets = [0, 128], sizes = [8, 128], strides = [1, 1]} : vector<8x512xf32> to vector<8x128xf32>
    %170 = vector.extract_strided_slice %167 {offsets = [0, 256], sizes = [8, 128], strides = [1, 1]} : vector<8x512xf32> to vector<8x128xf32>
    %171 = vector.extract_strided_slice %167 {offsets = [0, 384], sizes = [8, 128], strides = [1, 1]} : vector<8x512xf32> to vector<8x128xf32>
    %172 = arith.mulf %169, %141 : vector<8x128xf32>
    %173 = arith.mulf %168, %170 : vector<8x128xf32>
    %174 = arith.addf %172, %173 : vector<8x128xf32>
    %175 = math.tanh %174 : vector<8x128xf32>
    %176 = arith.mulf %171, %175 : vector<8x128xf32>
    %c8_i32_58 = arith.constant 8 : i32
    %177 = arith.muli %c4_i32, %c8_i32_58 : i32
    %c0_i32_59 = arith.constant 0 : i32
    %178 = arith.addi %c0_i32_59, %177 : i32
    %179 = tpu.assume_multiple %178, 8 : i32
    %180 = arith.index_cast %179 : i32 to index
    %c0_60 = arith.constant 0 : index
    %181 = vector.load %arg10[%180, %c0_60] : memref<64x128xf32, #tpu.memory_space<vmem>>, vector<8x128xf32>
    tpu.vector_store %arg10[%180, %c0_60], %176 {strides = array<i32>} : memref<64x128xf32, #tpu.memory_space<vmem>>, vector<8x128xf32>,
    %c5_i32 = arith.constant 5 : i32
    %c8_i32_61 = arith.constant 8 : i32
    %182 = arith.muli %c5_i32, %c8_i32_61 : i32
    %183 = tpu.assume_multiple %182, 8 : i32
    %184 = arith.index_cast %183 : i32 to index
    %c0_62 = arith.constant 0 : index
    %185 = vector.load %arg9[%184, %c0_62] : memref<64x512xf32, #tpu.memory_space<vmem>>, vector<8x512xf32>
    %cst_63 = arith.constant dense<0.000000e+00> : vector<8x512xf32>
    %186 = tpu.matmul %176, %6, %cst_63 {dimension_numbers = #tpu.dot_dimension_numbers<[1], [0], [0], [1], [0, 0, 1, 1], [], []>} : vector<8x128xf32>, vector<128x512xf32>, vector<8x512xf32> -> vector<8x512xf32>
    %187 = arith.addf %185, %186 : vector<8x512xf32>
    %cst_64 = arith.constant 2.000000e+00 : f32
    %188 = vector.broadcast %cst_64 : f32 to vector<8x512xf32>
    %189 = arith.mulf %188, %187 : vector<8x512xf32>
    %190 = arith.select %5, %189, %187 : vector<8x512xi1>, vector<8x512xf32>
    %191 = arith.negf %190 : vector<8x512xf32>
    %192 = math.exp %191 : vector<8x512xf32>
    %cst_65 = arith.constant 1.000000e+00 : f32
    %193 = vector.broadcast %cst_65 : f32 to vector<8x512xf32>
    %194 = arith.addf %193, %192 : vector<8x512xf32>
    %195 = arith.divf %193, %194 : vector<8x512xf32>
    %cst_66 = arith.constant 2.000000e+00 : f32
    %196 = vector.broadcast %cst_66 : f32 to vector<8x512xf32>
    %197 = arith.mulf %196, %195 : vector<8x512xf32>
    %cst_67 = arith.constant 1.000000e+00 : f32
    %198 = vector.broadcast %cst_67 : f32 to vector<8x512xf32>
    %199 = arith.subf %197, %198 : vector<8x512xf32>
    %200 = arith.select %5, %199, %195 : vector<8x512xi1>, vector<8x512xf32>
    %201 = vector.extract_strided_slice %200 {offsets = [0, 0], sizes = [8, 128], strides = [1, 1]} : vector<8x512xf32> to vector<8x128xf32>
    %202 = vector.extract_strided_slice %200 {offsets = [0, 128], sizes = [8, 128], strides = [1, 1]} : vector<8x512xf32> to vector<8x128xf32>
    %203 = vector.extract_strided_slice %200 {offsets = [0, 256], sizes = [8, 128], strides = [1, 1]} : vector<8x512xf32> to vector<8x128xf32>
    %204 = vector.extract_strided_slice %200 {offsets = [0, 384], sizes = [8, 128], strides = [1, 1]} : vector<8x512xf32> to vector<8x128xf32>
    %205 = arith.mulf %202, %174 : vector<8x128xf32>
    %206 = arith.mulf %201, %203 : vector<8x128xf32>
    %207 = arith.addf %205, %206 : vector<8x128xf32>
    %208 = math.tanh %207 : vector<8x128xf32>
    %209 = arith.mulf %204, %208 : vector<8x128xf32>
    %c8_i32_68 = arith.constant 8 : i32
    %210 = arith.muli %c5_i32, %c8_i32_68 : i32
    %c0_i32_69 = arith.constant 0 : i32
    %211 = arith.addi %c0_i32_69, %210 : i32
    %212 = tpu.assume_multiple %211, 8 : i32
    %213 = arith.index_cast %212 : i32 to index
    %c0_70 = arith.constant 0 : index
    %214 = vector.load %arg10[%213, %c0_70] : memref<64x128xf32, #tpu.memory_space<vmem>>, vector<8x128xf32>
    tpu.vector_store %arg10[%213, %c0_70], %209 {strides = array<i32>} : memref<64x128xf32, #tpu.memory_space<vmem>>, vector<8x128xf32>,
    %c6_i32 = arith.constant 6 : i32
    %c8_i32_71 = arith.constant 8 : i32
    %215 = arith.muli %c6_i32, %c8_i32_71 : i32
    %216 = tpu.assume_multiple %215, 8 : i32
    %217 = arith.index_cast %216 : i32 to index
    %c0_72 = arith.constant 0 : index
    %218 = vector.load %arg9[%217, %c0_72] : memref<64x512xf32, #tpu.memory_space<vmem>>, vector<8x512xf32>
    %cst_73 = arith.constant dense<0.000000e+00> : vector<8x512xf32>
    %219 = tpu.matmul %209, %6, %cst_73 {dimension_numbers = #tpu.dot_dimension_numbers<[1], [0], [0], [1], [0, 0, 1, 1], [], []>} : vector<8x128xf32>, vector<128x512xf32>, vector<8x512xf32> -> vector<8x512xf32>
    %220 = arith.addf %218, %219 : vector<8x512xf32>
    %cst_74 = arith.constant 2.000000e+00 : f32
    %221 = vector.broadcast %cst_74 : f32 to vector<8x512xf32>
    %222 = arith.mulf %221, %220 : vector<8x512xf32>
    %223 = arith.select %5, %222, %220 : vector<8x512xi1>, vector<8x512xf32>
    %224 = arith.negf %223 : vector<8x512xf32>
    %225 = math.exp %224 : vector<8x512xf32>
    %cst_75 = arith.constant 1.000000e+00 : f32
    %226 = vector.broadcast %cst_75 : f32 to vector<8x512xf32>
    %227 = arith.addf %226, %225 : vector<8x512xf32>
    %228 = arith.divf %226, %227 : vector<8x512xf32>
    %cst_76 = arith.constant 2.000000e+00 : f32
    %229 = vector.broadcast %cst_76 : f32 to vector<8x512xf32>
    %230 = arith.mulf %229, %228 : vector<8x512xf32>
    %cst_77 = arith.constant 1.000000e+00 : f32
    %231 = vector.broadcast %cst_77 : f32 to vector<8x512xf32>
    %232 = arith.subf %230, %231 : vector<8x512xf32>
    %233 = arith.select %5, %232, %228 : vector<8x512xi1>, vector<8x512xf32>
    %234 = vector.extract_strided_slice %233 {offsets = [0, 0], sizes = [8, 128], strides = [1, 1]} : vector<8x512xf32> to vector<8x128xf32>
    %235 = vector.extract_strided_slice %233 {offsets = [0, 128], sizes = [8, 128], strides = [1, 1]} : vector<8x512xf32> to vector<8x128xf32>
    %236 = vector.extract_strided_slice %233 {offsets = [0, 256], sizes = [8, 128], strides = [1, 1]} : vector<8x512xf32> to vector<8x128xf32>
    %237 = vector.extract_strided_slice %233 {offsets = [0, 384], sizes = [8, 128], strides = [1, 1]} : vector<8x512xf32> to vector<8x128xf32>
    %238 = arith.mulf %235, %207 : vector<8x128xf32>
    %239 = arith.mulf %234, %236 : vector<8x128xf32>
    %240 = arith.addf %238, %239 : vector<8x128xf32>
    %241 = math.tanh %240 : vector<8x128xf32>
    %242 = arith.mulf %237, %241 : vector<8x128xf32>
    %c8_i32_78 = arith.constant 8 : i32
    %243 = arith.muli %c6_i32, %c8_i32_78 : i32
    %c0_i32_79 = arith.constant 0 : i32
    %244 = arith.addi %c0_i32_79, %243 : i32
    %245 = tpu.assume_multiple %244, 8 : i32
    %246 = arith.index_cast %245 : i32 to index
    %c0_80 = arith.constant 0 : index
    %247 = vector.load %arg10[%246, %c0_80] : memref<64x128xf32, #tpu.memory_space<vmem>>, vector<8x128xf32>
    tpu.vector_store %arg10[%246, %c0_80], %242 {strides = array<i32>} : memref<64x128xf32, #tpu.memory_space<vmem>>, vector<8x128xf32>,
    %c7_i32 = arith.constant 7 : i32
    %c8_i32_81 = arith.constant 8 : i32
    %248 = arith.muli %c7_i32, %c8_i32_81 : i32
    %249 = tpu.assume_multiple %248, 8 : i32
    %250 = arith.index_cast %249 : i32 to index
    %c0_82 = arith.constant 0 : index
    %251 = vector.load %arg9[%250, %c0_82] : memref<64x512xf32, #tpu.memory_space<vmem>>, vector<8x512xf32>
    %cst_83 = arith.constant dense<0.000000e+00> : vector<8x512xf32>
    %252 = tpu.matmul %242, %6, %cst_83 {dimension_numbers = #tpu.dot_dimension_numbers<[1], [0], [0], [1], [0, 0, 1, 1], [], []>} : vector<8x128xf32>, vector<128x512xf32>, vector<8x512xf32> -> vector<8x512xf32>
    %253 = arith.addf %251, %252 : vector<8x512xf32>
    %cst_84 = arith.constant 2.000000e+00 : f32
    %254 = vector.broadcast %cst_84 : f32 to vector<8x512xf32>
    %255 = arith.mulf %254, %253 : vector<8x512xf32>
    %256 = arith.select %5, %255, %253 : vector<8x512xi1>, vector<8x512xf32>
    %257 = arith.negf %256 : vector<8x512xf32>
    %258 = math.exp %257 : vector<8x512xf32>
    %cst_85 = arith.constant 1.000000e+00 : f32
    %259 = vector.broadcast %cst_85 : f32 to vector<8x512xf32>
    %260 = arith.addf %259, %258 : vector<8x512xf32>
    %261 = arith.divf %259, %260 : vector<8x512xf32>
    %cst_86 = arith.constant 2.000000e+00 : f32
    %262 = vector.broadcast %cst_86 : f32 to vector<8x512xf32>
    %263 = arith.mulf %262, %261 : vector<8x512xf32>
    %cst_87 = arith.constant 1.000000e+00 : f32
    %264 = vector.broadcast %cst_87 : f32 to vector<8x512xf32>
    %265 = arith.subf %263, %264 : vector<8x512xf32>
    %266 = arith.select %5, %265, %261 : vector<8x512xi1>, vector<8x512xf32>
    %267 = vector.extract_strided_slice %266 {offsets = [0, 0], sizes = [8, 128], strides = [1, 1]} : vector<8x512xf32> to vector<8x128xf32>
    %268 = vector.extract_strided_slice %266 {offsets = [0, 128], sizes = [8, 128], strides = [1, 1]} : vector<8x512xf32> to vector<8x128xf32>
    %269 = vector.extract_strided_slice %266 {offsets = [0, 256], sizes = [8, 128], strides = [1, 1]} : vector<8x512xf32> to vector<8x128xf32>
    %270 = vector.extract_strided_slice %266 {offsets = [0, 384], sizes = [8, 128], strides = [1, 1]} : vector<8x512xf32> to vector<8x128xf32>
    %271 = arith.mulf %268, %240 : vector<8x128xf32>
    %272 = arith.mulf %267, %269 : vector<8x128xf32>
    %273 = arith.addf %271, %272 : vector<8x128xf32>
    %274 = math.tanh %273 : vector<8x128xf32>
    %275 = arith.mulf %270, %274 : vector<8x128xf32>
    %c8_i32_88 = arith.constant 8 : i32
    %276 = arith.muli %c7_i32, %c8_i32_88 : i32
    %c0_i32_89 = arith.constant 0 : i32
    %277 = arith.addi %c0_i32_89, %276 : i32
    %278 = tpu.assume_multiple %277, 8 : i32
    %279 = arith.index_cast %278 : i32 to index
    %c0_90 = arith.constant 0 : index
    %280 = vector.load %arg10[%279, %c0_90] : memref<64x128xf32, #tpu.memory_space<vmem>>, vector<8x128xf32>
    tpu.vector_store %arg10[%279, %c0_90], %275 {strides = array<i32>} : memref<64x128xf32, #tpu.memory_space<vmem>>, vector<8x128xf32>,
    %c8_i32_91 = arith.constant 8 : i32
    %c0_92 = arith.constant 0 : index
    %c0_93 = arith.constant 0 : index
    %281 = vector.load %arg6[%c0_92, %c0_93] : memref<128x512xf32, #tpu.memory_space<vmem>>, vector<128x512xf32>
    %c0_94 = arith.constant 0 : index
    %c0_95 = arith.constant 0 : index
    %282 = vector.load %arg7[%c0_94, %c0_95] : memref<1x512xf32, #tpu.memory_space<vmem>>, vector<1x512xf32>
    %cst_96 = arith.constant 0.000000e+00 : f32
    %283 = vector.broadcast %cst_96 : f32 to vector<8x128xf32>
    %cst_97 = arith.constant 0.000000e+00 : f32
    %284 = vector.broadcast %cst_97 : f32 to vector<8x128xf32>
    %c0_98 = arith.constant 0 : index
    %c0_99 = arith.constant 0 : index
    %285 = vector.load %arg10[%c0_98, %c0_99] : memref<64x128xf32, #tpu.memory_space<vmem>>, vector<64x128xf32>
    %c0_100 = arith.constant 0 : index
    %c0_101 = arith.constant 0 : index
    %286 = vector.load %arg5[%c0_100, %c0_101] : memref<128x512xf32, #tpu.memory_space<vmem>>, vector<128x512xf32>
    %cst_102 = arith.constant dense<0.000000e+00> : vector<64x512xf32>
    %287 = tpu.matmul %285, %286, %cst_102 {dimension_numbers = #tpu.dot_dimension_numbers<[1], [0], [0], [1], [0, 0, 1, 1], [], []>} : vector<64x128xf32>, vector<128x512xf32>, vector<64x512xf32> -> vector<64x512xf32>
    %288 = vector.broadcast %282 : vector<1x512xf32> to vector<64x512xf32>
    %289 = arith.addf %287, %288 : vector<64x512xf32>
    %c0_103 = arith.constant 0 : index
    %c0_104 = arith.constant 0 : index
    %290 = vector.load %arg9[%c0_103, %c0_104] : memref<64x512xf32, #tpu.memory_space<vmem>>, vector<64x512xf32>
    tpu.vector_store %arg9[%c0_103, %c0_104], %289 {strides = array<i32>} : memref<64x512xf32, #tpu.memory_space<vmem>>, vector<64x512xf32>,
    %c0_i32_105 = arith.constant 0 : i32
    %c8_i32_106 = arith.constant 8 : i32
    %291 = arith.muli %c0_i32_105, %c8_i32_106 : i32
    %292 = tpu.assume_multiple %291, 8 : i32
    %293 = arith.index_cast %292 : i32 to index
    %c0_107 = arith.constant 0 : index
    %294 = vector.load %arg9[%293, %c0_107] : memref<64x512xf32, #tpu.memory_space<vmem>>, vector<8x512xf32>
    %cst_108 = arith.constant dense<0.000000e+00> : vector<8x512xf32>
    %295 = tpu.matmul %283, %281, %cst_108 {dimension_numbers = #tpu.dot_dimension_numbers<[1], [0], [0], [1], [0, 0, 1, 1], [], []>} : vector<8x128xf32>, vector<128x512xf32>, vector<8x512xf32> -> vector<8x512xf32>
    %296 = arith.addf %294, %295 : vector<8x512xf32>
    %cst_109 = arith.constant 2.000000e+00 : f32
    %297 = vector.broadcast %cst_109 : f32 to vector<8x512xf32>
    %298 = arith.mulf %297, %296 : vector<8x512xf32>
    %299 = arith.select %5, %298, %296 : vector<8x512xi1>, vector<8x512xf32>
    %300 = arith.negf %299 : vector<8x512xf32>
    %301 = math.exp %300 : vector<8x512xf32>
    %cst_110 = arith.constant 1.000000e+00 : f32
    %302 = vector.broadcast %cst_110 : f32 to vector<8x512xf32>
    %303 = arith.addf %302, %301 : vector<8x512xf32>
    %304 = arith.divf %302, %303 : vector<8x512xf32>
    %cst_111 = arith.constant 2.000000e+00 : f32
    %305 = vector.broadcast %cst_111 : f32 to vector<8x512xf32>
    %306 = arith.mulf %305, %304 : vector<8x512xf32>
    %cst_112 = arith.constant 1.000000e+00 : f32
    %307 = vector.broadcast %cst_112 : f32 to vector<8x512xf32>
    %308 = arith.subf %306, %307 : vector<8x512xf32>
    %309 = arith.select %5, %308, %304 : vector<8x512xi1>, vector<8x512xf32>
    %310 = vector.extract_strided_slice %309 {offsets = [0, 0], sizes = [8, 128], strides = [1, 1]} : vector<8x512xf32> to vector<8x128xf32>
    %311 = vector.extract_strided_slice %309 {offsets = [0, 128], sizes = [8, 128], strides = [1, 1]} : vector<8x512xf32> to vector<8x128xf32>
    %312 = vector.extract_strided_slice %309 {offsets = [0, 256], sizes = [8, 128], strides = [1, 1]} : vector<8x512xf32> to vector<8x128xf32>
    %313 = vector.extract_strided_slice %309 {offsets = [0, 384], sizes = [8, 128], strides = [1, 1]} : vector<8x512xf32> to vector<8x128xf32>
    %314 = arith.mulf %311, %284 : vector<8x128xf32>
    %315 = arith.mulf %310, %312 : vector<8x128xf32>
    %316 = arith.addf %314, %315 : vector<8x128xf32>
    %317 = math.tanh %316 : vector<8x128xf32>
    %318 = arith.mulf %313, %317 : vector<8x128xf32>
    %c8_i32_113 = arith.constant 8 : i32
    %319 = arith.muli %c0_i32_105, %c8_i32_113 : i32
    %c0_i32_114 = arith.constant 0 : i32
    %320 = arith.addi %c0_i32_114, %319 : i32
    %321 = tpu.assume_multiple %320, 8 : i32
    %322 = arith.index_cast %321 : i32 to index
    %c0_115 = arith.constant 0 : index
    %323 = vector.load %arg10[%322, %c0_115] : memref<64x128xf32, #tpu.memory_space<vmem>>, vector<8x128xf32>
    tpu.vector_store %arg10[%322, %c0_115], %318 {strides = array<i32>} : memref<64x128xf32, #tpu.memory_space<vmem>>, vector<8x128xf32>,
    %c1_i32_116 = arith.constant 1 : i32
    %c8_i32_117 = arith.constant 8 : i32
    %324 = arith.muli %c1_i32_116, %c8_i32_117 : i32
    %325 = tpu.assume_multiple %324, 8 : i32
    %326 = arith.index_cast %325 : i32 to index
    %c0_118 = arith.constant 0 : index
    %327 = vector.load %arg9[%326, %c0_118] : memref<64x512xf32, #tpu.memory_space<vmem>>, vector<8x512xf32>
    %cst_119 = arith.constant dense<0.000000e+00> : vector<8x512xf32>
    %328 = tpu.matmul %318, %281, %cst_119 {dimension_numbers = #tpu.dot_dimension_numbers<[1], [0], [0], [1], [0, 0, 1, 1], [], []>} : vector<8x128xf32>, vector<128x512xf32>, vector<8x512xf32> -> vector<8x512xf32>
    %329 = arith.addf %327, %328 : vector<8x512xf32>
    %cst_120 = arith.constant 2.000000e+00 : f32
    %330 = vector.broadcast %cst_120 : f32 to vector<8x512xf32>
    %331 = arith.mulf %330, %329 : vector<8x512xf32>
    %332 = arith.select %5, %331, %329 : vector<8x512xi1>, vector<8x512xf32>
    %333 = arith.negf %332 : vector<8x512xf32>
    %334 = math.exp %333 : vector<8x512xf32>
    %cst_121 = arith.constant 1.000000e+00 : f32
    %335 = vector.broadcast %cst_121 : f32 to vector<8x512xf32>
    %336 = arith.addf %335, %334 : vector<8x512xf32>
    %337 = arith.divf %335, %336 : vector<8x512xf32>
    %cst_122 = arith.constant 2.000000e+00 : f32
    %338 = vector.broadcast %cst_122 : f32 to vector<8x512xf32>
    %339 = arith.mulf %338, %337 : vector<8x512xf32>
    %cst_123 = arith.constant 1.000000e+00 : f32
    %340 = vector.broadcast %cst_123 : f32 to vector<8x512xf32>
    %341 = arith.subf %339, %340 : vector<8x512xf32>
    %342 = arith.select %5, %341, %337 : vector<8x512xi1>, vector<8x512xf32>
    %343 = vector.extract_strided_slice %342 {offsets = [0, 0], sizes = [8, 128], strides = [1, 1]} : vector<8x512xf32> to vector<8x128xf32>
    %344 = vector.extract_strided_slice %342 {offsets = [0, 128], sizes = [8, 128], strides = [1, 1]} : vector<8x512xf32> to vector<8x128xf32>
    %345 = vector.extract_strided_slice %342 {offsets = [0, 256], sizes = [8, 128], strides = [1, 1]} : vector<8x512xf32> to vector<8x128xf32>
    %346 = vector.extract_strided_slice %342 {offsets = [0, 384], sizes = [8, 128], strides = [1, 1]} : vector<8x512xf32> to vector<8x128xf32>
    %347 = arith.mulf %344, %316 : vector<8x128xf32>
    %348 = arith.mulf %343, %345 : vector<8x128xf32>
    %349 = arith.addf %347, %348 : vector<8x128xf32>
    %350 = math.tanh %349 : vector<8x128xf32>
    %351 = arith.mulf %346, %350 : vector<8x128xf32>
    %c8_i32_124 = arith.constant 8 : i32
    %352 = arith.muli %c1_i32_116, %c8_i32_124 : i32
    %c0_i32_125 = arith.constant 0 : i32
    %353 = arith.addi %c0_i32_125, %352 : i32
    %354 = tpu.assume_multiple %353, 8 : i32
    %355 = arith.index_cast %354 : i32 to index
    %c0_126 = arith.constant 0 : index
    %356 = vector.load %arg10[%355, %c0_126] : memref<64x128xf32, #tpu.memory_space<vmem>>, vector<8x128xf32>
    tpu.vector_store %arg10[%355, %c0_126], %351 {strides = array<i32>} : memref<64x128xf32, #tpu.memory_space<vmem>>, vector<8x128xf32>,
    %c2_i32_127 = arith.constant 2 : i32
    %c8_i32_128 = arith.constant 8 : i32
    %357 = arith.muli %c2_i32_127, %c8_i32_128 : i32
    %358 = tpu.assume_multiple %357, 8 : i32
    %359 = arith.index_cast %358 : i32 to index
    %c0_129 = arith.constant 0 : index
    %360 = vector.load %arg9[%359, %c0_129] : memref<64x512xf32, #tpu.memory_space<vmem>>, vector<8x512xf32>
    %cst_130 = arith.constant dense<0.000000e+00> : vector<8x512xf32>
    %361 = tpu.matmul %351, %281, %cst_130 {dimension_numbers = #tpu.dot_dimension_numbers<[1], [0], [0], [1], [0, 0, 1, 1], [], []>} : vector<8x128xf32>, vector<128x512xf32>, vector<8x512xf32> -> vector<8x512xf32>
    %362 = arith.addf %360, %361 : vector<8x512xf32>
    %cst_131 = arith.constant 2.000000e+00 : f32
    %363 = vector.broadcast %cst_131 : f32 to vector<8x512xf32>
    %364 = arith.mulf %363, %362 : vector<8x512xf32>
    %365 = arith.select %5, %364, %362 : vector<8x512xi1>, vector<8x512xf32>
    %366 = arith.negf %365 : vector<8x512xf32>
    %367 = math.exp %366 : vector<8x512xf32>
    %cst_132 = arith.constant 1.000000e+00 : f32
    %368 = vector.broadcast %cst_132 : f32 to vector<8x512xf32>
    %369 = arith.addf %368, %367 : vector<8x512xf32>
    %370 = arith.divf %368, %369 : vector<8x512xf32>
    %cst_133 = arith.constant 2.000000e+00 : f32
    %371 = vector.broadcast %cst_133 : f32 to vector<8x512xf32>
    %372 = arith.mulf %371, %370 : vector<8x512xf32>
    %cst_134 = arith.constant 1.000000e+00 : f32
    %373 = vector.broadcast %cst_134 : f32 to vector<8x512xf32>
    %374 = arith.subf %372, %373 : vector<8x512xf32>
    %375 = arith.select %5, %374, %370 : vector<8x512xi1>, vector<8x512xf32>
    %376 = vector.extract_strided_slice %375 {offsets = [0, 0], sizes = [8, 128], strides = [1, 1]} : vector<8x512xf32> to vector<8x128xf32>
    %377 = vector.extract_strided_slice %375 {offsets = [0, 128], sizes = [8, 128], strides = [1, 1]} : vector<8x512xf32> to vector<8x128xf32>
    %378 = vector.extract_strided_slice %375 {offsets = [0, 256], sizes = [8, 128], strides = [1, 1]} : vector<8x512xf32> to vector<8x128xf32>
    %379 = vector.extract_strided_slice %375 {offsets = [0, 384], sizes = [8, 128], strides = [1, 1]} : vector<8x512xf32> to vector<8x128xf32>
    %380 = arith.mulf %377, %349 : vector<8x128xf32>
    %381 = arith.mulf %376, %378 : vector<8x128xf32>
    %382 = arith.addf %380, %381 : vector<8x128xf32>
    %383 = math.tanh %382 : vector<8x128xf32>
    %384 = arith.mulf %379, %383 : vector<8x128xf32>
    %c8_i32_135 = arith.constant 8 : i32
    %385 = arith.muli %c2_i32_127, %c8_i32_135 : i32
    %c0_i32_136 = arith.constant 0 : i32
    %386 = arith.addi %c0_i32_136, %385 : i32
    %387 = tpu.assume_multiple %386, 8 : i32
    %388 = arith.index_cast %387 : i32 to index
    %c0_137 = arith.constant 0 : index
    %389 = vector.load %arg10[%388, %c0_137] : memref<64x128xf32, #tpu.memory_space<vmem>>, vector<8x128xf32>
    tpu.vector_store %arg10[%388, %c0_137], %384 {strides = array<i32>} : memref<64x128xf32, #tpu.memory_space<vmem>>, vector<8x128xf32>,
    %c3_i32_138 = arith.constant 3 : i32
    %c8_i32_139 = arith.constant 8 : i32
    %390 = arith.muli %c3_i32_138, %c8_i32_139 : i32
    %391 = tpu.assume_multiple %390, 8 : i32
    %392 = arith.index_cast %391 : i32 to index
    %c0_140 = arith.constant 0 : index
    %393 = vector.load %arg9[%392, %c0_140] : memref<64x512xf32, #tpu.memory_space<vmem>>, vector<8x512xf32>
    %cst_141 = arith.constant dense<0.000000e+00> : vector<8x512xf32>
    %394 = tpu.matmul %384, %281, %cst_141 {dimension_numbers = #tpu.dot_dimension_numbers<[1], [0], [0], [1], [0, 0, 1, 1], [], []>} : vector<8x128xf32>, vector<128x512xf32>, vector<8x512xf32> -> vector<8x512xf32>
    %395 = arith.addf %393, %394 : vector<8x512xf32>
    %cst_142 = arith.constant 2.000000e+00 : f32
    %396 = vector.broadcast %cst_142 : f32 to vector<8x512xf32>
    %397 = arith.mulf %396, %395 : vector<8x512xf32>
    %398 = arith.select %5, %397, %395 : vector<8x512xi1>, vector<8x512xf32>
    %399 = arith.negf %398 : vector<8x512xf32>
    %400 = math.exp %399 : vector<8x512xf32>
    %cst_143 = arith.constant 1.000000e+00 : f32
    %401 = vector.broadcast %cst_143 : f32 to vector<8x512xf32>
    %402 = arith.addf %401, %400 : vector<8x512xf32>
    %403 = arith.divf %401, %402 : vector<8x512xf32>
    %cst_144 = arith.constant 2.000000e+00 : f32
    %404 = vector.broadcast %cst_144 : f32 to vector<8x512xf32>
    %405 = arith.mulf %404, %403 : vector<8x512xf32>
    %cst_145 = arith.constant 1.000000e+00 : f32
    %406 = vector.broadcast %cst_145 : f32 to vector<8x512xf32>
    %407 = arith.subf %405, %406 : vector<8x512xf32>
    %408 = arith.select %5, %407, %403 : vector<8x512xi1>, vector<8x512xf32>
    %409 = vector.extract_strided_slice %408 {offsets = [0, 0], sizes = [8, 128], strides = [1, 1]} : vector<8x512xf32> to vector<8x128xf32>
    %410 = vector.extract_strided_slice %408 {offsets = [0, 128], sizes = [8, 128], strides = [1, 1]} : vector<8x512xf32> to vector<8x128xf32>
    %411 = vector.extract_strided_slice %408 {offsets = [0, 256], sizes = [8, 128], strides = [1, 1]} : vector<8x512xf32> to vector<8x128xf32>
    %412 = vector.extract_strided_slice %408 {offsets = [0, 384], sizes = [8, 128], strides = [1, 1]} : vector<8x512xf32> to vector<8x128xf32>
    %413 = arith.mulf %410, %382 : vector<8x128xf32>
    %414 = arith.mulf %409, %411 : vector<8x128xf32>
    %415 = arith.addf %413, %414 : vector<8x128xf32>
    %416 = math.tanh %415 : vector<8x128xf32>
    %417 = arith.mulf %412, %416 : vector<8x128xf32>
    %c8_i32_146 = arith.constant 8 : i32
    %418 = arith.muli %c3_i32_138, %c8_i32_146 : i32
    %c0_i32_147 = arith.constant 0 : i32
    %419 = arith.addi %c0_i32_147, %418 : i32
    %420 = tpu.assume_multiple %419, 8 : i32
    %421 = arith.index_cast %420 : i32 to index
    %c0_148 = arith.constant 0 : index
    %422 = vector.load %arg10[%421, %c0_148] : memref<64x128xf32, #tpu.memory_space<vmem>>, vector<8x128xf32>
    tpu.vector_store %arg10[%421, %c0_148], %417 {strides = array<i32>} : memref<64x128xf32, #tpu.memory_space<vmem>>, vector<8x128xf32>,
    %c4_i32_149 = arith.constant 4 : i32
    %c8_i32_150 = arith.constant 8 : i32
    %423 = arith.muli %c4_i32_149, %c8_i32_150 : i32
    %424 = tpu.assume_multiple %423, 8 : i32
    %425 = arith.index_cast %424 : i32 to index
    %c0_151 = arith.constant 0 : index
    %426 = vector.load %arg9[%425, %c0_151] : memref<64x512xf32, #tpu.memory_space<vmem>>, vector<8x512xf32>
    %cst_152 = arith.constant dense<0.000000e+00> : vector<8x512xf32>
    %427 = tpu.matmul %417, %281, %cst_152 {dimension_numbers = #tpu.dot_dimension_numbers<[1], [0], [0], [1], [0, 0, 1, 1], [], []>} : vector<8x128xf32>, vector<128x512xf32>, vector<8x512xf32> -> vector<8x512xf32>
    %428 = arith.addf %426, %427 : vector<8x512xf32>
    %cst_153 = arith.constant 2.000000e+00 : f32
    %429 = vector.broadcast %cst_153 : f32 to vector<8x512xf32>
    %430 = arith.mulf %429, %428 : vector<8x512xf32>
    %431 = arith.select %5, %430, %428 : vector<8x512xi1>, vector<8x512xf32>
    %432 = arith.negf %431 : vector<8x512xf32>
    %433 = math.exp %432 : vector<8x512xf32>
    %cst_154 = arith.constant 1.000000e+00 : f32
    %434 = vector.broadcast %cst_154 : f32 to vector<8x512xf32>
    %435 = arith.addf %434, %433 : vector<8x512xf32>
    %436 = arith.divf %434, %435 : vector<8x512xf32>
    %cst_155 = arith.constant 2.000000e+00 : f32
    %437 = vector.broadcast %cst_155 : f32 to vector<8x512xf32>
    %438 = arith.mulf %437, %436 : vector<8x512xf32>
    %cst_156 = arith.constant 1.000000e+00 : f32
    %439 = vector.broadcast %cst_156 : f32 to vector<8x512xf32>
    %440 = arith.subf %438, %439 : vector<8x512xf32>
    %441 = arith.select %5, %440, %436 : vector<8x512xi1>, vector<8x512xf32>
    %442 = vector.extract_strided_slice %441 {offsets = [0, 0], sizes = [8, 128], strides = [1, 1]} : vector<8x512xf32> to vector<8x128xf32>
    %443 = vector.extract_strided_slice %441 {offsets = [0, 128], sizes = [8, 128], strides = [1, 1]} : vector<8x512xf32> to vector<8x128xf32>
    %444 = vector.extract_strided_slice %441 {offsets = [0, 256], sizes = [8, 128], strides = [1, 1]} : vector<8x512xf32> to vector<8x128xf32>
    %445 = vector.extract_strided_slice %441 {offsets = [0, 384], sizes = [8, 128], strides = [1, 1]} : vector<8x512xf32> to vector<8x128xf32>
    %446 = arith.mulf %443, %415 : vector<8x128xf32>
    %447 = arith.mulf %442, %444 : vector<8x128xf32>
    %448 = arith.addf %446, %447 : vector<8x128xf32>
    %449 = math.tanh %448 : vector<8x128xf32>
    %450 = arith.mulf %445, %449 : vector<8x128xf32>
    %c8_i32_157 = arith.constant 8 : i32
    %451 = arith.muli %c4_i32_149, %c8_i32_157 : i32
    %c0_i32_158 = arith.constant 0 : i32
    %452 = arith.addi %c0_i32_158, %451 : i32
    %453 = tpu.assume_multiple %452, 8 : i32
    %454 = arith.index_cast %453 : i32 to index
    %c0_159 = arith.constant 0 : index
    %455 = vector.load %arg10[%454, %c0_159] : memref<64x128xf32, #tpu.memory_space<vmem>>, vector<8x128xf32>
    tpu.vector_store %arg10[%454, %c0_159], %450 {strides = array<i32>} : memref<64x128xf32, #tpu.memory_space<vmem>>, vector<8x128xf32>,
    %c5_i32_160 = arith.constant 5 : i32
    %c8_i32_161 = arith.constant 8 : i32
    %456 = arith.muli %c5_i32_160, %c8_i32_161 : i32
    %457 = tpu.assume_multiple %456, 8 : i32
    %458 = arith.index_cast %457 : i32 to index
    %c0_162 = arith.constant 0 : index
    %459 = vector.load %arg9[%458, %c0_162] : memref<64x512xf32, #tpu.memory_space<vmem>>, vector<8x512xf32>
    %cst_163 = arith.constant dense<0.000000e+00> : vector<8x512xf32>
    %460 = tpu.matmul %450, %281, %cst_163 {dimension_numbers = #tpu.dot_dimension_numbers<[1], [0], [0], [1], [0, 0, 1, 1], [], []>} : vector<8x128xf32>, vector<128x512xf32>, vector<8x512xf32> -> vector<8x512xf32>
    %461 = arith.addf %459, %460 : vector<8x512xf32>
    %cst_164 = arith.constant 2.000000e+00 : f32
    %462 = vector.broadcast %cst_164 : f32 to vector<8x512xf32>
    %463 = arith.mulf %462, %461 : vector<8x512xf32>
    %464 = arith.select %5, %463, %461 : vector<8x512xi1>, vector<8x512xf32>
    %465 = arith.negf %464 : vector<8x512xf32>
    %466 = math.exp %465 : vector<8x512xf32>
    %cst_165 = arith.constant 1.000000e+00 : f32
    %467 = vector.broadcast %cst_165 : f32 to vector<8x512xf32>
    %468 = arith.addf %467, %466 : vector<8x512xf32>
    %469 = arith.divf %467, %468 : vector<8x512xf32>
    %cst_166 = arith.constant 2.000000e+00 : f32
    %470 = vector.broadcast %cst_166 : f32 to vector<8x512xf32>
    %471 = arith.mulf %470, %469 : vector<8x512xf32>
    %cst_167 = arith.constant 1.000000e+00 : f32
    %472 = vector.broadcast %cst_167 : f32 to vector<8x512xf32>
    %473 = arith.subf %471, %472 : vector<8x512xf32>
    %474 = arith.select %5, %473, %469 : vector<8x512xi1>, vector<8x512xf32>
    %475 = vector.extract_strided_slice %474 {offsets = [0, 0], sizes = [8, 128], strides = [1, 1]} : vector<8x512xf32> to vector<8x128xf32>
    %476 = vector.extract_strided_slice %474 {offsets = [0, 128], sizes = [8, 128], strides = [1, 1]} : vector<8x512xf32> to vector<8x128xf32>
    %477 = vector.extract_strided_slice %474 {offsets = [0, 256], sizes = [8, 128], strides = [1, 1]} : vector<8x512xf32> to vector<8x128xf32>
    %478 = vector.extract_strided_slice %474 {offsets = [0, 384], sizes = [8, 128], strides = [1, 1]} : vector<8x512xf32> to vector<8x128xf32>
    %479 = arith.mulf %476, %448 : vector<8x128xf32>
    %480 = arith.mulf %475, %477 : vector<8x128xf32>
    %481 = arith.addf %479, %480 : vector<8x128xf32>
    %482 = math.tanh %481 : vector<8x128xf32>
    %483 = arith.mulf %478, %482 : vector<8x128xf32>
    %c8_i32_168 = arith.constant 8 : i32
    %484 = arith.muli %c5_i32_160, %c8_i32_168 : i32
    %c0_i32_169 = arith.constant 0 : i32
    %485 = arith.addi %c0_i32_169, %484 : i32
    %486 = tpu.assume_multiple %485, 8 : i32
    %487 = arith.index_cast %486 : i32 to index
    %c0_170 = arith.constant 0 : index
    %488 = vector.load %arg10[%487, %c0_170] : memref<64x128xf32, #tpu.memory_space<vmem>>, vector<8x128xf32>
    tpu.vector_store %arg10[%487, %c0_170], %483 {strides = array<i32>} : memref<64x128xf32, #tpu.memory_space<vmem>>, vector<8x128xf32>,
    %c6_i32_171 = arith.constant 6 : i32
    %c8_i32_172 = arith.constant 8 : i32
    %489 = arith.muli %c6_i32_171, %c8_i32_172 : i32
    %490 = tpu.assume_multiple %489, 8 : i32
    %491 = arith.index_cast %490 : i32 to index
    %c0_173 = arith.constant 0 : index
    %492 = vector.load %arg9[%491, %c0_173] : memref<64x512xf32, #tpu.memory_space<vmem>>, vector<8x512xf32>
    %cst_174 = arith.constant dense<0.000000e+00> : vector<8x512xf32>
    %493 = tpu.matmul %483, %281, %cst_174 {dimension_numbers = #tpu.dot_dimension_numbers<[1], [0], [0], [1], [0, 0, 1, 1], [], []>} : vector<8x128xf32>, vector<128x512xf32>, vector<8x512xf32> -> vector<8x512xf32>
    %494 = arith.addf %492, %493 : vector<8x512xf32>
    %cst_175 = arith.constant 2.000000e+00 : f32
    %495 = vector.broadcast %cst_175 : f32 to vector<8x512xf32>
    %496 = arith.mulf %495, %494 : vector<8x512xf32>
    %497 = arith.select %5, %496, %494 : vector<8x512xi1>, vector<8x512xf32>
    %498 = arith.negf %497 : vector<8x512xf32>
    %499 = math.exp %498 : vector<8x512xf32>
    %cst_176 = arith.constant 1.000000e+00 : f32
    %500 = vector.broadcast %cst_176 : f32 to vector<8x512xf32>
    %501 = arith.addf %500, %499 : vector<8x512xf32>
    %502 = arith.divf %500, %501 : vector<8x512xf32>
    %cst_177 = arith.constant 2.000000e+00 : f32
    %503 = vector.broadcast %cst_177 : f32 to vector<8x512xf32>
    %504 = arith.mulf %503, %502 : vector<8x512xf32>
    %cst_178 = arith.constant 1.000000e+00 : f32
    %505 = vector.broadcast %cst_178 : f32 to vector<8x512xf32>
    %506 = arith.subf %504, %505 : vector<8x512xf32>
    %507 = arith.select %5, %506, %502 : vector<8x512xi1>, vector<8x512xf32>
    %508 = vector.extract_strided_slice %507 {offsets = [0, 0], sizes = [8, 128], strides = [1, 1]} : vector<8x512xf32> to vector<8x128xf32>
    %509 = vector.extract_strided_slice %507 {offsets = [0, 128], sizes = [8, 128], strides = [1, 1]} : vector<8x512xf32> to vector<8x128xf32>
    %510 = vector.extract_strided_slice %507 {offsets = [0, 256], sizes = [8, 128], strides = [1, 1]} : vector<8x512xf32> to vector<8x128xf32>
    %511 = vector.extract_strided_slice %507 {offsets = [0, 384], sizes = [8, 128], strides = [1, 1]} : vector<8x512xf32> to vector<8x128xf32>
    %512 = arith.mulf %509, %481 : vector<8x128xf32>
    %513 = arith.mulf %508, %510 : vector<8x128xf32>
    %514 = arith.addf %512, %513 : vector<8x128xf32>
    %515 = math.tanh %514 : vector<8x128xf32>
    %516 = arith.mulf %511, %515 : vector<8x128xf32>
    %c8_i32_179 = arith.constant 8 : i32
    %517 = arith.muli %c6_i32_171, %c8_i32_179 : i32
    %c0_i32_180 = arith.constant 0 : i32
    %518 = arith.addi %c0_i32_180, %517 : i32
    %519 = tpu.assume_multiple %518, 8 : i32
    %520 = arith.index_cast %519 : i32 to index
    %c0_181 = arith.constant 0 : index
    %521 = vector.load %arg10[%520, %c0_181] : memref<64x128xf32, #tpu.memory_space<vmem>>, vector<8x128xf32>
    tpu.vector_store %arg10[%520, %c0_181], %516 {strides = array<i32>} : memref<64x128xf32, #tpu.memory_space<vmem>>, vector<8x128xf32>,
    %c7_i32_182 = arith.constant 7 : i32
    %c8_i32_183 = arith.constant 8 : i32
    %522 = arith.muli %c7_i32_182, %c8_i32_183 : i32
    %523 = tpu.assume_multiple %522, 8 : i32
    %524 = arith.index_cast %523 : i32 to index
    %c0_184 = arith.constant 0 : index
    %525 = vector.load %arg9[%524, %c0_184] : memref<64x512xf32, #tpu.memory_space<vmem>>, vector<8x512xf32>
    %cst_185 = arith.constant dense<0.000000e+00> : vector<8x512xf32>
    %526 = tpu.matmul %516, %281, %cst_185 {dimension_numbers = #tpu.dot_dimension_numbers<[1], [0], [0], [1], [0, 0, 1, 1], [], []>} : vector<8x128xf32>, vector<128x512xf32>, vector<8x512xf32> -> vector<8x512xf32>
    %527 = arith.addf %525, %526 : vector<8x512xf32>
    %cst_186 = arith.constant 2.000000e+00 : f32
    %528 = vector.broadcast %cst_186 : f32 to vector<8x512xf32>
    %529 = arith.mulf %528, %527 : vector<8x512xf32>
    %530 = arith.select %5, %529, %527 : vector<8x512xi1>, vector<8x512xf32>
    %531 = arith.negf %530 : vector<8x512xf32>
    %532 = math.exp %531 : vector<8x512xf32>
    %cst_187 = arith.constant 1.000000e+00 : f32
    %533 = vector.broadcast %cst_187 : f32 to vector<8x512xf32>
    %534 = arith.addf %533, %532 : vector<8x512xf32>
    %535 = arith.divf %533, %534 : vector<8x512xf32>
    %cst_188 = arith.constant 2.000000e+00 : f32
    %536 = vector.broadcast %cst_188 : f32 to vector<8x512xf32>
    %537 = arith.mulf %536, %535 : vector<8x512xf32>
    %cst_189 = arith.constant 1.000000e+00 : f32
    %538 = vector.broadcast %cst_189 : f32 to vector<8x512xf32>
    %539 = arith.subf %537, %538 : vector<8x512xf32>
    %540 = arith.select %5, %539, %535 : vector<8x512xi1>, vector<8x512xf32>
    %541 = vector.extract_strided_slice %540 {offsets = [0, 0], sizes = [8, 128], strides = [1, 1]} : vector<8x512xf32> to vector<8x128xf32>
    %542 = vector.extract_strided_slice %540 {offsets = [0, 128], sizes = [8, 128], strides = [1, 1]} : vector<8x512xf32> to vector<8x128xf32>
    %543 = vector.extract_strided_slice %540 {offsets = [0, 256], sizes = [8, 128], strides = [1, 1]} : vector<8x512xf32> to vector<8x128xf32>
    %544 = vector.extract_strided_slice %540 {offsets = [0, 384], sizes = [8, 128], strides = [1, 1]} : vector<8x512xf32> to vector<8x128xf32>
    %545 = arith.mulf %542, %514 : vector<8x128xf32>
    %546 = arith.mulf %541, %543 : vector<8x128xf32>
    %547 = arith.addf %545, %546 : vector<8x128xf32>
    %548 = math.tanh %547 : vector<8x128xf32>
    %549 = arith.mulf %544, %548 : vector<8x128xf32>
    %c8_i32_190 = arith.constant 8 : i32
    %550 = arith.muli %c7_i32_182, %c8_i32_190 : i32
    %c0_i32_191 = arith.constant 0 : i32
    %551 = arith.addi %c0_i32_191, %550 : i32
    %552 = tpu.assume_multiple %551, 8 : i32
    %553 = arith.index_cast %552 : i32 to index
    %c0_192 = arith.constant 0 : index
    %554 = vector.load %arg10[%553, %c0_192] : memref<64x128xf32, #tpu.memory_space<vmem>>, vector<8x128xf32>
    tpu.vector_store %arg10[%553, %c0_192], %549 {strides = array<i32>} : memref<64x128xf32, #tpu.memory_space<vmem>>, vector<8x128xf32>,
    %c8_i32_193 = arith.constant 8 : i32
    %c32 = arith.constant 32 : index
    %c0_194 = arith.constant 0 : index
    %555 = vector.load %arg10[%c32, %c0_194] : memref<64x128xf32, #tpu.memory_space<vmem>>, vector<32x128xf32>
    %c0_195 = arith.constant 0 : index
    %c0_196 = arith.constant 0 : index
    %c0_197 = arith.constant 0 : index
    %556 = vector.load %arg8[%c0_195, %c0_196, %c0_197] : memref<1x32x128xf32, #tpu.memory_space<vmem>>, vector<1x32x128xf32>
    %557 = vector.shape_cast %556 : vector<1x32x128xf32> to vector<32x128xf32>
    %558 = vector.shape_cast %555 : vector<32x128xf32> to vector<1x32x128xf32>
    tpu.vector_store %arg8[%c0_195, %c0_196, %c0_197], %558 {strides = array<i32>} : memref<1x32x128xf32, #tpu.memory_space<vmem>>, vector<1x32x128xf32>,
    return
  }
  func.func @transform_0(%arg0: i32) -> (i32, i32, i32) {
    %c0_i32 = arith.constant 0 : i32
    %c0_i32_0 = arith.constant 0 : i32
    %c0_i32_1 = arith.constant 0 : i32
    return %arg0, %c0_i32, %c0_i32_0 : i32, i32, i32
  }
  func.func @transform_1(%arg0: i32) -> (i32, i32) {
    %c0_i32 = arith.constant 0 : i32
    %c0_i32_0 = arith.constant 0 : i32
    %c0_i32_1 = arith.constant 0 : i32
    return %c0_i32, %c0_i32_0 : i32, i32
  }
  func.func @transform_2(%arg0: i32) -> (i32, i32) {
    %c0_i32 = arith.constant 0 : i32
    %c0_i32_0 = arith.constant 0 : i32
    %c0_i32_1 = arith.constant 0 : i32
    return %c0_i32, %c0_i32_0 : i32, i32
  }
  func.func @transform_3(%arg0: i32) -> (i32, i32) {
    %c0_i32 = arith.constant 0 : i32
    %c0_i32_0 = arith.constant 0 : i32
    %c0_i32_1 = arith.constant 0 : i32
    return %c0_i32, %c0_i32_0 : i32, i32
  }
  func.func @transform_4(%arg0: i32) -> (i32, i32) {
    %c0_i32 = arith.constant 0 : i32
    %c0_i32_0 = arith.constant 0 : i32
    %c0_i32_1 = arith.constant 0 : i32
    return %c0_i32, %c0_i32_0 : i32, i32
  }
  func.func @transform_5(%arg0: i32) -> (i32, i32) {
    %c0_i32 = arith.constant 0 : i32
    %c0_i32_0 = arith.constant 0 : i32
    %c0_i32_1 = arith.constant 0 : i32
    return %c0_i32, %c0_i32_0 : i32, i32
  }
  func.func @transform_6(%arg0: i32) -> (i32, i32) {
    %c0_i32 = arith.constant 0 : i32
    %c0_i32_0 = arith.constant 0 : i32
    %c0_i32_1 = arith.constant 0 : i32
    return %c0_i32, %c0_i32_0 : i32, i32
  }
  func.func @transform_7(%arg0: i32) -> (i32, i32, i32) {
    %c0_i32 = arith.constant 0 : i32
    %c0_i32_0 = arith.constant 0 : i32
    %c0_i32_1 = arith.constant 0 : i32
    return %arg0, %c0_i32, %c0_i32_0 : i32, i32, i32
  }
}

</mosaic_0001>

<bundles_post_ra>
// kernel: lstm_forward.1
= control target key start
LH: loop header
LB: loop body
LE: loop exit
PB: predicated region body
PF: predicated region fallthrough
CT: control target
= control target key end

     0   :  { %12 = vsyncpa [#allocation5], 0  ;;  %s6953_s0 = inlined_call_operand.vmem [shape: f32[1,64,16], index: 0, kind: input, shape index: {}]   ;;  %s6954_s1 = inlined_call_operand.vmem [shape: f32[16,512], index: 1, kind: input, shape index: {}]   ;;  %s6955_s2 = inlined_call_operand.hbm [shape: f32[128,512], index: 2, kind: input, shape index: {}]   ;;  %s6956_s3 = inlined_call_operand.vmem [shape: f32[1,512], index: 3, kind: input, shape index: {}]   ;;  %s6957_s4 = inlined_call_operand.hbm [shape: f32[128,512], index: 4, kind: input, shape index: {}]   ;;  %s6958_s5 = inlined_call_operand.hbm [shape: f32[128,512], index: 5, kind: input, shape index: {}]   ;;  %s6959_s6 = inlined_call_operand.vmem [shape: f32[1,512], index: 6, kind: input, shape index: {}]   ;;  %s6960_s7 = inlined_call_operand.vmem [shape: f32[1,32,128], index: 7, kind: output, shape index: {}]  }
   0x1   :  { %13 = vsyncpa [#allocation7], 0  ;;  %s5869_s24 = smov [#allocation6]   ;;  %s5870_s26 = smov [#allocation4]  }
   0x2   :  { %s37_s25 = sshll.u32 %s5869_s24, 4  ;;  %s23_s27 = sshll.u32 %s5870_s26, 4  ;;  %s38_s25 = int_to_ptr.vmem [resolvable:$true] %s37_s25  ;;  %s5915_s27 = int_to_ptr.vmem [resolvable:$true] %s23_s27 }
   0x3   :  { %s5799_s30 = scalar_lea.hbm %s6957_s4, 8192 }
   0x4   :  { %p5800_p0 = scmp.ne.s32.totalorder %s6957_s4, %s5799_s30  ;;  %p5803_p1 = scmp.lt.u32.totalorder %s5799_s30, %s6957_s4 }
   0x6   :  { %p5805_p2 = pnand %p5803_p1, %p5800_p0 }
   0x8   :  { %5808 = shalt.err (!%p5805_p2)
}
   0x9   :  { %s5809_s12 = scalar_lea.vmem %s38_s25, 8192  ;;  %p5814_p4 = scmp.lt.s32.totalorder %s38_s25, %s38_s25 }
   0xa   :  { %p5810_p3 = scmp.ne.s32.totalorder %s38_s25, %s5809_s12  ;;  %p5815_p5 = scmp.lt.s32.totalorder %s5809_s12, %s5809_s12 }
   0xc   :  { %p5816_p6 = por %p5815_p5, %p5814_p4 }
   0xe   :  { %p5817_p7 = pnand %p5816_p6, %p5810_p3 }
  0x10   :  { %5820 = shalt.err (!%p5817_p7)
}
  0x11   :  { %s5871_s13 = smov 512   ;;  %s5872_s14 = smov 32  }
  0x12   :  { %43 = dma.hbm_to_vmem [thread:$0]  %s6957_s4, 8192, %s38_s25, [#allocation7], %s5871_s13, %s5871_s13, %s5872_s14  }
  0x13   :  { %s5821_s19 = scalar_lea.hbm %s6955_s2, 8192 }
  0x14   :  { %p5822_p8 = scmp.ne.s32.totalorder %s6955_s2, %s5821_s19  ;;  %p5825_p9 = scmp.lt.u32.totalorder %s5821_s19, %s6955_s2 }
  0x16   :  { %p5827_p10 = pnand %p5825_p9, %p5822_p8 }
  0x18   :  { %5830 = shalt.err (!%p5827_p10)
}
  0x19   :  { %s5831_s24 = scalar_lea.vmem %s5915_s27, 8192  ;;  %p5836_p12 = scmp.lt.s32.totalorder %s5915_s27, %s5915_s27 }
  0x1a   :  { %p5832_p11 = scmp.ne.s32.totalorder %s5915_s27, %s5831_s24  ;;  %p5837_p13 = scmp.lt.s32.totalorder %s5831_s24, %s5831_s24 }
  0x1c   :  { %p5838_p0 = por %p5837_p13, %p5836_p12 }
  0x1e   :  { %p5839_p1 = pnand %p5838_p0, %p5832_p11 }
  0x20   :  { %5842 = shalt.err (!%p5839_p1)
}
  0x21   :  { %29 = dma.hbm_to_vmem [thread:$0]  %s6955_s2, 8192, %s5915_s27, [#allocation5], %s5871_s13, %s5871_s13, %s5872_s14  }
  0x22   :  { %s5873_s26 = smov [#allocation8]   ;;  %s5843_s8 = scalar_lea.hbm %s6958_s5, 8192 }
  0x23   :  { %s49_s28 = sshll.u32 %s5873_s26, 4  ;;  %p5844_p2 = scmp.ne.s32.totalorder %s6958_s5, %s5843_s8  ;;  %s50_s28 = int_to_ptr.vmem [resolvable:$true] %s49_s28 }
  0x24   :  { %p5847_p3 = scmp.lt.u32.totalorder %s5843_s8, %s6958_s5 }
  0x26   :  { %p5849_p4 = pnand %p5847_p3, %p5844_p2 }
  0x28   :  { %5852 = shalt.err (!%p5849_p4)
}
  0x29   :  { %s5853_s15 = scalar_lea.vmem %s50_s28, 8192  ;;  %p5858_p6 = scmp.lt.s32.totalorder %s50_s28, %s50_s28 }
  0x2a   :  { %p5854_p5 = scmp.ne.s32.totalorder %s50_s28, %s5853_s15  ;;  %p5859_p7 = scmp.lt.s32.totalorder %s5853_s15, %s5853_s15 }
  0x2c   :  { %p5860_p8 = por %p5859_p7, %p5858_p6 }
  0x2e   :  { %p5861_p9 = pnand %p5860_p8, %p5854_p5 }
  0x30   :  { %5864 = shalt.err (!%p5861_p9)
}
  0x31   :  { %55 = dma.hbm_to_vmem [thread:$0]  %s6958_s5, 8192, %s50_s28, [#allocation7], %s5871_s13, %s5871_s13, %s5872_s14  }
  0x32   :  { %5865 = dma.done.wait [#allocation5], 8192  }
  0x33   :  { %5866 = vsyncadd [#allocation5], 4294959104 }
  0x34   :  { %5867 = dma.done.wait [#allocation7], 16384  }
  0x35   :  { %5868 = vsyncadd [#allocation7], 4294950912  ;;  %v5874_v0 = vmov 0.0   ;;  %v158_v1 = vld [vmem:[%s6954_s1 + $0x8] sm:$0xff]  ;;  %v160_v3 = vld [vmem:[%s6954_s1 + $0x18] sm:$0xff]  ;;  %vm186_vm0 = vcmask 130048  }
  0x36   :  { %275 = vmatprep.mubr.f32.mxu0 %v5874_v0  ;;  %388 = vmatprep.mubr.f32.mxu1 %v5874_v0  ;;  %v162_v2 = vld [vmem:[%s6954_s1 + $0x28] sm:$0xff]  ;;  %v164_v5 = vld [vmem:[%s6954_s1 + $0x38] sm:$0xff]  ;;  %v157_v6 = vld [vmem:[%s6954_s1] sm:$0xff] }
  0x37   :  { %v4281_v4 = vpack.c.bf16 %v162_v2, %v158_v1  ;;  %v161_v7 = vld [vmem:[%s6954_s1 + $0x20] sm:$0xff]  ;;  %v4285_v8 = vpack.c.bf16 %v164_v5, %v160_v3  ;;  %v159_v10 = vld [vmem:[%s6954_s1 + $0x10] sm:$0xff]  ;;  %v85_v14 = vld [vmem:[#allocation4 + $0x8] sm:$0xff] }
  0x38   :  { %v4283_v9 = vpack.c.bf16 %v161_v7, %v157_v6  ;;  %v163_v11 = vld [vmem:[%s6954_s1 + $0x30] sm:$0xff]  ;;  %v149_v12 = vld [vmem:[%s6953_s0] sm:$0xff]  ;;  %v89_v15 = vld [vmem:[#allocation4 + $0x28] sm:$0xff] }
  0x39   :  { %4282 = vmatprep.subr.bf16.mxu0 %v4281_v4  ;;  %v4287_v13 = vpack.c.bf16 %v163_v11, %v159_v10  ;;  %v87_v16 = vld [vmem:[#allocation4 + $0x18] sm:$0xff]  ;;  %4286 = vmatprep.subr.bf16.mxu1 %v4285_v8  ;;  %v5996_v17 = vpack.c.bf16 %v89_v15, %v85_v14  ;;  %v84_v19 = vld [vmem:[#allocation4] sm:$0xff]  ;;  %v86_v23 = vld [vmem:[#allocation4 + $0x10] sm:$0xff] }
  0x3a   :  { %4284 = vmatpush1.bf16.msra.mxu0 %v4283_v9  ;;  %v91_v18 = vld [vmem:[#allocation4 + $0x38] sm:$0xff]  ;;  %v88_v20 = vld [vmem:[#allocation4 + $0x20] sm:$0xff]  ;;  %v90_v24 = vld [vmem:[#allocation4 + $0x30] sm:$0xff] }
  0x3b   :  { %4288 = vmatpush1.bf16.msra.mxu1 %v4287_v13  ;;  %v5998_v21 = vpack.c.bf16 %v91_v18, %v87_v16  ;;  %v6000_v22 = vpack.c.bf16 %v88_v20, %v84_v19  ;;  %4290 = vmatprep.subr.bf16.mxu0 %v5996_v17  ;;  %v6003_v25 = vpack.c.bf16 %v90_v24, %v86_v23  ;;  %v93_v26 = vld [vmem:[#allocation4 + $0x48] sm:$0xff]  ;;  %v95_v28 = vld [vmem:[#allocation4 + $0x58] sm:$0xff]  ;;  %v92_v31 = vld [vmem:[#allocation4 + $0x40] sm:$0xff] }
  0x3c   :  { %v97_v27 = vld [vmem:[#allocation4 + $0x68] sm:$0xff]  ;;  %v99_v30 = vld [vmem:[#allocation4 + $0x78] sm:$0xff]  ;;  %v96_v32 = vld [vmem:[#allocation4 + $0x60] sm:$0xff] }
  0x3d   :  { %4137 = vmatmul.mubr.msk.f32.vlgmr.msra.gmra.mrb[0].mxu0 %vm186_vm0, %v149_v12  ;;  %4322 = vmatprep.subr.bf16.mxu1 %v5998_v21  ;;  %v6007_v29 = vpack.c.bf16 %v97_v27, %v93_v26  ;;  %v150_v33 = vld [vmem:[%s6953_s0 + $0x8] sm:$0xff]  ;;  %v6014_v34 = vpack.c.bf16 %v99_v30, %v95_v28  ;;  %v6016_v35 = vpack.c.bf16 %v96_v32, %v92_v31  ;;  %v94_v36 = vld [vmem:[#allocation4 + $0x50] sm:$0xff]  ;;  %v103_v41 = vld [vmem:[#allocation4 + $0x98] sm:$0xff] }
  0x3e   :  { %4145 = vmatmul.mubr.msk.f32.vlgmr.msra.gmra.mrb[0].mxu1 %vm186_vm0, %v149_v12  ;;  %4292 = vmatpush1.bf16.msra.mxu0 %v6000_v22  ;;  %v98_v37 = vld [vmem:[#allocation4 + $0x70] sm:$0xff]  ;;  %v101_v39 = vld [vmem:[#allocation4 + $0x88] sm:$0xff]  ;;  %v107_v43 = vld [vmem:[#allocation4 + $0xb8] sm:$0xff] }
  0x3f   :  { %4324 = vmatpush1.bf16.msra.mxu1 %v6003_v25  ;;  %281 = vmatprep.mubr.f32.mxu0 %v5874_v0  ;;  %v6020_v38 = vpack.c.bf16 %v98_v37, %v94_v36  ;;  %v105_v40 = vld [vmem:[#allocation4 + $0xa8] sm:$0xff]  ;;  %v100_v44 = vld [vmem:[#allocation4 + $0x80] sm:$0xff]  ;;  %v151_v46 = vld [vmem:[%s6953_s0 + $0x10] sm:$0xff]  ;;  %v6031_v47 = vpack.c.bf16 %v107_v43, %v103_v41 }
  0x40   :  { %394 = vmatprep.mubr.f32.mxu1 %v5874_v0  ;;  %4294 = vmatprep.subr.bf16.mxu0 %v6007_v29  ;;  %v6024_v42 = vpack.c.bf16 %v105_v40, %v101_v39  ;;  %v104_v45 = vld [vmem:[#allocation4 + $0xa0] sm:$0xff]  ;;  %v102_v48 = vld [vmem:[#allocation4 + $0x90] sm:$0xff]  ;;  %v109_v51 = vld [vmem:[#allocation4 + $0xc8] sm:$0xff] }
  0x41   :  { %4138 = vmatmul.mubr.msk.f32.gmra.mrb[2].mxu0 %vm186_vm0, %v150_v33  ;;  %4326 = vmatprep.subr.bf16.mxu1 %v6014_v34  ;;  %v106_v49 = vld [vmem:[#allocation4 + $0xb0] sm:$0xff]  ;;  %v6035_v50 = vpack.c.bf16 %v104_v45, %v100_v44  ;;  %v113_v52 = vld [vmem:[#allocation4 + $0xe8] sm:$0xff]  ;;  %v111_v53 = vld [vmem:[#allocation4 + $0xd8] sm:$0xff] }
  0x42   :  { %4146 = vmatmul.mubr.msk.f32.gmra.mrb[2].mxu1 %vm186_vm0, %v150_v33  ;;  %4296 = vmatpush1.bf16.msra.mxu0 %v6016_v35  ;;  %v6039_v54 = vpack.c.bf16 %v106_v49, %v102_v48  ;;  %v115_v55 = vld [vmem:[#allocation4 + $0xf8] sm:$0xff]  ;;  %v108_v56 = vld [vmem:[#allocation4 + $0xc0] sm:$0xff]  ;;  %v6043_v58 = vpack.c.bf16 %v113_v52, %v109_v51  ;;  %v110_v59 = vld [vmem:[#allocation4 + $0xd0] sm:$0xff] }
  0x43   :  { %4328 = vmatpush1.bf16.msra.mxu1 %v6020_v38  ;;  %287 = vmatprep.mubr.f32.mxu0 %v5874_v0  ;;  %v112_v57 = vld [vmem:[#allocation4 + $0xe0] sm:$0xff]  ;;  %v114_v60 = vld [vmem:[#allocation4 + $0xf0] sm:$0xff]  ;;  %v6047_v61 = vpack.c.bf16 %v115_v55, %v111_v53  ;;  %v117_v62 = vld [vmem:[#allocation4 + $0x108] sm:$0xff] }
  0x44   :  { %400 = vmatprep.mubr.f32.mxu1 %v5874_v0  ;;  %4298 = vmatprep.subr.bf16.mxu0 %v6024_v42  ;;  %v121_v63 = vld [vmem:[#allocation4 + $0x128] sm:$0xff]  ;;  %v152_v1 = vld [vmem:[%s6953_s0 + $0x18] sm:$0xff]  ;;  %v6054_v2 = vpack.c.bf16 %v112_v57, %v108_v56  ;;  %v6058_v5 = vpack.c.bf16 %v114_v60, %v110_v59  ;;  %v116_v6 = vld [vmem:[#allocation4 + $0x100] sm:$0xff] }
  0x45   :  { %4139 = vmatmul.mubr.msk.f32.gmra.mrb[4].mxu0 %vm186_vm0, %v151_v46  ;;  %4330 = vmatprep.subr.bf16.mxu1 %v6031_v47  ;;  %v119_v3 = vld [vmem:[#allocation4 + $0x118] sm:$0xff]  ;;  %v120_v7 = vld [vmem:[#allocation4 + $0x120] sm:$0xff]  ;;  %v6062_v8 = vpack.c.bf16 %v121_v63, %v117_v62  ;;  %v118_v9 = vld [vmem:[#allocation4 + $0x110] sm:$0xff] }
  0x46   :  { %4147 = vmatmul.mubr.msk.f32.gmra.mrb[4].mxu1 %vm186_vm0, %v151_v46  ;;  %4300 = vmatpush1.bf16.msra.mxu0 %v6035_v50  ;;  %v123_v4 = vld [vmem:[#allocation4 + $0x138] sm:$0xff]  ;;  %v122_v10 = vld [vmem:[#allocation4 + $0x130] sm:$0xff]  ;;  %v125_v12 = vld [vmem:[#allocation4 + $0x148] sm:$0xff]  ;;  %v6073_v15 = vpack.c.bf16 %v120_v7, %v116_v6  ;;  %v166_v7 = vlaneseq }
  0x47   :  { %4332 = vmatpush1.bf16.msra.mxu1 %v6039_v54  ;;  %293 = vmatprep.mubr.f32.mxu0 %v5874_v0  ;;  %v6066_v11 = vpack.c.bf16 %v123_v4, %v119_v3  ;;  %v129_v13 = vld [vmem:[#allocation4 + $0x168] sm:$0xff]  ;;  %v153_v14 = vld [vmem:[%s6953_s0 + $0x20] sm:$0xff]  ;;  %v127_v16 = vld [vmem:[#allocation4 + $0x158] sm:$0xff]  ;;  %v6077_v19 = vpack.c.bf16 %v122_v10, %v118_v9 }
  0x48   :  { %406 = vmatprep.mubr.f32.mxu1 %v5874_v0  ;;  %4302 = vmatprep.subr.bf16.mxu0 %v6043_v58  ;;  %v131_v18 = vld [vmem:[#allocation4 + $0x178] sm:$0xff]  ;;  %v124_v20 = vld [vmem:[#allocation4 + $0x140] sm:$0xff]  ;;  %v6081_v24 = vpack.c.bf16 %v129_v13, %v125_v12  ;;  %v126_v26 = vld [vmem:[#allocation4 + $0x150] sm:$0xff]  ;;  %v6183_v9 = vshrl.u32 %v166_v7, 7 }
  0x49   :  { %4140 = vmatmul.mubr.msk.f32.gmra.mrb[6].mxu0 %vm186_vm0, %v152_v1  ;;  %4334 = vmatprep.subr.bf16.mxu1 %v6047_v61  ;;  %v128_v23 = vld [vmem:[#allocation4 + $0x160] sm:$0xff]  ;;  %v130_v27 = vld [vmem:[#allocation4 + $0x170] sm:$0xff]  ;;  %v6085_v28 = vpack.c.bf16 %v131_v18, %v127_v16  ;;  %v133_v30 = vld [vmem:[#allocation4 + $0x188] sm:$0xff] }
  0x4a   :  { %4148 = vmatmul.mubr.msk.f32.gmra.mrb[6].mxu1 %vm186_vm0, %v152_v1  ;;  %4304 = vmatpush1.bf16.msra.mxu0 %v6054_v2  ;;  %v137_v31 = vld [vmem:[#allocation4 + $0x1a8] sm:$0xff]  ;;  %v6092_v33 = vpack.c.bf16 %v128_v23, %v124_v20  ;;  %v135_v36 = vld [vmem:[#allocation4 + $0x198] sm:$0xff]  ;;  %v6096_v39 = vpack.c.bf16 %v130_v27, %v126_v26  ;;  %v132_v40 = vld [vmem:[#allocation4 + $0x180] sm:$0xff]  ;;  %v168_v10 = vsub.s32 0, %v6183_v9  ;;  %v176_v13 = vsub.s32 2, %v6183_v9 }
  0x4b   :  { %4336 = vmatpush1.bf16.msra.mxu1 %v6058_v5  ;;  %299 = vmatprep.mubr.f32.mxu0 %v5874_v0  ;;  %v154_v32 = vld [vmem:[%s6953_s0 + $0x28] sm:$0xff]  ;;  %v139_v37 = vld [vmem:[#allocation4 + $0x1b8] sm:$0xff]  ;;  %v136_v41 = vld [vmem:[#allocation4 + $0x1a0] sm:$0xff]  ;;  %v6100_v43 = vpack.c.bf16 %v137_v31, %v133_v30 }
  0x4c   :  { %412 = vmatprep.mubr.f32.mxu1 %v5874_v0  ;;  %4306 = vmatprep.subr.bf16.mxu0 %v6062_v8  ;;  %v134_v44 = vld [vmem:[#allocation4 + $0x190] sm:$0xff]  ;;  %v6104_v46 = vpack.c.bf16 %v139_v37, %v135_v36  ;;  %v141_v48 = vld [vmem:[#allocation4 + $0x1c8] sm:$0xff]  ;;  %v6111_v52 = vpack.c.bf16 %v136_v41, %v132_v40  ;;  %v143_v53 = vld [vmem:[#allocation4 + $0x1d8] sm:$0xff] }
  0x4d   :  { %4141 = vmatmul.mubr.msk.f32.gmra.mrb[8].mxu0 %vm186_vm0, %v153_v14  ;;  %4338 = vmatprep.subr.bf16.mxu1 %v6066_v11  ;;  %v138_v45 = vld [vmem:[#allocation4 + $0x1b0] sm:$0xff]  ;;  %v145_v49 = vld [vmem:[#allocation4 + $0x1e8] sm:$0xff]  ;;  %v147_v55 = vld [vmem:[#allocation4 + $0x1f8] sm:$0xff] }
  0x4e   :  { %4149 = vmatmul.mubr.msk.f32.gmra.mrb[8].mxu1 %vm186_vm0, %v153_v14  ;;  %4308 = vmatpush1.bf16.msra.mxu0 %v6073_v15  ;;  %v155_v51 = vld [vmem:[%s6953_s0 + $0x30] sm:$0xff]  ;;  %v6115_v56 = vpack.c.bf16 %v138_v45, %v134_v44  ;;  %v140_v57 = vld [vmem:[#allocation4 + $0x1c0] sm:$0xff]  ;;  %v6119_v60 = vpack.c.bf16 %v145_v49, %v141_v48  ;;  %v6123_v1 = vpack.c.bf16 %v147_v55, %v143_v53  ;;  %v156_v3 = vld [vmem:[%s6953_s0 + $0x38] sm:$0xff]  ;;  %v172_v14 = vsub.s32 1, %v6183_v9 }
  0x4f   :  { %4340 = vmatpush1.bf16.msra.mxu1 %v6077_v19  ;;  %305 = vmatprep.mubr.f32.mxu0 %v5874_v0  ;;  %v144_v59 = vld [vmem:[#allocation4 + $0x1e0] sm:$0xff]  ;;  %v142_v62 = vld [vmem:[#allocation4 + $0x1d0] sm:$0xff]  ;;  %v6961_v45 = vsub.s32 3, %v6183_v9 }
  0x50   :  { %418 = vmatprep.mubr.f32.mxu1 %v5874_v0  ;;  %4310 = vmatprep.subr.bf16.mxu0 %v6081_v24  ;;  %v146_v63 = vld [vmem:[#allocation4 + $0x1f0] sm:$0xff]  ;;  %v6130_v4 = vpack.c.bf16 %v144_v59, %v140_v57  ;;  %v148_v12 = vld [vmem:[%s6956_s3] sm:$0xf] }
  0x51   :  { %4142 = vmatmul.mubr.msk.f32.gmra.mrb[10].mxu0 %vm186_vm0, %v154_v32  ;;  %4342 = vmatprep.subr.bf16.mxu1 %v6085_v28  ;;  %v6134_v6 = vpack.c.bf16 %v146_v63, %v142_v62  ;;  %v6193_v16 = vrot.slane %v148_v12, %v168_v10  ;;  %v6197_v18 = vrot.slane %v148_v12, %v176_v13 }
  0x52   :  { %4150 = vmatmul.mubr.msk.f32.gmra.mrb[10].mxu1 %vm186_vm0, %v154_v32  ;;  %4312 = vmatpush1.bf16.msra.mxu0 %v6092_v33  ;;  %v6201_v20 = vrot.slane %v148_v12, %v172_v14  ;;  %v6209_v48 = vrot.slane %v148_v12, %v6961_v45 }
  0x53   :  { %4344 = vmatpush1.bf16.msra.mxu1 %v6096_v39  ;;  %311 = vmatprep.mubr.f32.mxu0 %v5874_v0 }
  0x54   :  { %424 = vmatprep.mubr.f32.mxu1 %v5874_v0  ;;  %4314 = vmatprep.subr.bf16.mxu0 %v6100_v43 }
  0x55   :  { %4143 = vmatmul.mubr.msk.f32.gmra.mrb[12].mxu0 %vm186_vm0, %v155_v51  ;;  %4346 = vmatprep.subr.bf16.mxu1 %v6104_v46 }
  0x56   :  { %4151 = vmatmul.mubr.msk.f32.gmra.mrb[12].mxu1 %vm186_vm0, %v155_v51  ;;  %4316 = vmatpush1.bf16.msra.mxu0 %v6111_v52 }
  0x57   :  { %4348 = vmatpush1.bf16.msra.mxu1 %v6115_v56  ;;  %317 = vmatprep.mubr.f32.mxu0 %v5874_v0 }
  0x58   :  { %430 = vmatprep.mubr.f32.mxu1 %v5874_v0  ;;  %4318 = vmatprep.subr.bf16.mxu0 %v6119_v60 }
  0x59   :  { %4144 = vmatmul.mubr.msk.f32.gmra.mrb[14].mxu0 %vm186_vm0, %v156_v3  ;;  %4350 = vmatprep.subr.bf16.mxu1 %v6123_v1 }
  0x5a   :  { %4152 = vmatmul.mubr.msk.f32.gmra.mrb[14].mxu1 %vm186_vm0, %v156_v3  ;;  %4320 = vmatpush1.bf16.msra.mxu0 %v6130_v4 }
  0x5b   :  { %4352 = vmatpush1.bf16.msra.mxu1 %v6134_v6  ;;  %540 = vmatprep.mubr.f32.mxu0 %v5874_v0 }
  0x5c   :  { %611 = vmatprep.mubr.f32.mxu1 %v5874_v0  ;;  %4354 = vmatprep.subr.bf16.mxu0 %v5996_v17 }
  0x5d   :  { %541 = vmatmul.mubr.f32.vlgmr.msra.gmra.mrb[0].mxu0 %v5874_v0  ;;  %4386 = vmatprep.subr.bf16.mxu1 %v5998_v21 }
  0x5e   :  { %612 = vmatmul.mubr.f32.vlgmr.msra.gmra.mrb[0].mxu1 %v5874_v0  ;;  %4356 = vmatpush1.bf16.msra.mxu0 %v6000_v22 }
  0x5f   :  { %4388 = vmatpush1.bf16.msra.mxu1 %v6003_v25  ;;  %4358 = vmatprep.subr.bf16.mxu0 %v6007_v29 }
  0x60   :  { %4390 = vmatprep.subr.bf16.mxu1 %v6014_v34  ;;  %743 = vmatprep.mubr.f32.mxu0 %v5874_v0 }
  0x61   :  { %814 = vmatprep.mubr.f32.mxu1 %v5874_v0 }
  0x62   :  { %4360 = vmatpush1.bf16.msra.mxu0 %v6016_v35 }
  0x63   :  { %4392 = vmatpush1.bf16.msra.mxu1 %v6020_v38  ;;  %4362 = vmatprep.subr.bf16.mxu0 %v6024_v42 }
  0x64   :  { %4394 = vmatprep.subr.bf16.mxu1 %v6031_v47 }
  0x66   :  { %4364 = vmatpush1.bf16.msra.mxu0 %v6035_v50 }
  0x67   :  { %4396 = vmatpush1.bf16.msra.mxu1 %v6039_v54  ;;  %4366 = vmatprep.subr.bf16.mxu0 %v6043_v58 }
  0x68   :  { %4398 = vmatprep.subr.bf16.mxu1 %v6047_v61 }
  0x6a   :  { %4368 = vmatpush1.bf16.msra.mxu0 %v6054_v2 }
  0x6b   :  { %4400 = vmatpush1.bf16.msra.mxu1 %v6058_v5  ;;  %4370 = vmatprep.subr.bf16.mxu0 %v6062_v8 }
  0x6c   :  { %4402 = vmatprep.subr.bf16.mxu1 %v6066_v11 }
  0x6e   :  { %4372 = vmatpush1.bf16.msra.mxu0 %v6073_v15 }
  0x6f   :  { %4404 = vmatpush1.bf16.msra.mxu1 %v6077_v19  ;;  %4374 = vmatprep.subr.bf16.mxu0 %v6081_v24 }
  0x70   :  { %4406 = vmatprep.subr.bf16.mxu1 %v6085_v28 }
  0x72   :  { %4376 = vmatpush1.bf16.msra.mxu0 %v6092_v33 }
  0x73   :  { %4408 = vmatpush1.bf16.msra.mxu1 %v6096_v39  ;;  %4378 = vmatprep.subr.bf16.mxu0 %v6100_v43 }
  0x74   :  { %4410 = vmatprep.subr.bf16.mxu1 %v6104_v46 }
  0x76   :  { %4380 = vmatpush1.bf16.msra.mxu0 %v6111_v52 }
  0x77   :  { %4412 = vmatpush1.bf16.msra.mxu1 %v6115_v56  ;;  %4382 = vmatprep.subr.bf16.mxu0 %v6119_v60 }
  0x78   :  { %4414 = vmatprep.subr.bf16.mxu1 %v6123_v1 }
  0x7a   :  { %4384 = vmatpush1.bf16.msra.mxu0 %v6130_v4 }
  0x7b   :  { %4416 = vmatpush1.bf16.msra.mxu1 %v6134_v6  ;;  %4418 = vmatprep.subr.bf16.mxu0 %v5996_v17 }
  0x7c   :  { %4450 = vmatprep.subr.bf16.mxu1 %v5998_v21 }
 0x130   :  { %v542_v23 = vpop.f32.mrb[0].mxu0 }
 0x131   :  { %v5377_v26 = vadd.f32 %v542_v23, %v6193_v16  ;;  %v613_v27 = vpop.f32.mrb[0].mxu1  ;;  %v544_v30 = vpop.f32.mrb[1].mxu0 }
 0x132   :  { %v5393_v31 = vadd.f32 %v613_v27, %v6197_v18  ;;  %v5378_v32 = vadd.f32 %v544_v30, %v6201_v20  ;;  %v615_v36 = vpop.f32.mrb[1].mxu1 }
 0x133   :  { %v4154_v37 = vmul.f32 -1.442695, %v5377_v26  ;;  %v5394_v49 = vadd.f32 %v615_v36, %v6209_v48 }
 0x134   :  { %v4153_v40 = vmul.f32 -2.0, %v5393_v31  ;;  %v4155_v41 = vmul.f32 -1.442695, %v5378_v32 }
 0x135   :  { %v4156_v57 = vmul.f32 -1.442695, %v5394_v49 }
 0x136   :  { %v638_v44 = vmul.f32 1.442695, %v4153_v40  ;;  %5511 = vpow2.f32 %v4155_v41 }
 0x137   :  { %5513 = vpow2.f32 %v4154_v37 }
 0x138   :  { %5515 = vpow2.f32 %v638_v44 }
 0x140   :  { %v5512_v51 = vpop.eup %5511 }
 0x141   :  { %v5514_v53 = vpop.eup %5513  ;;  %v643_v62 = vadd.f32 1.0, %v5512_v51 }
 0x142   :  { %v5516_v55 = vpop.eup %5515  ;;  %v642_v63 = vadd.f32 1.0, %v5514_v53 }
 0x143   :  { %v644_v59 = vadd.f32 1.0, %v5516_v55 }
 0x145   :  { %5517 = vrcp.f32 %v644_v59 }
 0x146   :  { %5519 = vpow2.f32 %v4156_v57 }
 0x147   :  { %5521 = vrcp.f32 %v643_v62 }
 0x148   :  { %5523 = vrcp.f32 %v642_v63 }
 0x14f   :  { %v5518_v3 = vpop.eup %5517 }
 0x150   :  { %v5520_v7 = vpop.eup %5519  ;;  %v656_v23 = vmul.f32 2.0, %v5518_v3 }
 0x151   :  { %v5522_v26 = vpop.eup %5521  ;;  %v645_v30 = vadd.f32 1.0, %v5520_v7 }
 0x152   :  { %v4159_v27 = vadd.f32 -1.0, %v656_v23  ;;  %v5524_v12 = vpop.eup %5523  ;;  %v666_v32 = vmul.f32 0.0, %v5522_v26 }
 0x153   :  { %5525 = vrcp.f32 %v645_v30 }
 0x154   :  { %v667_v31 = vmul.f32 %v5524_v12, %v4159_v27 }
 0x156   :  { %v6212_v36 = vadd.f32 %v667_v31, %v666_v32 }
 0x158   :  { %5527 = vtanh.f32 %v6212_v36 }
 0x15d   :  { %v5526_v37 = vpop.eup %5525 }
 0x162   :  { %v5528_v40 = vpop.eup %5527 }
 0x163   :  { %v6215_v41 = vmul.f32 %v5528_v40, %v5526_v37 }
 0x165   :  { %744 = vmatmul.mubr.f32.vlgmr.msra.gmra.mrb[2].mxu0 %v6215_v41  ;;  %815 = vmatmul.mubr.f32.vlgmr.msra.gmra.mrb[2].mxu1 %v6215_v41 }
 0x166   :  { %4420 = vmatpush1.bf16.msra.mxu0 %v6000_v22  ;;  %4452 = vmatpush1.bf16.msra.mxu1 %v6003_v25 }
 0x167   :  { %4422 = vmatprep.subr.bf16.mxu0 %v6007_v29  ;;  %4454 = vmatprep.subr.bf16.mxu1 %v6014_v34 }
 0x168   :  { %947 = vmatprep.mubr.f32.mxu0 %v5874_v0  ;;  %1018 = vmatprep.mubr.f32.mxu1 %v5874_v0 }
 0x16a   :  { %4424 = vmatpush1.bf16.msra.mxu0 %v6016_v35  ;;  %4456 = vmatpush1.bf16.msra.mxu1 %v6020_v38 }
 0x16b   :  { %4426 = vmatprep.subr.bf16.mxu0 %v6024_v42  ;;  %4458 = vmatprep.subr.bf16.mxu1 %v6031_v47 }
 0x16e   :  { %4428 = vmatpush1.bf16.msra.mxu0 %v6035_v50  ;;  %4460 = vmatpush1.bf16.msra.mxu1 %v6039_v54 }
 0x16f   :  { %4430 = vmatprep.subr.bf16.mxu0 %v6043_v58  ;;  %4462 = vmatprep.subr.bf16.mxu1 %v6047_v61 }
 0x172   :  { %4432 = vmatpush1.bf16.msra.mxu0 %v6054_v2  ;;  %4464 = vmatpush1.bf16.msra.mxu1 %v6058_v5 }
 0x173   :  { %4434 = vmatprep.subr.bf16.mxu0 %v6062_v8  ;;  %4466 = vmatprep.subr.bf16.mxu1 %v6066_v11 }
 0x176   :  { %4436 = vmatpush1.bf16.msra.mxu0 %v6073_v15  ;;  %4468 = vmatpush1.bf16.msra.mxu1 %v6077_v19 }
 0x177   :  { %4438 = vmatprep.subr.bf16.mxu0 %v6081_v24  ;;  %4470 = vmatprep.subr.bf16.mxu1 %v6085_v28 }
 0x17a   :  { %4440 = vmatpush1.bf16.msra.mxu0 %v6092_v33  ;;  %4472 = vmatpush1.bf16.msra.mxu1 %v6096_v39 }
 0x17b   :  { %4442 = vmatprep.subr.bf16.mxu0 %v6100_v43  ;;  %4474 = vmatprep.subr.bf16.mxu1 %v6104_v46 }
 0x17e   :  { %4444 = vmatpush1.bf16.msra.mxu0 %v6111_v52  ;;  %4476 = vmatpush1.bf16.msra.mxu1 %v6115_v56 }
 0x17f   :  { %4446 = vmatprep.subr.bf16.mxu0 %v6119_v60  ;;  %4478 = vmatprep.subr.bf16.mxu1 %v6123_v1 }
 0x182   :  { %4448 = vmatpush1.bf16.msra.mxu0 %v6130_v4  ;;  %4480 = vmatpush1.bf16.msra.mxu1 %v6134_v6 }
 0x183   :  { %4482 = vmatprep.subr.bf16.mxu0 %v5996_v17  ;;  %4514 = vmatprep.subr.bf16.mxu1 %v5998_v21 }
 0x238   :  { %v745_v44 = vpop.f32.mrb[2].mxu0  ;;  %v816_v49 = vpop.f32.mrb[2].mxu1 }
 0x239   :  { %v5379_v51 = vadd.f32 %v745_v44, %v6193_v16  ;;  %v5395_v53 = vadd.f32 %v816_v49, %v6197_v18  ;;  %v747_v55 = vpop.f32.mrb[3].mxu0  ;;  %v818_v57 = vpop.f32.mrb[3].mxu1 }
 0x23a   :  { %v5380_v59 = vadd.f32 %v747_v55, %v6201_v20  ;;  %v5396_v23 = vadd.f32 %v818_v57, %v6209_v48 }
 0x23b   :  { %v4162_v62 = vmul.f32 -1.442695, %v5379_v51  ;;  %v4161_v63 = vmul.f32 -2.0, %v5395_v53 }
 0x23c   :  { %v4163_v3 = vmul.f32 -1.442695, %v5380_v59  ;;  %v4164_v30 = vmul.f32 -1.442695, %v5396_v23 }
 0x23d   :  { %5529 = vpow2.f32 %v4162_v62  ;;  %v841_v7 = vmul.f32 1.442695, %v4161_v63 }
 0x23e   :  { %5531 = vpow2.f32 %v4163_v3 }
 0x23f   :  { %5533 = vpow2.f32 %v841_v7 }
 0x247   :  { %v5530_v26 = vpop.eup %5529 }
 0x248   :  { %v5532_v27 = vpop.eup %5531  ;;  %v845_v37 = vadd.f32 1.0, %v5530_v26 }
 0x249   :  { %v5534_v12 = vpop.eup %5533  ;;  %v846_v32 = vadd.f32 1.0, %v5532_v27 }
 0x24a   :  { %v847_v31 = vadd.f32 1.0, %v5534_v12 }
 0x24c   :  { %5535 = vrcp.f32 %v847_v31 }
 0x24d   :  { %5537 = vpow2.f32 %v4164_v30 }
 0x24e   :  { %5539 = vrcp.f32 %v846_v32 }
 0x24f   :  { %5541 = vrcp.f32 %v845_v37 }
 0x256   :  { %v5536_v40 = vpop.eup %5535 }
 0x257   :  { %v5538_v44 = vpop.eup %5537  ;;  %v859_v49 = vmul.f32 2.0, %v5536_v40 }
 0x258   :  { %v5540_v51 = vpop.eup %5539  ;;  %v848_v59 = vadd.f32 1.0, %v5538_v44 }
 0x259   :  { %v4167_v53 = vadd.f32 -1.0, %v859_v49  ;;  %v5542_v55 = vpop.eup %5541  ;;  %v869_v57 = vmul.f32 %v5540_v51, %v6212_v36 }
 0x25a   :  { %5543 = vrcp.f32 %v848_v59 }
 0x25b   :  { %v870_v62 = vmul.f32 %v5542_v55, %v4167_v53 }
 0x25d   :  { %v6258_v63 = vadd.f32 %v870_v62, %v869_v57 }
 0x25f   :  { %5545 = vtanh.f32 %v6258_v63 }
 0x264   :  { %v5544_v3 = vpop.eup %5543 }
 0x269   :  { %v5546_v7 = vpop.eup %5545 }
 0x26a   :  { %v6261_v23 = vmul.f32 %v5546_v7, %v5544_v3 }
 0x26c   :  { %948 = vmatmul.mubr.f32.vlgmr.msra.gmra.mrb[4].mxu0 %v6261_v23  ;;  %1019 = vmatmul.mubr.f32.vlgmr.msra.gmra.mrb[4].mxu1 %v6261_v23 }
 0x26d   :  { %4484 = vmatpush1.bf16.msra.mxu0 %v6000_v22  ;;  %4516 = vmatpush1.bf16.msra.mxu1 %v6003_v25 }
 0x26e   :  { %4486 = vmatprep.subr.bf16.mxu0 %v6007_v29  ;;  %4518 = vmatprep.subr.bf16.mxu1 %v6014_v34 }
 0x26f   :  { %1151 = vmatprep.mubr.f32.mxu0 %v5874_v0  ;;  %1222 = vmatprep.mubr.f32.mxu1 %v5874_v0 }
 0x271   :  { %4488 = vmatpush1.bf16.msra.mxu0 %v6016_v35  ;;  %4520 = vmatpush1.bf16.msra.mxu1 %v6020_v38 }
 0x272   :  { %4490 = vmatprep.subr.bf16.mxu0 %v6024_v42  ;;  %4522 = vmatprep.subr.bf16.mxu1 %v6031_v47 }
 0x275   :  { %4492 = vmatpush1.bf16.msra.mxu0 %v6035_v50  ;;  %4524 = vmatpush1.bf16.msra.mxu1 %v6039_v54 }
 0x276   :  { %4494 = vmatprep.subr.bf16.mxu0 %v6043_v58  ;;  %4526 = vmatprep.subr.bf16.mxu1 %v6047_v61 }
 0x279   :  { %4496 = vmatpush1.bf16.msra.mxu0 %v6054_v2  ;;  %4528 = vmatpush1.bf16.msra.mxu1 %v6058_v5 }
 0x27a   :  { %4498 = vmatprep.subr.bf16.mxu0 %v6062_v8  ;;  %4530 = vmatprep.subr.bf16.mxu1 %v6066_v11 }
 0x27d   :  { %4500 = vmatpush1.bf16.msra.mxu0 %v6073_v15  ;;  %4532 = vmatpush1.bf16.msra.mxu1 %v6077_v19 }
 0x27e   :  { %4502 = vmatprep.subr.bf16.mxu0 %v6081_v24  ;;  %4534 = vmatprep.subr.bf16.mxu1 %v6085_v28 }
 0x281   :  { %4504 = vmatpush1.bf16.msra.mxu0 %v6092_v33  ;;  %4536 = vmatpush1.bf16.msra.mxu1 %v6096_v39 }
 0x282   :  { %4506 = vmatprep.subr.bf16.mxu0 %v6100_v43  ;;  %4538 = vmatprep.subr.bf16.mxu1 %v6104_v46 }
 0x285   :  { %4508 = vmatpush1.bf16.msra.mxu0 %v6111_v52  ;;  %4540 = vmatpush1.bf16.msra.mxu1 %v6115_v56 }
 0x286   :  { %4510 = vmatprep.subr.bf16.mxu0 %v6119_v60  ;;  %4542 = vmatprep.subr.bf16.mxu1 %v6123_v1 }
 0x289   :  { %4512 = vmatpush1.bf16.msra.mxu0 %v6130_v4  ;;  %4544 = vmatpush1.bf16.msra.mxu1 %v6134_v6 }
 0x28a   :  { %4546 = vmatprep.subr.bf16.mxu0 %v5996_v17  ;;  %4578 = vmatprep.subr.bf16.mxu1 %v5998_v21 }
 0x33f   :  { %v949_v36 = vpop.f32.mrb[4].mxu0  ;;  %v1020_v26 = vpop.f32.mrb[4].mxu1 }
 0x340   :  { %v5381_v27 = vadd.f32 %v949_v36, %v6193_v16  ;;  %v5397_v12 = vadd.f32 %v1020_v26, %v6197_v18  ;;  %v951_v30 = vpop.f32.mrb[5].mxu0  ;;  %v1022_v31 = vpop.f32.mrb[5].mxu1 }
 0x341   :  { %v5382_v32 = vadd.f32 %v951_v30, %v6201_v20  ;;  %v5398_v51 = vadd.f32 %v1022_v31, %v6209_v48 }
 0x342   :  { %v4170_v37 = vmul.f32 -1.442695, %v5381_v27  ;;  %v4169_v40 = vmul.f32 -2.0, %v5397_v12 }
 0x343   :  { %v4171_v44 = vmul.f32 -1.442695, %v5382_v32  ;;  %v4172_v62 = vmul.f32 -1.442695, %v5398_v51 }
 0x344   :  { %5547 = vpow2.f32 %v4170_v37  ;;  %v1045_v49 = vmul.f32 1.442695, %v4169_v40 }
 0x345   :  { %5549 = vpow2.f32 %v4171_v44 }
 0x346   :  { %5551 = vpow2.f32 %v1045_v49 }
 0x34e   :  { %v5548_v53 = vpop.eup %5547 }
 0x34f   :  { %v5550_v55 = vpop.eup %5549  ;;  %v1049_v7 = vadd.f32 1.0, %v5548_v53 }
 0x350   :  { %v5552_v59 = vpop.eup %5551  ;;  %v1050_v3 = vadd.f32 1.0, %v5550_v55 }
 0x351   :  { %v1051_v57 = vadd.f32 1.0, %v5552_v59 }
 0x353   :  { %5553 = vrcp.f32 %v1051_v57 }
 0x354   :  { %5555 = vpow2.f32 %v4172_v62 }
 0x355   :  { %5557 = vrcp.f32 %v1050_v3 }
 0x356   :  { %5559 = vrcp.f32 %v1049_v7 }
 0x35d   :  { %v5554_v36 = vpop.eup %5553 }
 0x35e   :  { %v5556_v26 = vpop.eup %5555  ;;  %v1063_v27 = vmul.f32 2.0, %v5554_v36 }
 0x35f   :  { %v5558_v12 = vpop.eup %5557  ;;  %v1052_v37 = vadd.f32 1.0, %v5556_v26 }
 0x360   :  { %v4175_v30 = vadd.f32 -1.0, %v1063_v27  ;;  %v5560_v32 = vpop.eup %5559  ;;  %v1073_v31 = vmul.f32 %v5558_v12, %v6258_v63 }
 0x361   :  { %5561 = vrcp.f32 %v1052_v37 }
 0x362   :  { %v1074_v40 = vmul.f32 %v5560_v32, %v4175_v30 }
 0x364   :  { %v6304_v44 = vadd.f32 %v1074_v40, %v1073_v31 }
 0x366   :  { %5563 = vtanh.f32 %v6304_v44 }
 0x36b   :  { %v5562_v49 = vpop.eup %5561 }
 0x370   :  { %v5564_v51 = vpop.eup %5563 }
 0x371   :  { %v6307_v53 = vmul.f32 %v5564_v51, %v5562_v49 }
 0x373   :  { %1152 = vmatmul.mubr.f32.vlgmr.msra.gmra.mrb[6].mxu0 %v6307_v53  ;;  %1223 = vmatmul.mubr.f32.vlgmr.msra.gmra.mrb[6].mxu1 %v6307_v53 }
 0x374   :  { %4548 = vmatpush1.bf16.msra.mxu0 %v6000_v22  ;;  %4580 = vmatpush1.bf16.msra.mxu1 %v6003_v25 }
 0x375   :  { %4550 = vmatprep.subr.bf16.mxu0 %v6007_v29  ;;  %4582 = vmatprep.subr.bf16.mxu1 %v6014_v34 }
 0x376   :  { %1355 = vmatprep.mubr.f32.mxu0 %v5874_v0  ;;  %1426 = vmatprep.mubr.f32.mxu1 %v5874_v0 }
 0x378   :  { %4552 = vmatpush1.bf16.msra.mxu0 %v6016_v35  ;;  %4584 = vmatpush1.bf16.msra.mxu1 %v6020_v38 }
 0x379   :  { %4554 = vmatprep.subr.bf16.mxu0 %v6024_v42  ;;  %4586 = vmatprep.subr.bf16.mxu1 %v6031_v47 }
 0x37c   :  { %4556 = vmatpush1.bf16.msra.mxu0 %v6035_v50  ;;  %4588 = vmatpush1.bf16.msra.mxu1 %v6039_v54 }
 0x37d   :  { %4558 = vmatprep.subr.bf16.mxu0 %v6043_v58  ;;  %4590 = vmatprep.subr.bf16.mxu1 %v6047_v61 }
 0x380   :  { %4560 = vmatpush1.bf16.msra.mxu0 %v6054_v2  ;;  %4592 = vmatpush1.bf16.msra.mxu1 %v6058_v5 }
 0x381   :  { %4562 = vmatprep.subr.bf16.mxu0 %v6062_v8  ;;  %4594 = vmatprep.subr.bf16.mxu1 %v6066_v11 }
 0x384   :  { %4564 = vmatpush1.bf16.msra.mxu0 %v6073_v15  ;;  %4596 = vmatpush1.bf16.msra.mxu1 %v6077_v19 }
 0x385   :  { %4566 = vmatprep.subr.bf16.mxu0 %v6081_v24  ;;  %4598 = vmatprep.subr.bf16.mxu1 %v6085_v28 }
 0x388   :  { %4568 = vmatpush1.bf16.msra.mxu0 %v6092_v33  ;;  %4600 = vmatpush1.bf16.msra.mxu1 %v6096_v39 }
 0x389   :  { %4570 = vmatprep.subr.bf16.mxu0 %v6100_v43  ;;  %4602 = vmatprep.subr.bf16.mxu1 %v6104_v46 }
 0x38c   :  { %4572 = vmatpush1.bf16.msra.mxu0 %v6111_v52  ;;  %4604 = vmatpush1.bf16.msra.mxu1 %v6115_v56 }
 0x38d   :  { %4574 = vmatprep.subr.bf16.mxu0 %v6119_v60  ;;  %4606 = vmatprep.subr.bf16.mxu1 %v6123_v1 }
 0x390   :  { %4576 = vmatpush1.bf16.msra.mxu0 %v6130_v4  ;;  %4608 = vmatpush1.bf16.msra.mxu1 %v6134_v6 }
 0x391   :  { %4610 = vmatprep.subr.bf16.mxu0 %v5996_v17  ;;  %4642 = vmatprep.subr.bf16.mxu1 %v5998_v21 }
 0x446   :  { %v1153_v63 = vpop.f32.mrb[6].mxu0  ;;  %v1224_v55 = vpop.f32.mrb[6].mxu1 }
 0x447   :  { %v5383_v59 = vadd.f32 %v1153_v63, %v6193_v16  ;;  %v5399_v62 = vadd.f32 %v1224_v55, %v6197_v18  ;;  %v1155_v57 = vpop.f32.mrb[7].mxu0  ;;  %v1226_v3 = vpop.f32.mrb[7].mxu1 }
 0x448   :  { %v5384_v7 = vadd.f32 %v1155_v57, %v6201_v20  ;;  %v5400_v30 = vadd.f32 %v1226_v3, %v6209_v48 }
 0x449   :  { %v4178_v36 = vmul.f32 -1.442695, %v5383_v59  ;;  %v4177_v26 = vmul.f32 -2.0, %v5399_v62 }
 0x44a   :  { %v4179_v27 = vmul.f32 -1.442695, %v5384_v7  ;;  %v4180_v31 = vmul.f32 -1.442695, %v5400_v30 }
 0x44b   :  { %5565 = vpow2.f32 %v4178_v36  ;;  %v1249_v12 = vmul.f32 1.442695, %v4177_v26 }
 0x44c   :  { %5567 = vpow2.f32 %v4179_v27 }
 0x44d   :  { %5569 = vpow2.f32 %v1249_v12 }
 0x455   :  { %v5566_v32 = vpop.eup %5565 }
 0x456   :  { %v5568_v37 = vpop.eup %5567  ;;  %v1253_v63 = vadd.f32 1.0, %v5566_v32 }
 0x457   :  { %v5570_v40 = vpop.eup %5569  ;;  %v1254_v51 = vadd.f32 1.0, %v5568_v37 }
 0x458   :  { %v1255_v49 = vadd.f32 1.0, %v5570_v40 }
 0x45a   :  { %5571 = vrcp.f32 %v1255_v49 }
 0x45b   :  { %5573 = vpow2.f32 %v4180_v31 }
 0x45c   :  { %5575 = vrcp.f32 %v1254_v51 }
 0x45d   :  { %5577 = vrcp.f32 %v1253_v63 }
 0x464   :  { %v5572_v55 = vpop.eup %5571 }
 0x465   :  { %v5574_v59 = vpop.eup %5573  ;;  %v1267_v62 = vmul.f32 2.0, %v5572_v55 }
 0x466   :  { %v5576_v57 = vpop.eup %5575  ;;  %v1256_v26 = vadd.f32 1.0, %v5574_v59 }
 0x467   :  { %v4183_v7 = vadd.f32 -1.0, %v1267_v62  ;;  %v5578_v36 = vpop.eup %5577  ;;  %v1277_v3 = vmul.f32 %v5576_v57, %v6304_v44 }
 0x468   :  { %5579 = vrcp.f32 %v1256_v26 }
 0x469   :  { %v1278_v27 = vmul.f32 %v5578_v36, %v4183_v7 }
 0x46b   :  { %v6350_v12 = vadd.f32 %v1278_v27, %v1277_v3 }
 0x46d   :  { %5581 = vtanh.f32 %v6350_v12 }
 0x472   :  { %v5580_v30 = vpop.eup %5579 }
 0x477   :  { %v5582_v32 = vpop.eup %5581 }
 0x478   :  { %v6353_v37 = vmul.f32 %v5582_v32, %v5580_v30 }
 0x47a   :  { %1356 = vmatmul.mubr.f32.vlgmr.msra.gmra.mrb[8].mxu0 %v6353_v37  ;;  %1427 = vmatmul.mubr.f32.vlgmr.msra.gmra.mrb[8].mxu1 %v6353_v37 }
 0x47b   :  { %4612 = vmatpush1.bf16.msra.mxu0 %v6000_v22  ;;  %4644 = vmatpush1.bf16.msra.mxu1 %v6003_v25 }
 0x47c   :  { %4614 = vmatprep.subr.bf16.mxu0 %v6007_v29  ;;  %4646 = vmatprep.subr.bf16.mxu1 %v6014_v34 }
 0x47d   :  { %1559 = vmatprep.mubr.f32.mxu0 %v5874_v0  ;;  %1630 = vmatprep.mubr.f32.mxu1 %v5874_v0 }
 0x47f   :  { %4616 = vmatpush1.bf16.msra.mxu0 %v6016_v35  ;;  %4648 = vmatpush1.bf16.msra.mxu1 %v6020_v38 }
 0x480   :  { %4618 = vmatprep.subr.bf16.mxu0 %v6024_v42  ;;  %4650 = vmatprep.subr.bf16.mxu1 %v6031_v47 }
 0x483   :  { %4620 = vmatpush1.bf16.msra.mxu0 %v6035_v50  ;;  %4652 = vmatpush1.bf16.msra.mxu1 %v6039_v54 }
 0x484   :  { %4622 = vmatprep.subr.bf16.mxu0 %v6043_v58  ;;  %4654 = vmatprep.subr.bf16.mxu1 %v6047_v61 }
 0x487   :  { %4624 = vmatpush1.bf16.msra.mxu0 %v6054_v2  ;;  %4656 = vmatpush1.bf16.msra.mxu1 %v6058_v5 }
 0x488   :  { %4626 = vmatprep.subr.bf16.mxu0 %v6062_v8  ;;  %4658 = vmatprep.subr.bf16.mxu1 %v6066_v11 }
 0x48b   :  { %4628 = vmatpush1.bf16.msra.mxu0 %v6073_v15  ;;  %4660 = vmatpush1.bf16.msra.mxu1 %v6077_v19 }
 0x48c   :  { %4630 = vmatprep.subr.bf16.mxu0 %v6081_v24  ;;  %4662 = vmatprep.subr.bf16.mxu1 %v6085_v28 }
 0x48f   :  { %4632 = vmatpush1.bf16.msra.mxu0 %v6092_v33  ;;  %4664 = vmatpush1.bf16.msra.mxu1 %v6096_v39 }
 0x490   :  { %4634 = vmatprep.subr.bf16.mxu0 %v6100_v43  ;;  %4666 = vmatprep.subr.bf16.mxu1 %v6104_v46 }
 0x493   :  { %4636 = vmatpush1.bf16.msra.mxu0 %v6111_v52  ;;  %4668 = vmatpush1.bf16.msra.mxu1 %v6115_v56 }
 0x494   :  { %4638 = vmatprep.subr.bf16.mxu0 %v6119_v60  ;;  %4670 = vmatprep.subr.bf16.mxu1 %v6123_v1 }
 0x497   :  { %4640 = vmatpush1.bf16.msra.mxu0 %v6130_v4  ;;  %4672 = vmatpush1.bf16.msra.mxu1 %v6134_v6 }
 0x498   :  { %4674 = vmatprep.subr.bf16.mxu0 %v5996_v17  ;;  %4706 = vmatprep.subr.bf16.mxu1 %v5998_v21 }
 0x54d   :  { %v1357_v44 = vpop.f32.mrb[8].mxu0  ;;  %v1428_v40 = vpop.f32.mrb[8].mxu1 }
 0x54e   :  { %v5385_v31 = vadd.f32 %v1357_v44, %v6193_v16  ;;  %v5401_v49 = vadd.f32 %v1428_v40, %v6197_v18  ;;  %v1359_v51 = vpop.f32.mrb[9].mxu0  ;;  %v1430_v63 = vpop.f32.mrb[9].mxu1 }
 0x54f   :  { %v5386_v55 = vadd.f32 %v1359_v51, %v6201_v20  ;;  %v5402_v36 = vadd.f32 %v1430_v63, %v6209_v48 }
 0x550   :  { %v4186_v59 = vmul.f32 -1.442695, %v5385_v31  ;;  %v4185_v62 = vmul.f32 -2.0, %v5401_v49 }
 0x551   :  { %v4187_v57 = vmul.f32 -1.442695, %v5386_v55  ;;  %v4188_v30 = vmul.f32 -1.442695, %v5402_v36 }
 0x552   :  { %5583 = vpow2.f32 %v4186_v59  ;;  %v1453_v7 = vmul.f32 1.442695, %v4185_v62 }
 0x553   :  { %5585 = vpow2.f32 %v4187_v57 }
 0x554   :  { %5587 = vpow2.f32 %v1453_v7 }
 0x55c   :  { %v5584_v26 = vpop.eup %5583 }
 0x55d   :  { %v5586_v27 = vpop.eup %5585  ;;  %v1457_v40 = vadd.f32 1.0, %v5584_v26 }
 0x55e   :  { %v5588_v3 = vpop.eup %5587  ;;  %v1458_v44 = vadd.f32 1.0, %v5586_v27 }
 0x55f   :  { %v1459_v32 = vadd.f32 1.0, %v5588_v3 }
 0x561   :  { %5589 = vrcp.f32 %v1459_v32 }
 0x562   :  { %5591 = vpow2.f32 %v4188_v30 }
 0x563   :  { %5593 = vrcp.f32 %v1458_v44 }
 0x564   :  { %5595 = vrcp.f32 %v1457_v40 }
 0x56b   :  { %v5590_v31 = vpop.eup %5589 }
 0x56c   :  { %v5592_v49 = vpop.eup %5591  ;;  %v1471_v51 = vmul.f32 2.0, %v5590_v31 }
 0x56d   :  { %v5594_v55 = vpop.eup %5593  ;;  %v1460_v57 = vadd.f32 1.0, %v5592_v49 }
 0x56e   :  { %v4191_v59 = vadd.f32 -1.0, %v1471_v51  ;;  %v5596_v62 = vpop.eup %5595  ;;  %v1481_v63 = vmul.f32 %v5594_v55, %v6350_v12 }
 0x56f   :  { %5597 = vrcp.f32 %v1460_v57 }
 0x570   :  { %v1482_v7 = vmul.f32 %v5596_v62, %v4191_v59 }
 0x572   :  { %v6396_v45 = vadd.f32 %v1482_v7, %v1481_v63 }
 0x574   :  { %5599 = vtanh.f32 %v6396_v45 }
 0x579   :  { %v5598_v36 = vpop.eup %5597 }
 0x57e   :  { %v5600_v26 = vpop.eup %5599 }
 0x57f   :  { %v6399_v27 = vmul.f32 %v5600_v26, %v5598_v36 }
 0x581   :  { %1560 = vmatmul.mubr.f32.vlgmr.msra.gmra.mrb[10].mxu0 %v6399_v27  ;;  %1631 = vmatmul.mubr.f32.vlgmr.msra.gmra.mrb[10].mxu1 %v6399_v27 }
 0x582   :  { %4676 = vmatpush1.bf16.msra.mxu0 %v6000_v22  ;;  %4708 = vmatpush1.bf16.msra.mxu1 %v6003_v25 }
 0x583   :  { %4678 = vmatprep.subr.bf16.mxu0 %v6007_v29  ;;  %4710 = vmatprep.subr.bf16.mxu1 %v6014_v34 }
 0x584   :  { %1763 = vmatprep.mubr.f32.mxu0 %v5874_v0  ;;  %1834 = vmatprep.mubr.f32.mxu1 %v5874_v0 }
 0x586   :  { %4680 = vmatpush1.bf16.msra.mxu0 %v6016_v35  ;;  %4712 = vmatpush1.bf16.msra.mxu1 %v6020_v38 }
 0x587   :  { %4682 = vmatprep.subr.bf16.mxu0 %v6024_v42  ;;  %4714 = vmatprep.subr.bf16.mxu1 %v6031_v47 }
 0x58a   :  { %4684 = vmatpush1.bf16.msra.mxu0 %v6035_v50  ;;  %4716 = vmatpush1.bf16.msra.mxu1 %v6039_v54 }
 0x58b   :  { %4686 = vmatprep.subr.bf16.mxu0 %v6043_v58  ;;  %4718 = vmatprep.subr.bf16.mxu1 %v6047_v61 }
 0x58e   :  { %4688 = vmatpush1.bf16.msra.mxu0 %v6054_v2  ;;  %4720 = vmatpush1.bf16.msra.mxu1 %v6058_v5 }
 0x58f   :  { %4690 = vmatprep.subr.bf16.mxu0 %v6062_v8  ;;  %4722 = vmatprep.subr.bf16.mxu1 %v6066_v11 }
 0x592   :  { %4692 = vmatpush1.bf16.msra.mxu0 %v6073_v15  ;;  %4724 = vmatpush1.bf16.msra.mxu1 %v6077_v19 }
 0x593   :  { %4694 = vmatprep.subr.bf16.mxu0 %v6081_v24  ;;  %4726 = vmatprep.subr.bf16.mxu1 %v6085_v28 }
 0x596   :  { %4696 = vmatpush1.bf16.msra.mxu0 %v6092_v33  ;;  %4728 = vmatpush1.bf16.msra.mxu1 %v6096_v39 }
 0x597   :  { %4698 = vmatprep.subr.bf16.mxu0 %v6100_v43  ;;  %4730 = vmatprep.subr.bf16.mxu1 %v6104_v46 }
 0x59a   :  { %4700 = vmatpush1.bf16.msra.mxu0 %v6111_v52  ;;  %4732 = vmatpush1.bf16.msra.mxu1 %v6115_v56 }
 0x59b   :  { %4702 = vmatprep.subr.bf16.mxu0 %v6119_v60  ;;  %4734 = vmatprep.subr.bf16.mxu1 %v6123_v1 }
 0x59e   :  { %4704 = vmatpush1.bf16.msra.mxu0 %v6130_v4  ;;  %4736 = vmatpush1.bf16.msra.mxu1 %v6134_v6 }
 0x59f   :  { %4738 = vmatprep.subr.bf16.mxu0 %v5996_v17  ;;  %4770 = vmatprep.subr.bf16.mxu1 %v5998_v21 }
 0x654   :  { %v1561_v12 = vpop.f32.mrb[10].mxu0  ;;  %v1632_v3 = vpop.f32.mrb[10].mxu1 }
 0x655   :  { %v5387_v30 = vadd.f32 %v1561_v12, %v6193_v16  ;;  %v5403_v32 = vadd.f32 %v1632_v3, %v6197_v18  ;;  %v1563_v44 = vpop.f32.mrb[11].mxu0  ;;  %v1634_v40 = vpop.f32.mrb[11].mxu1 }
 0x656   :  { %v5388_v31 = vadd.f32 %v1563_v44, %v6201_v20  ;;  %v5404_v17 = vadd.f32 %v1634_v40, %v6209_v48 }
 0x657   :  { %v4194_v49 = vmul.f32 -1.442695, %v5387_v30  ;;  %v4193_v51 = vmul.f32 -2.0, %v5403_v32 }
 0x658   :  { %v4195_v55 = vmul.f32 -1.442695, %v5388_v31  ;;  %v4196_v7 = vmul.f32 -1.442695, %v5404_v17 }
 0x659   :  { %5601 = vpow2.f32 %v4194_v49  ;;  %v1657_v59 = vmul.f32 1.442695, %v4193_v51 }
 0x65a   :  { %5603 = vpow2.f32 %v4195_v55 }
 0x65b   :  { %5605 = vpow2.f32 %v1657_v59 }
 0x663   :  { %v5602_v21 = vpop.eup %5601 }
 0x664   :  { %v5604_v62 = vpop.eup %5603  ;;  %v1661_v26 = vadd.f32 1.0, %v5602_v21 }
 0x665   :  { %v5606_v57 = vpop.eup %5605  ;;  %v1662_v36 = vadd.f32 1.0, %v5604_v62 }
 0x666   :  { %v1663_v63 = vadd.f32 1.0, %v5606_v57 }
 0x668   :  { %5607 = vrcp.f32 %v1663_v63 }
 0x669   :  { %5609 = vpow2.f32 %v4196_v7 }
 0x66a   :  { %5611 = vrcp.f32 %v1662_v36  ;;  %v2173_v36 = vld [vmem:[#allocation6] sm:$0xff] }
 0x66b   :  { %5613 = vrcp.f32 %v1661_v26  ;;  %v2177_v26 = vld [vmem:[#allocation6 + $0x20] sm:$0xff] }
 0x672   :  { %v5608_v12 = vpop.eup %5607 }
 0x673   :  { %v5610_v3 = vpop.eup %5609  ;;  %v1675_v30 = vmul.f32 2.0, %v5608_v12  ;;  %v2175_v12 = vld [vmem:[#allocation6 + $0x10] sm:$0xff] }
 0x674   :  { %v5612_v32 = vpop.eup %5611  ;;  %v1664_v49 = vadd.f32 1.0, %v5610_v3  ;;  %v2179_v3 = vld [vmem:[#allocation6 + $0x30] sm:$0xff] }
 0x675   :  { %v4199_v44 = vadd.f32 -1.0, %v1675_v30  ;;  %v5614_v31 = vpop.eup %5613  ;;  %v1685_v40 = vmul.f32 %v5612_v32, %v6396_v45  ;;  %v2182_v30 = vld [vmem:[#allocation6 + $0x48] sm:$0xff] }
 0x676   :  { %5615 = vrcp.f32 %v1664_v49  ;;  %v2186_v32 = vld [vmem:[#allocation6 + $0x68] sm:$0xff] }
 0x677   :  { %v1686_v51 = vmul.f32 %v5614_v31, %v4199_v44  ;;  %v2184_v44 = vld [vmem:[#allocation6 + $0x58] sm:$0xff] }
 0x678   :  { %v2188_v31 = vld [vmem:[#allocation6 + $0x78] sm:$0xff] }
 0x679   :  { %v6442_v55 = vadd.f32 %v1686_v51, %v1685_v40  ;;  %v4803_v40 = vpack.c.bf16 %v2177_v26, %v2173_v36  ;;  %v2205_v26 = vld [vmem:[#allocation6 + $0x100] sm:$0xff] }
 0x67b   :  { %5617 = vtanh.f32 %v6442_v55 }
 0x680   :  { %v5616_v59 = vpop.eup %5615 }
 0x685   :  { %v5618_v17 = vpop.eup %5617 }
 0x686   :  { %v6445_v21 = vmul.f32 %v5618_v17, %v5616_v59  ;;  %v4835_v59 = vpack.c.bf16 %v2179_v3, %v2175_v12  ;;  %v2181_v17 = vld [vmem:[#allocation6 + $0x40] sm:$0xff] }
 0x687   :  { %v2209_v12 = vld [vmem:[#allocation6 + $0x120] sm:$0xff] }
 0x688   :  { %1764 = vmatmul.mubr.f32.vlgmr.msra.gmra.mrb[12].mxu0 %v6445_v21  ;;  %1835 = vmatmul.mubr.f32.vlgmr.msra.gmra.mrb[12].mxu1 %v6445_v21 }
 0x689   :  { %4740 = vmatpush1.bf16.msra.mxu0 %v6000_v22  ;;  %4772 = vmatpush1.bf16.msra.mxu1 %v6003_v25  ;;  %v2174_v22 = vld [vmem:[#allocation6 + $0x8] sm:$0xff] }
 0x68a   :  { %4742 = vmatprep.subr.bf16.mxu0 %v6007_v29  ;;  %4774 = vmatprep.subr.bf16.mxu1 %v6014_v34  ;;  %v2178_v25 = vld [vmem:[#allocation6 + $0x28] sm:$0xff]  ;;  %v2176_v29 = vld [vmem:[#allocation6 + $0x18] sm:$0xff] }
 0x68b   :  { %1967 = vmatprep.mubr.f32.mxu0 %v5874_v0  ;;  %2038 = vmatprep.mubr.f32.mxu1 %v5874_v0  ;;  %v4801_v34 = vpack.c.bf16 %v2178_v25, %v2174_v22  ;;  %v2185_v22 = vld [vmem:[#allocation6 + $0x60] sm:$0xff]  ;;  %v4805_v25 = vpack.c.bf16 %v2186_v32, %v2182_v30  ;;  %v2207_v32 = vld [vmem:[#allocation6 + $0x110] sm:$0xff] }
 0x68d   :  { %4744 = vmatpush1.bf16.msra.mxu0 %v6016_v35  ;;  %4776 = vmatpush1.bf16.msra.mxu1 %v6020_v38  ;;  %v2180_v35 = vld [vmem:[#allocation6 + $0x38] sm:$0xff] }
 0x68e   :  { %4746 = vmatprep.subr.bf16.mxu0 %v6024_v42  ;;  %4778 = vmatprep.subr.bf16.mxu1 %v6031_v47  ;;  %v4833_v38 = vpack.c.bf16 %v2180_v35, %v2176_v29  ;;  %v4837_v29 = vpack.c.bf16 %v2188_v31, %v2184_v44  ;;  %v2187_v35 = vld [vmem:[#allocation6 + $0x70] sm:$0xff]  ;;  %v2214_v31 = vld [vmem:[#allocation6 + $0x148] sm:$0xff] }
 0x68f   :  { %v2211_v44 = vld [vmem:[#allocation6 + $0x130] sm:$0xff] }
 0x691   :  { %4748 = vmatpush1.bf16.msra.mxu0 %v6035_v50  ;;  %4780 = vmatpush1.bf16.msra.mxu1 %v6039_v54 }
 0x692   :  { %4750 = vmatprep.subr.bf16.mxu0 %v6043_v58  ;;  %4782 = vmatprep.subr.bf16.mxu1 %v6047_v61 }
 0x695   :  { %4752 = vmatpush1.bf16.msra.mxu0 %v6054_v2  ;;  %4784 = vmatpush1.bf16.msra.mxu1 %v6058_v5 }
 0x696   :  { %4754 = vmatprep.subr.bf16.mxu0 %v6062_v8  ;;  %4786 = vmatprep.subr.bf16.mxu1 %v6066_v11 }
 0x699   :  { %4756 = vmatpush1.bf16.msra.mxu0 %v6073_v15  ;;  %4788 = vmatpush1.bf16.msra.mxu1 %v6077_v19 }
 0x69a   :  { %4758 = vmatprep.subr.bf16.mxu0 %v6081_v24  ;;  %4790 = vmatprep.subr.bf16.mxu1 %v6085_v28 }
 0x69d   :  { %4760 = vmatpush1.bf16.msra.mxu0 %v6092_v33  ;;  %4792 = vmatpush1.bf16.msra.mxu1 %v6096_v39 }
 0x69e   :  { %4762 = vmatprep.subr.bf16.mxu0 %v6100_v43  ;;  %4794 = vmatprep.subr.bf16.mxu1 %v6104_v46 }
 0x6a1   :  { %4764 = vmatpush1.bf16.msra.mxu0 %v6111_v52  ;;  %4796 = vmatpush1.bf16.msra.mxu1 %v6115_v56 }
 0x6a2   :  { %4766 = vmatprep.subr.bf16.mxu0 %v6119_v60  ;;  %4798 = vmatprep.subr.bf16.mxu1 %v6123_v1 }
 0x6a5   :  { %4768 = vmatpush1.bf16.msra.mxu0 %v6130_v4  ;;  %4800 = vmatpush1.bf16.msra.mxu1 %v6134_v6 }
 0x6a6   :  { %4802 = vmatprep.subr.bf16.mxu0 %v4801_v34  ;;  %4834 = vmatprep.subr.bf16.mxu1 %v4833_v38  ;;  %v2183_v34 = vld [vmem:[#allocation6 + $0x50] sm:$0xff]  ;;  %v2190_v38 = vld [vmem:[#allocation6 + $0x88] sm:$0xff] }
 0x75b   :  { %v1765_v42 = vpop.f32.mrb[12].mxu0  ;;  %v1836_v47 = vpop.f32.mrb[12].mxu1 }
 0x75c   :  { %v5389_v50 = vadd.f32 %v1765_v42, %v6193_v16  ;;  %v5405_v54 = vadd.f32 %v1836_v47, %v6197_v18  ;;  %v1767_v58 = vpop.f32.mrb[13].mxu0  ;;  %v1838_v61 = vpop.f32.mrb[13].mxu1  ;;  %v2194_v42 = vld [vmem:[#allocation6 + $0xa8] sm:$0xff]  ;;  %v2192_v47 = vld [vmem:[#allocation6 + $0x98] sm:$0xff] }
 0x75d   :  { %v5390_v2 = vadd.f32 %v1767_v58, %v6201_v20  ;;  %v5406_v19 = vadd.f32 %v1838_v61, %v6209_v48  ;;  %v4839_v58 = vpack.c.bf16 %v2187_v35, %v2183_v34  ;;  %v2189_v61 = vld [vmem:[#allocation6 + $0x80] sm:$0xff]  ;;  %v2215_v35 = vld [vmem:[#allocation6 + $0x150] sm:$0xff] }
 0x75e   :  { %v4202_v5 = vmul.f32 -1.442695, %v5389_v50  ;;  %v4201_v8 = vmul.f32 -2.0, %v5405_v54  ;;  %v2196_v50 = vld [vmem:[#allocation6 + $0xb8] sm:$0xff]  ;;  %v4807_v54 = vpack.c.bf16 %v2185_v22, %v2181_v17  ;;  %v4851_v17 = vpack.c.bf16 %v2211_v44, %v2207_v32  ;;  %v2213_v22 = vld [vmem:[#allocation6 + $0x140] sm:$0xff] }
 0x75f   :  { %v4203_v11 = vmul.f32 -1.442695, %v5390_v2  ;;  %v4204_v39 = vmul.f32 -1.442695, %v5406_v19  ;;  %v2193_v2 = vld [vmem:[#allocation6 + $0xa0] sm:$0xff]  ;;  %v2198_v19 = vld [vmem:[#allocation6 + $0xc8] sm:$0xff] }
 0x760   :  { %5619 = vpow2.f32 %v4202_v5  ;;  %v1861_v15 = vmul.f32 1.442695, %v4201_v8  ;;  %v4809_v5 = vpack.c.bf16 %v2194_v42, %v2190_v38  ;;  %v4841_v8 = vpack.c.bf16 %v2196_v50, %v2192_v47  ;;  %v2219_v38 = vld [vmem:[#allocation6 + $0x170] sm:$0xff]  ;;  %v2222_v42 = vld [vmem:[#allocation6 + $0x188] sm:$0xff]  ;;  %v2224_v50 = vld [vmem:[#allocation6 + $0x198] sm:$0xff] }
 0x761   :  { %5621 = vpow2.f32 %v4203_v11  ;;  %v2191_v11 = vld [vmem:[#allocation6 + $0x90] sm:$0xff]  ;;  %v2226_v47 = vld [vmem:[#allocation6 + $0x1a8] sm:$0xff]  ;;  %v2111_v32 = vld [vmem:[#allocation8 + $0x58] sm:$0xff] }
 0x762   :  { %5623 = vpow2.f32 %v1861_v15  ;;  %v2195_v15 = vld [vmem:[#allocation6 + $0xb0] sm:$0xff] }
 0x76a   :  { %v5620_v24 = vpop.eup %5619 }
 0x76b   :  { %v5622_v28 = vpop.eup %5621  ;;  %v1865_v52 = vadd.f32 1.0, %v5620_v24  ;;  %v2202_v24 = vld [vmem:[#allocation6 + $0xe8] sm:$0xff] }
 0x76c   :  { %v5624_v33 = vpop.eup %5623  ;;  %v1866_v46 = vadd.f32 1.0, %v5622_v28  ;;  %v2200_v28 = vld [vmem:[#allocation6 + $0xd8] sm:$0xff] }
 0x76d   :  { %v1867_v43 = vadd.f32 1.0, %v5624_v33  ;;  %v2204_v33 = vld [vmem:[#allocation6 + $0xf8] sm:$0xff] }
 0x76f   :  { %5625 = vrcp.f32 %v1867_v43  ;;  %v4843_v43 = vpack.c.bf16 %v2195_v15, %v2191_v11  ;;  %v2223_v15 = vld [vmem:[#allocation6 + $0x190] sm:$0xff] }
 0x770   :  { %5627 = vpow2.f32 %v4204_v39  ;;  %v4811_v39 = vpack.c.bf16 %v2193_v2, %v2189_v61  ;;  %v4855_v61 = vpack.c.bf16 %v2219_v38, %v2215_v35  ;;  %v2221_v2 = vld [vmem:[#allocation6 + $0x180] sm:$0xff]  ;;  %v2119_v35 = vld [vmem:[#allocation8 + $0x98] sm:$0xff] }
 0x771   :  { %5629 = vrcp.f32 %v1866_v46  ;;  %v2197_v46 = vld [vmem:[#allocation6 + $0xc0] sm:$0xff] }
 0x772   :  { %5631 = vrcp.f32 %v1865_v52  ;;  %v2201_v52 = vld [vmem:[#allocation6 + $0xe0] sm:$0xff] }
 0x779   :  { %v5626_v56 = vpop.eup %5625 }
 0x77a   :  { %v5628_v60 = vpop.eup %5627  ;;  %v1879_v1 = vmul.f32 2.0, %v5626_v56  ;;  %v4813_v56 = vpack.c.bf16 %v2202_v24, %v2198_v19  ;;  %v2227_v19 = vld [vmem:[#allocation6 + $0x1b0] sm:$0xff]  ;;  %v2230_v24 = vld [vmem:[#allocation6 + $0x1c8] sm:$0xff] }
 0x77b   :  { %v5630_v4 = vpop.eup %5629  ;;  %v1868_v62 = vadd.f32 1.0, %v5628_v60  ;;  %v4845_v60 = vpack.c.bf16 %v2204_v33, %v2200_v28  ;;  %v2234_v28 = vld [vmem:[#allocation6 + $0x1e8] sm:$0xff]  ;;  %v2232_v33 = vld [vmem:[#allocation6 + $0x1d8] sm:$0xff] }
 0x77c   :  { %v4207_v6 = vadd.f32 -1.0, %v1879_v1  ;;  %v5632_v45 = vpop.eup %5631  ;;  %v1889_v7 = vmul.f32 %v5630_v4, %v6442_v55  ;;  %v2199_v1 = vld [vmem:[#allocation6 + $0xd0] sm:$0xff] }
 0x77d   :  { %5633 = vrcp.f32 %v1868_v62  ;;  %v2203_v4 = vld [vmem:[#allocation6 + $0xf0] sm:$0xff]  ;;  %v2208_v62 = vld [vmem:[#allocation6 + $0x118] sm:$0xff] }
 0x77e   :  { %v1890_v57 = vmul.f32 %v5632_v45, %v4207_v6  ;;  %v2206_v6 = vld [vmem:[#allocation6 + $0x108] sm:$0xff]  ;;  %v4847_v36 = vpack.c.bf16 %v2203_v4, %v2199_v1  ;;  %v2233_v1 = vld [vmem:[#allocation6 + $0x1e0] sm:$0xff]  ;;  %v2231_v4 = vld [vmem:[#allocation6 + $0x1d0] sm:$0xff] }
 0x77f   :  { %v2210_v45 = vld [vmem:[#allocation6 + $0x128] sm:$0xff] }
 0x780   :  { %v6486_v63 = vadd.f32 %v1890_v57, %v1889_v7  ;;  %v2212_v57 = vld [vmem:[#allocation6 + $0x138] sm:$0xff]  ;;  %v4815_v7 = vpack.c.bf16 %v2201_v52, %v2197_v46  ;;  %v4817_v3 = vpack.c.bf16 %v2210_v45, %v2206_v6  ;;  %v4859_v46 = vpack.c.bf16 %v2227_v19, %v2223_v15  ;;  %v2229_v52 = vld [vmem:[#allocation6 + $0x1c0] sm:$0xff]  ;;  %v2235_v6 = vld [vmem:[#allocation6 + $0x1f0] sm:$0xff] }
 0x781   :  { %v4849_v30 = vpack.c.bf16 %v2212_v57, %v2208_v62  ;;  %v4831_v45 = vpack.c.bf16 %v2233_v1, %v2229_v52  ;;  %v4863_v62 = vpack.c.bf16 %v2235_v6, %v2231_v4  ;;  %v2100_v57 = vld [vmem:[#allocation8] sm:$0xff]  ;;  %v2127_v15 = vld [vmem:[#allocation8 + $0xd8] sm:$0xff]  ;;  %v2130_v52 = vld [vmem:[#allocation8 + $0xf0] sm:$0xff] }
 0x782   :  { %5635 = vtanh.f32 %v6486_v63  ;;  %v2137_v1 = vld [vmem:[#allocation8 + $0x128] sm:$0xff]  ;;  %v2135_v4 = vld [vmem:[#allocation8 + $0x118] sm:$0xff] }
 0x783   :  { %v2139_v6 = vld [vmem:[#allocation8 + $0x138] sm:$0xff] }
 0x787   :  { %v5634_v49 = vpop.eup %5633 }
 0x78c   :  { %v5636_v51 = vpop.eup %5635 }
 0x78d   :  { %v6489_v55 = vmul.f32 %v5636_v51, %v5634_v49  ;;  %v2218_v49 = vld [vmem:[#allocation6 + $0x168] sm:$0xff]  ;;  %v2216_v51 = vld [vmem:[#allocation6 + $0x158] sm:$0xff] }
 0x78f   :  { %1968 = vmatmul.mubr.f32.vlgmr.msra.gmra.mrb[14].mxu0 %v6489_v55  ;;  %2039 = vmatmul.mubr.f32.vlgmr.msra.gmra.mrb[14].mxu1 %v6489_v55 }
 0x790   :  { %4804 = vmatpush1.bf16.msra.mxu0 %v4803_v40  ;;  %4836 = vmatpush1.bf16.msra.mxu1 %v4835_v59  ;;  %v2220_v40 = vld [vmem:[#allocation6 + $0x178] sm:$0xff]  ;;  %v4819_v59 = vpack.c.bf16 %v2209_v12, %v2205_v26  ;;  %v2102_v26 = vld [vmem:[#allocation8 + $0x10] sm:$0xff] }
 0x791   :  { %4806 = vmatprep.subr.bf16.mxu0 %v4805_v25  ;;  %4838 = vmatprep.subr.bf16.mxu1 %v4837_v29  ;;  %v2217_v25 = vld [vmem:[#allocation6 + $0x160] sm:$0xff]  ;;  %v4821_v29 = vpack.c.bf16 %v2218_v49, %v2214_v31  ;;  %v4853_v34 = vpack.c.bf16 %v2220_v40, %v2216_v51  ;;  %v2106_v12 = vld [vmem:[#allocation8 + $0x30] sm:$0xff]  ;;  %v2115_v31 = vld [vmem:[#allocation8 + $0x78] sm:$0xff] }
 0x792   :  { %2322 = vmatprep.mubr.f32.mxu0 %v5874_v0  ;;  %2435 = vmatprep.mubr.f32.mxu1 %v5874_v0  ;;  %v2108_v49 = vld [vmem:[#allocation8 + $0x40] sm:$0xff]  ;;  %v6537_v40 = vpack.c.bf16 %v2115_v31, %v2111_v32  ;;  %v2147_v32 = vld [vmem:[#allocation8 + $0x178] sm:$0xff] }
 0x793   :  { %v2112_v51 = vld [vmem:[#allocation8 + $0x60] sm:$0xff] }
 0x794   :  { %4808 = vmatpush1.bf16.msra.mxu0 %v4807_v54  ;;  %4840 = vmatpush1.bf16.msra.mxu1 %v4839_v58  ;;  %v2228_v54 = vld [vmem:[#allocation6 + $0x1b8] sm:$0xff]  ;;  %v4823_v58 = vpack.c.bf16 %v2217_v25, %v2213_v22  ;;  %v2114_v22 = vld [vmem:[#allocation8 + $0x70] sm:$0xff]  ;;  %v2140_v31 = vld [vmem:[#allocation8 + $0x140] sm:$0xff] }
 0x795   :  { %4810 = vmatprep.subr.bf16.mxu0 %v4809_v5  ;;  %4842 = vmatprep.subr.bf16.mxu1 %v4841_v8  ;;  %v2225_v5 = vld [vmem:[#allocation6 + $0x1a0] sm:$0xff]  ;;  %v4825_v8 = vpack.c.bf16 %v2226_v47, %v2222_v42  ;;  %v4857_v11 = vpack.c.bf16 %v2228_v54, %v2224_v50  ;;  %v2123_v42 = vld [vmem:[#allocation8 + $0xb8] sm:$0xff] }
 0x796   :  { %v2116_v47 = vld [vmem:[#allocation8 + $0x80] sm:$0xff]  ;;  %v6549_v54 = vpack.c.bf16 %v2123_v42, %v2119_v35  ;;  %v2153_v35 = vld [vmem:[#allocation8 + $0x1a8] sm:$0xff]  ;;  %v2151_v42 = vld [vmem:[#allocation8 + $0x198] sm:$0xff] }
 0x797   :  { %v2120_v50 = vld [vmem:[#allocation8 + $0xa0] sm:$0xff] }
 0x798   :  { %4812 = vmatpush1.bf16.msra.mxu0 %v4811_v39  ;;  %4844 = vmatpush1.bf16.msra.mxu1 %v4843_v43  ;;  %v2236_v39 = vld [vmem:[#allocation6 + $0x1f8] sm:$0xff]  ;;  %v4827_v43 = vpack.c.bf16 %v2225_v5, %v2221_v2  ;;  %v2122_v2 = vld [vmem:[#allocation8 + $0xb0] sm:$0xff] }
 0x799   :  { %4814 = vmatprep.subr.bf16.mxu0 %v4813_v56  ;;  %4846 = vmatprep.subr.bf16.mxu1 %v4845_v60  ;;  %v4829_v56 = vpack.c.bf16 %v2234_v28, %v2230_v24  ;;  %v4861_v60 = vpack.c.bf16 %v2236_v39, %v2232_v33  ;;  %v2131_v24 = vld [vmem:[#allocation8 + $0xf8] sm:$0xff]  ;;  %v2124_v28 = vld [vmem:[#allocation8 + $0xc0] sm:$0xff] }
 0x79a   :  { %v2128_v33 = vld [vmem:[#allocation8 + $0xe0] sm:$0xff]  ;;  %v6561_v39 = vpack.c.bf16 %v2131_v24, %v2127_v15  ;;  %v2150_v15 = vld [vmem:[#allocation8 + $0x190] sm:$0xff] }
 0x79b   :  { %v2154_v24 = vld [vmem:[#allocation8 + $0x1b0] sm:$0xff] }
 0x79c   :  { %4816 = vmatpush1.bf16.msra.mxu0 %v4815_v7  ;;  %4848 = vmatpush1.bf16.msra.mxu1 %v4847_v36 }
 0x79d   :  { %4818 = vmatprep.subr.bf16.mxu0 %v4817_v3  ;;  %4850 = vmatprep.subr.bf16.mxu1 %v4849_v30  ;;  %v2109_v3 = vld [vmem:[#allocation8 + $0x48] sm:$0xff] }
 0x79e   :  { %v2113_v30 = vld [vmem:[#allocation8 + $0x68] sm:$0xff] }
 0x79f   :  { %v6535_v44 = vpack.c.bf16 %v2113_v30, %v2109_v3  ;;  %v2143_v30 = vld [vmem:[#allocation8 + $0x158] sm:$0xff] }
 0x7a0   :  { %4820 = vmatpush1.bf16.msra.mxu0 %v4819_v59  ;;  %4852 = vmatpush1.bf16.msra.mxu1 %v4851_v17  ;;  %v6539_v59 = vpack.c.bf16 %v2112_v51, %v2108_v49  ;;  %v2110_v17 = vld [vmem:[#allocation8 + $0x50] sm:$0xff]  ;;  %v6583_v49 = vpack.c.bf16 %v2147_v32, %v2143_v30  ;;  %v2144_v51 = vld [vmem:[#allocation8 + $0x160] sm:$0xff] }
 0x7a1   :  { %4822 = vmatprep.subr.bf16.mxu0 %v4821_v29  ;;  %4854 = vmatprep.subr.bf16.mxu1 %v4853_v34  ;;  %v6542_v25 = vpack.c.bf16 %v2114_v22, %v2110_v17  ;;  %v2117_v29 = vld [vmem:[#allocation8 + $0x88] sm:$0xff]  ;;  %v2142_v17 = vld [vmem:[#allocation8 + $0x150] sm:$0xff] }
 0x7a2   :  { %v2121_v34 = vld [vmem:[#allocation8 + $0xa8] sm:$0xff]  ;;  %v2146_v22 = vld [vmem:[#allocation8 + $0x170] sm:$0xff] }
 0x7a3   :  { %v6547_v38 = vpack.c.bf16 %v2121_v34, %v2117_v29  ;;  %v6586_v29 = vpack.c.bf16 %v2144_v51, %v2140_v31  ;;  %v2149_v34 = vld [vmem:[#allocation8 + $0x188] sm:$0xff] }
 0x7a4   :  { %4824 = vmatpush1.bf16.msra.mxu0 %v4823_v58  ;;  %4856 = vmatpush1.bf16.msra.mxu1 %v4855_v61  ;;  %v6551_v58 = vpack.c.bf16 %v2120_v50, %v2116_v47  ;;  %v2118_v61 = vld [vmem:[#allocation8 + $0x90] sm:$0xff]  ;;  %v6590_v47 = vpack.c.bf16 %v2146_v22, %v2142_v17  ;;  %v6592_v50 = vpack.c.bf16 %v2153_v35, %v2149_v34 }
 0x7a5   :  { %4826 = vmatprep.subr.bf16.mxu0 %v4825_v8  ;;  %4858 = vmatprep.subr.bf16.mxu1 %v4857_v11  ;;  %v6554_v5 = vpack.c.bf16 %v2122_v2, %v2118_v61  ;;  %v2125_v8 = vld [vmem:[#allocation8 + $0xc8] sm:$0xff]  ;;  %v2155_v61 = vld [vmem:[#allocation8 + $0x1b8] sm:$0xff]  ;;  %v2148_v2 = vld [vmem:[#allocation8 + $0x180] sm:$0xff] }
 0x7a6   :  { %v2129_v11 = vld [vmem:[#allocation8 + $0xe8] sm:$0xff] }
 0x7a7   :  { %v6559_v19 = vpack.c.bf16 %v2129_v11, %v2125_v8  ;;  %v2152_v8 = vld [vmem:[#allocation8 + $0x1a0] sm:$0xff]  ;;  %v6595_v11 = vpack.c.bf16 %v2155_v61, %v2151_v42 }
 0x7a8   :  { %4828 = vmatpush1.bf16.msra.mxu0 %v4827_v43  ;;  %4860 = vmatpush1.bf16.msra.mxu1 %v4859_v46  ;;  %v6563_v43 = vpack.c.bf16 %v2128_v33, %v2124_v28  ;;  %v2126_v46 = vld [vmem:[#allocation8 + $0xd0] sm:$0xff]  ;;  %v6598_v28 = vpack.c.bf16 %v2152_v8, %v2148_v2  ;;  %v6602_v33 = vpack.c.bf16 %v2154_v24, %v2150_v15 }
 0x7a9   :  { %4830 = vmatprep.subr.bf16.mxu0 %v4829_v56  ;;  %4862 = vmatprep.subr.bf16.mxu1 %v4861_v60  ;;  %v2133_v56 = vld [vmem:[#allocation8 + $0x108] sm:$0xff]  ;;  %v6566_v60 = vpack.c.bf16 %v2130_v52, %v2126_v46 }
 0x7aa   :  { %v2157_v46 = vld [vmem:[#allocation8 + $0x1c8] sm:$0xff] }
 0x7ab   :  { %v2161_v52 = vld [vmem:[#allocation8 + $0x1e8] sm:$0xff] }
 0x7ac   :  { %4832 = vmatpush1.bf16.msra.mxu0 %v4831_v45  ;;  %4864 = vmatpush1.bf16.msra.mxu1 %v4863_v62  ;;  %v6570_v45 = vpack.c.bf16 %v2137_v1, %v2133_v56  ;;  %v6572_v62 = vpack.c.bf16 %v2139_v6, %v2135_v4  ;;  %v2159_v56 = vld [vmem:[#allocation8 + $0x1d8] sm:$0xff]  ;;  %v6607_v1 = vpack.c.bf16 %v2161_v52, %v2157_v46  ;;  %v2156_v6 = vld [vmem:[#allocation8 + $0x1c0] sm:$0xff] }
 0x7ad   :  { %v2163_v4 = vld [vmem:[#allocation8 + $0x1f8] sm:$0xff] }
 0x7af   :  { %2323 = vmatmul.mubr.f32.vlgmr.msra.gmra.mrb[16].mxu0 %v6215_v41  ;;  %2436 = vmatmul.mubr.f32.vlgmr.msra.gmra.mrb[16].mxu1 %v6215_v41  ;;  %v2101_v41 = vld [vmem:[#allocation8 + $0x8] sm:$0xff] }
 0x7b0   :  { %2328 = vmatprep.mubr.f32.mxu0 %v5874_v0  ;;  %2441 = vmatprep.mubr.f32.mxu1 %v5874_v0 }
 0x7b3   :  { %2329 = vmatmul.mubr.f32.gmra.mrb[18].mxu0 %v6261_v23  ;;  %2442 = vmatmul.mubr.f32.gmra.mrb[18].mxu1 %v6261_v23  ;;  %v2105_v23 = vld [vmem:[#allocation8 + $0x28] sm:$0xff] }
 0x7b4   :  { %2334 = vmatprep.mubr.f32.mxu0 %v5874_v0  ;;  %2447 = vmatprep.mubr.f32.mxu1 %v5874_v0 }
 0x7b7   :  { %2335 = vmatmul.mubr.f32.gmra.mrb[20].mxu0 %v6307_v53  ;;  %2448 = vmatmul.mubr.f32.gmra.mrb[20].mxu1 %v6307_v53  ;;  %v2103_v53 = vld [vmem:[#allocation8 + $0x18] sm:$0xff] }
 0x7b8   :  { %2340 = vmatprep.mubr.f32.mxu0 %v5874_v0  ;;  %2453 = vmatprep.mubr.f32.mxu1 %v5874_v0 }
 0x7bb   :  { %2341 = vmatmul.mubr.f32.gmra.mrb[22].mxu0 %v6353_v37  ;;  %2454 = vmatmul.mubr.f32.gmra.mrb[22].mxu1 %v6353_v37  ;;  %v6523_v37 = vpack.c.bf16 %v2105_v23, %v2101_v41  ;;  %v2132_v41 = vld [vmem:[#allocation8 + $0x100] sm:$0xff] }
 0x7bc   :  { %2346 = vmatprep.mubr.f32.mxu0 %v5874_v0  ;;  %2459 = vmatprep.mubr.f32.mxu1 %v5874_v0  ;;  %v2136_v23 = vld [vmem:[#allocation8 + $0x120] sm:$0xff] }
 0x7bd   :  { %4866 = vmatprep.subr.bf16.mxu0 %v6523_v37 }
 0x7bf   :  { %2347 = vmatmul.mubr.f32.gmra.mrb[24].mxu0 %v6399_v27  ;;  %2460 = vmatmul.mubr.f32.gmra.mrb[24].mxu1 %v6399_v27  ;;  %v2107_v27 = vld [vmem:[#allocation8 + $0x38] sm:$0xff] }
 0x7c0   :  { %2352 = vmatprep.mubr.f32.mxu0 %v5874_v0  ;;  %2465 = vmatprep.mubr.f32.mxu1 %v5874_v0  ;;  %v6525_v7 = vpack.c.bf16 %v2107_v27, %v2103_v53  ;;  %v2134_v53 = vld [vmem:[#allocation8 + $0x110] sm:$0xff]  ;;  %v6575_v27 = vpack.c.bf16 %v2136_v23, %v2132_v41  ;;  %v2160_v41 = vld [vmem:[#allocation8 + $0x1e0] sm:$0xff]  ;;  %v6609_v23 = vpack.c.bf16 %v2163_v4, %v2159_v56 }
 0x7c2   :  { %4898 = vmatprep.subr.bf16.mxu1 %v6525_v7 }
 0x7c3   :  { %2353 = vmatmul.mubr.f32.gmra.mrb[26].mxu0 %v6445_v21  ;;  %2466 = vmatmul.mubr.f32.gmra.mrb[26].mxu1 %v6445_v21  ;;  %v2104_v21 = vld [vmem:[#allocation8 + $0x20] sm:$0xff] }
 0x7c4   :  { %2358 = vmatprep.mubr.f32.mxu0 %v5874_v0  ;;  %2471 = vmatprep.mubr.f32.mxu1 %v5874_v0  ;;  %v6527_v36 = vpack.c.bf16 %v2104_v21, %v2100_v57  ;;  %v2138_v57 = vld [vmem:[#allocation8 + $0x130] sm:$0xff]  ;;  %v2141_v21 = vld [vmem:[#allocation8 + $0x148] sm:$0xff] }
 0x7c6   :  { %4868 = vmatpush1.bf16.msra.mxu0 %v6527_v36 }
 0x7c7   :  { %2359 = vmatmul.mubr.f32.gmra.mrb[28].mxu0 %v6489_v55  ;;  %2472 = vmatmul.mubr.f32.gmra.mrb[28].mxu1 %v6489_v55  ;;  %v6530_v55 = vpack.c.bf16 %v2106_v12, %v2102_v26  ;;  %v2145_v26 = vld [vmem:[#allocation8 + $0x168] sm:$0xff]  ;;  %v6579_v12 = vpack.c.bf16 %v2138_v57, %v2134_v53  ;;  %v6611_v53 = vpack.c.bf16 %v2160_v41, %v2156_v6  ;;  %v2158_v57 = vld [vmem:[#allocation8 + $0x1d0] sm:$0xff] }
 0x7c8   :  { %2364 = vmatprep.mubr.f32.mxu0 %v5874_v0  ;;  %2477 = vmatprep.mubr.f32.mxu1 %v5874_v0  ;;  %v6581_v3 = vpack.c.bf16 %v2145_v26, %v2141_v21  ;;  %v2162_v21 = vld [vmem:[#allocation8 + $0x1f0] sm:$0xff] }
 0x7c9   :  { %4900 = vmatpush1.bf16.msra.mxu1 %v6530_v55  ;;  %4870 = vmatprep.subr.bf16.mxu0 %v6535_v44  ;;  %v6614_v26 = vpack.c.bf16 %v2162_v21, %v2158_v57 }
 0x7ca   :  { %4902 = vmatprep.subr.bf16.mxu1 %v6537_v40  ;;  %4872 = vmatpush1.bf16.msra.mxu0 %v6539_v59 }
 0x7cb   :  { %4874 = vmatprep.subr.bf16.mxu0 %v6547_v38 }
 0x7cd   :  { %4904 = vmatpush1.bf16.msra.mxu1 %v6542_v25 }
 0x7ce   :  { %4906 = vmatprep.subr.bf16.mxu1 %v6549_v54  ;;  %4876 = vmatpush1.bf16.msra.mxu0 %v6551_v58 }
 0x7cf   :  { %4878 = vmatprep.subr.bf16.mxu0 %v6559_v19 }
 0x7d1   :  { %4908 = vmatpush1.bf16.msra.mxu1 %v6554_v5 }
 0x7d2   :  { %4910 = vmatprep.subr.bf16.mxu1 %v6561_v39  ;;  %4880 = vmatpush1.bf16.msra.mxu0 %v6563_v43 }
 0x7d3   :  { %4882 = vmatprep.subr.bf16.mxu0 %v6570_v45 }
 0x7d5   :  { %4912 = vmatpush1.bf16.msra.mxu1 %v6566_v60 }
 0x7d6   :  { %4914 = vmatprep.subr.bf16.mxu1 %v6572_v62  ;;  %4884 = vmatpush1.bf16.msra.mxu0 %v6575_v27 }
 0x7d7   :  { %4886 = vmatprep.subr.bf16.mxu0 %v6581_v3 }
 0x7d9   :  { %4916 = vmatpush1.bf16.msra.mxu1 %v6579_v12 }
 0x7da   :  { %4918 = vmatprep.subr.bf16.mxu1 %v6583_v49  ;;  %4888 = vmatpush1.bf16.msra.mxu0 %v6586_v29 }
 0x7db   :  { %4890 = vmatprep.subr.bf16.mxu0 %v6592_v50 }
 0x7dd   :  { %4920 = vmatpush1.bf16.msra.mxu1 %v6590_v47 }
 0x7de   :  { %4922 = vmatprep.subr.bf16.mxu1 %v6595_v11  ;;  %4892 = vmatpush1.bf16.msra.mxu0 %v6598_v28 }
 0x7df   :  { %4894 = vmatprep.subr.bf16.mxu0 %v6607_v1 }
 0x7e1   :  { %4924 = vmatpush1.bf16.msra.mxu1 %v6602_v33 }
 0x7e2   :  { %4926 = vmatprep.subr.bf16.mxu1 %v6609_v23  ;;  %4896 = vmatpush1.bf16.msra.mxu0 %v6611_v53 }
 0x7e3   :  { %4930 = vmatprep.subr.bf16.mxu0 %v6523_v37 }
 0x7e5   :  { %4928 = vmatpush1.bf16.msra.mxu1 %v6614_v26 }
 0x7e6   :  { %4962 = vmatprep.subr.bf16.mxu1 %v6525_v7 }
 0x862   :  { %v1969_v30 = vpop.f32.mrb[14].mxu0  ;;  %v2040_v32 = vpop.f32.mrb[14].mxu1 }
 0x863   :  { %v5391_v31 = vadd.f32 %v1969_v30, %v6193_v16  ;;  %v5407_v51 = vadd.f32 %v2040_v32, %v6197_v18  ;;  %v1971_v17 = vpop.f32.mrb[15].mxu0  ;;  %v2042_v22 = vpop.f32.mrb[15].mxu1 }
 0x864   :  { %v5392_v34 = vadd.f32 %v1971_v17, %v6201_v20  ;;  %v5408_v8 = vadd.f32 %v2042_v22, %v6209_v48 }
 0x865   :  { %v4210_v35 = vmul.f32 -1.442695, %v5391_v31  ;;  %v4209_v42 = vmul.f32 -2.0, %v5407_v51 }
 0x866   :  { %v4211_v61 = vmul.f32 -1.442695, %v5392_v34  ;;  %v4212_v52 = vmul.f32 -1.442695, %v5408_v8 }
 0x867   :  { %5637 = vpow2.f32 %v4210_v35  ;;  %v2065_v2 = vmul.f32 1.442695, %v4209_v42 }
 0x868   :  { %5639 = vpow2.f32 %v4211_v61 }
 0x869   :  { %5641 = vpow2.f32 %v2065_v2 }
 0x871   :  { %v5638_v15 = vpop.eup %5637 }
 0x872   :  { %v5640_v24 = vpop.eup %5639  ;;  %v2069_v18 = vadd.f32 1.0, %v5638_v15 }
 0x873   :  { %v5642_v46 = vpop.eup %5641  ;;  %v2070_v56 = vadd.f32 1.0, %v5640_v24 }
 0x874   :  { %v2071_v16 = vadd.f32 1.0, %v5642_v46 }
 0x876   :  { %5643 = vrcp.f32 %v2071_v16 }
 0x877   :  { %5645 = vpow2.f32 %v4212_v52 }
 0x878   :  { %5647 = vrcp.f32 %v2070_v56 }
 0x879   :  { %5649 = vrcp.f32 %v2069_v18 }
 0x880   :  { %v5644_v20 = vpop.eup %5643 }
 0x881   :  { %v5646_v4 = vpop.eup %5645  ;;  %v2083_v6 = vmul.f32 2.0, %v5644_v20 }
 0x882   :  { %v5648_v41 = vpop.eup %5647  ;;  %v2072_v30 = vadd.f32 1.0, %v5646_v4 }
 0x883   :  { %v4215_v57 = vadd.f32 -1.0, %v2083_v6  ;;  %v5650_v21 = vpop.eup %5649  ;;  %v2093_v48 = vmul.f32 %v5648_v41, %v6486_v63  ;;  %v2164_v63 = vld [vmem:[%s6959_s6] sm:$0xf] }
 0x884   :  { %5651 = vrcp.f32 %v2072_v30  ;;  %v6669_v34 = vrot.slane %v2164_v63, %v168_v10  ;;  %v6673_v35 = vrot.slane %v2164_v63, %v176_v13  ;;  %v6677_v42 = vrot.slane %v2164_v63, %v172_v14 }
 0x885   :  { %v2094_v32 = vmul.f32 %v5650_v21, %v4215_v57  ;;  %v6962_v14 = vsub.s32 3, %v6183_v9 }
 0x887   :  { %v2095_v31 = vadd.f32 %v2094_v32, %v2093_v48  ;;  %v6684_v18 = vrot.slane %v2164_v63, %v6962_v14 }
 0x889   :  { %5653 = vtanh.f32 %v2095_v31 }
 0x88e   :  { %v5652_v51 = vpop.eup %5651 }
 0x893   :  { %v5654_v17 = vpop.eup %5653 }
 0x894   :  { %v2097_v22 = vmul.f32 %v5654_v17, %v5652_v51 }
 0x896   :  { %2365 = vmatmul.mubr.f32.gmra.mrb[30].mxu0 %v2097_v22  ;;  %2478 = vmatmul.mubr.f32.gmra.mrb[30].mxu1 %v2097_v22 }
 0x897   :  { %2584 = vmatprep.mubr.f32.mxu0 %v5874_v0  ;;  %2655 = vmatprep.mubr.f32.mxu1 %v5874_v0 }
 0x89a   :  { %2585 = vmatmul.mubr.f32.vlgmr.msra.gmra.mrb[16].mxu0 %v5874_v0  ;;  %2656 = vmatmul.mubr.f32.vlgmr.msra.gmra.mrb[16].mxu1 %v5874_v0 }
 0x89b   :  { %4932 = vmatpush1.bf16.msra.mxu0 %v6527_v36  ;;  %4964 = vmatpush1.bf16.msra.mxu1 %v6530_v55 }
 0x89c   :  { %4934 = vmatprep.subr.bf16.mxu0 %v6535_v44  ;;  %4966 = vmatprep.subr.bf16.mxu1 %v6537_v40 }
 0x89d   :  { %2784 = vmatprep.mubr.f32.mxu0 %v5874_v0  ;;  %2855 = vmatprep.mubr.f32.mxu1 %v5874_v0 }
 0x89f   :  { %4936 = vmatpush1.bf16.msra.mxu0 %v6539_v59  ;;  %4968 = vmatpush1.bf16.msra.mxu1 %v6542_v25 }
 0x8a0   :  { %4938 = vmatprep.subr.bf16.mxu0 %v6547_v38  ;;  %4970 = vmatprep.subr.bf16.mxu1 %v6549_v54 }
 0x8a3   :  { %4940 = vmatpush1.bf16.msra.mxu0 %v6551_v58  ;;  %4972 = vmatpush1.bf16.msra.mxu1 %v6554_v5 }
 0x8a4   :  { %4942 = vmatprep.subr.bf16.mxu0 %v6559_v19  ;;  %4974 = vmatprep.subr.bf16.mxu1 %v6561_v39 }
 0x8a7   :  { %4944 = vmatpush1.bf16.msra.mxu0 %v6563_v43  ;;  %4976 = vmatpush1.bf16.msra.mxu1 %v6566_v60 }
 0x8a8   :  { %4946 = vmatprep.subr.bf16.mxu0 %v6570_v45  ;;  %4978 = vmatprep.subr.bf16.mxu1 %v6572_v62 }
 0x8ab   :  { %4948 = vmatpush1.bf16.msra.mxu0 %v6575_v27  ;;  %4980 = vmatpush1.bf16.msra.mxu1 %v6579_v12 }
 0x8ac   :  { %4950 = vmatprep.subr.bf16.mxu0 %v6581_v3  ;;  %4982 = vmatprep.subr.bf16.mxu1 %v6583_v49 }
 0x8af   :  { %4952 = vmatpush1.bf16.msra.mxu0 %v6586_v29  ;;  %4984 = vmatpush1.bf16.msra.mxu1 %v6590_v47 }
 0x8b0   :  { %4954 = vmatprep.subr.bf16.mxu0 %v6592_v50  ;;  %4986 = vmatprep.subr.bf16.mxu1 %v6595_v11 }
 0x8b3   :  { %4956 = vmatpush1.bf16.msra.mxu0 %v6598_v28  ;;  %4988 = vmatpush1.bf16.msra.mxu1 %v6602_v33 }
 0x8b4   :  { %4958 = vmatprep.subr.bf16.mxu0 %v6607_v1  ;;  %4990 = vmatprep.subr.bf16.mxu1 %v6609_v23 }
 0x8b7   :  { %4960 = vmatpush1.bf16.msra.mxu0 %v6611_v53  ;;  %4992 = vmatpush1.bf16.msra.mxu1 %v6614_v26 }
 0x8b8   :  { %4994 = vmatprep.subr.bf16.mxu0 %v6523_v37  ;;  %5026 = vmatprep.subr.bf16.mxu1 %v6525_v7 }
 0x96d   :  { %v2586_v61 = vpop.f32.mrb[16].mxu0  ;;  %v2657_v2 = vpop.f32.mrb[16].mxu1 }
 0x96e   :  { %v5409_v8 = vadd.f32 %v2586_v61, %v6669_v34  ;;  %v5425_v15 = vadd.f32 %v2657_v2, %v6673_v35  ;;  %v2588_v24 = vpop.f32.mrb[17].mxu0  ;;  %v2659_v46 = vpop.f32.mrb[17].mxu1 }
 0x96f   :  { %v5410_v52 = vadd.f32 %v2588_v24, %v6677_v42  ;;  %v5426_v20 = vadd.f32 %v2659_v46, %v6684_v18 }
 0x970   :  { %v4218_v10 = vmul.f32 -1.442695, %v5409_v8  ;;  %v4217_v16 = vmul.f32 -2.0, %v5425_v15 }
 0x971   :  { %v4219_v56 = vmul.f32 -1.442695, %v5410_v52  ;;  %v4220_v57 = vmul.f32 -1.442695, %v5426_v20 }
 0x972   :  { %5655 = vpow2.f32 %v4218_v10  ;;  %v2682_v13 = vmul.f32 1.442695, %v4217_v16 }
 0x973   :  { %5657 = vpow2.f32 %v4219_v56 }
 0x974   :  { %5659 = vpow2.f32 %v2682_v13 }
 0x97c   :  { %v5656_v4 = vpop.eup %5655 }
 0x97d   :  { %v5658_v6 = vpop.eup %5657  ;;  %v2686_v32 = vadd.f32 1.0, %v5656_v4 }
 0x97e   :  { %v5660_v41 = vpop.eup %5659  ;;  %v2687_v30 = vadd.f32 1.0, %v5658_v6 }
 0x97f   :  { %v2688_v21 = vadd.f32 1.0, %v5660_v41 }
 0x981   :  { %5661 = vrcp.f32 %v2688_v21 }
 0x982   :  { %5663 = vpow2.f32 %v4220_v57 }
 0x983   :  { %5665 = vrcp.f32 %v2687_v30 }
 0x984   :  { %5667 = vrcp.f32 %v2686_v32 }
 0x98b   :  { %v5662_v48 = vpop.eup %5661 }
 0x98c   :  { %v5664_v31 = vpop.eup %5663  ;;  %v2700_v51 = vmul.f32 2.0, %v5662_v48 }
 0x98d   :  { %v5666_v17 = vpop.eup %5665  ;;  %v2689_v63 = vadd.f32 1.0, %v5664_v31 }
 0x98e   :  { %v4223_v9 = vadd.f32 -1.0, %v2700_v51  ;;  %v5668_v22 = vpop.eup %5667  ;;  %v2710_v2 = vmul.f32 0.0, %v5666_v17 }
 0x98f   :  { %5669 = vrcp.f32 %v2689_v63 }
 0x990   :  { %v2711_v61 = vmul.f32 %v5668_v22, %v4223_v9 }
 0x992   :  { %v6687_v8 = vadd.f32 %v2711_v61, %v2710_v2 }
 0x994   :  { %5671 = vtanh.f32 %v6687_v8 }
 0x999   :  { %v5670_v15 = vpop.eup %5669 }
 0x99e   :  { %v5672_v24 = vpop.eup %5671 }
 0x99f   :  { %v2714_v46 = vmul.f32 %v5672_v24, %v5670_v15 }
 0x9a1   :  { %2785 = vmatmul.mubr.f32.vlgmr.msra.gmra.mrb[18].mxu0 %v2714_v46  ;;  %2856 = vmatmul.mubr.f32.vlgmr.msra.gmra.mrb[18].mxu1 %v2714_v46 }
 0x9a2   :  { %4996 = vmatpush1.bf16.msra.mxu0 %v6527_v36  ;;  %5028 = vmatpush1.bf16.msra.mxu1 %v6530_v55 }
 0x9a3   :  { %4998 = vmatprep.subr.bf16.mxu0 %v6535_v44  ;;  %5030 = vmatprep.subr.bf16.mxu1 %v6537_v40 }
 0x9a4   :  { %2984 = vmatprep.mubr.f32.mxu0 %v5874_v0  ;;  %3055 = vmatprep.mubr.f32.mxu1 %v5874_v0 }
 0x9a6   :  { %5000 = vmatpush1.bf16.msra.mxu0 %v6539_v59  ;;  %5032 = vmatpush1.bf16.msra.mxu1 %v6542_v25 }
 0x9a7   :  { %5002 = vmatprep.subr.bf16.mxu0 %v6547_v38  ;;  %5034 = vmatprep.subr.bf16.mxu1 %v6549_v54 }
 0x9aa   :  { %5004 = vmatpush1.bf16.msra.mxu0 %v6551_v58  ;;  %5036 = vmatpush1.bf16.msra.mxu1 %v6554_v5 }
 0x9ab   :  { %5006 = vmatprep.subr.bf16.mxu0 %v6559_v19  ;;  %5038 = vmatprep.subr.bf16.mxu1 %v6561_v39 }
 0x9ae   :  { %5008 = vmatpush1.bf16.msra.mxu0 %v6563_v43  ;;  %5040 = vmatpush1.bf16.msra.mxu1 %v6566_v60 }
 0x9af   :  { %5010 = vmatprep.subr.bf16.mxu0 %v6570_v45  ;;  %5042 = vmatprep.subr.bf16.mxu1 %v6572_v62 }
 0x9b2   :  { %5012 = vmatpush1.bf16.msra.mxu0 %v6575_v27  ;;  %5044 = vmatpush1.bf16.msra.mxu1 %v6579_v12 }
 0x9b3   :  { %5014 = vmatprep.subr.bf16.mxu0 %v6581_v3  ;;  %5046 = vmatprep.subr.bf16.mxu1 %v6583_v49 }
 0x9b6   :  { %5016 = vmatpush1.bf16.msra.mxu0 %v6586_v29  ;;  %5048 = vmatpush1.bf16.msra.mxu1 %v6590_v47 }
 0x9b7   :  { %5018 = vmatprep.subr.bf16.mxu0 %v6592_v50  ;;  %5050 = vmatprep.subr.bf16.mxu1 %v6595_v11 }
 0x9ba   :  { %5020 = vmatpush1.bf16.msra.mxu0 %v6598_v28  ;;  %5052 = vmatpush1.bf16.msra.mxu1 %v6602_v33 }
 0x9bb   :  { %5022 = vmatprep.subr.bf16.mxu0 %v6607_v1  ;;  %5054 = vmatprep.subr.bf16.mxu1 %v6609_v23 }
 0x9be   :  { %5024 = vmatpush1.bf16.msra.mxu0 %v6611_v53  ;;  %5056 = vmatpush1.bf16.msra.mxu1 %v6614_v26 }
 0x9bf   :  { %5058 = vmatprep.subr.bf16.mxu0 %v6523_v37  ;;  %5090 = vmatprep.subr.bf16.mxu1 %v6525_v7 }
 0xa74   :  { %v2786_v52 = vpop.f32.mrb[18].mxu0  ;;  %v2857_v10 = vpop.f32.mrb[18].mxu1 }
 0xa75   :  { %v5411_v16 = vadd.f32 %v2786_v52, %v6669_v34  ;;  %v5427_v56 = vadd.f32 %v2857_v10, %v6673_v35  ;;  %v2788_v13 = vpop.f32.mrb[19].mxu0  ;;  %v2859_v14 = vpop.f32.mrb[19].mxu1 }
 0xa76   :  { %v5412_v20 = vadd.f32 %v2788_v13, %v6677_v42  ;;  %v5428_v21 = vadd.f32 %v2859_v14, %v6684_v18 }
 0xa77   :  { %v4226_v4 = vmul.f32 -1.442695, %v5411_v16  ;;  %v4225_v6 = vmul.f32 -2.0, %v5427_v56 }
 0xa78   :  { %v4227_v41 = vmul.f32 -1.442695, %v5412_v20  ;;  %v4228_v31 = vmul.f32 -1.442695, %v5428_v21 }
 0xa79   :  { %5673 = vpow2.f32 %v4226_v4  ;;  %v2882_v57 = vmul.f32 1.442695, %v4225_v6 }
 0xa7a   :  { %5675 = vpow2.f32 %v4227_v41 }
 0xa7b   :  { %5677 = vpow2.f32 %v2882_v57 }
 0xa83   :  { %v5674_v30 = vpop.eup %5673 }
 0xa84   :  { %v5676_v32 = vpop.eup %5675  ;;  %v2886_v9 = vadd.f32 1.0, %v5674_v30 }
 0xa85   :  { %v5678_v48 = vpop.eup %5677  ;;  %v2887_v17 = vadd.f32 1.0, %v5676_v32 }
 0xa86   :  { %v2888_v51 = vadd.f32 1.0, %v5678_v48 }
 0xa88   :  { %5679 = vrcp.f32 %v2888_v51 }
 0xa89   :  { %5681 = vpow2.f32 %v4228_v31 }
 0xa8a   :  { %5683 = vrcp.f32 %v2887_v17 }
 0xa8b   :  { %5685 = vrcp.f32 %v2886_v9 }
 0xa92   :  { %v5680_v22 = vpop.eup %5679 }
 0xa93   :  { %v5682_v63 = vpop.eup %5681  ;;  %v2900_v61 = vmul.f32 2.0, %v5680_v22 }
 0xa94   :  { %v5684_v2 = vpop.eup %5683  ;;  %v2889_v46 = vadd.f32 1.0, %v5682_v63 }
 0xa95   :  { %v4231_v15 = vadd.f32 -1.0, %v2900_v61  ;;  %v5686_v24 = vpop.eup %5685  ;;  %v2910_v10 = vmul.f32 %v5684_v2, %v6687_v8 }
 0xa96   :  { %5687 = vrcp.f32 %v2889_v46 }
 0xa97   :  { %v2911_v52 = vmul.f32 %v5686_v24, %v4231_v15 }
 0xa99   :  { %v6729_v16 = vadd.f32 %v2911_v52, %v2910_v10 }
 0xa9b   :  { %5689 = vtanh.f32 %v6729_v16 }
 0xaa0   :  { %v5688_v56 = vpop.eup %5687 }
 0xaa5   :  { %v5690_v13 = vpop.eup %5689 }
 0xaa6   :  { %v2914_v14 = vmul.f32 %v5690_v13, %v5688_v56 }
 0xaa8   :  { %2985 = vmatmul.mubr.f32.vlgmr.msra.gmra.mrb[20].mxu0 %v2914_v14  ;;  %3056 = vmatmul.mubr.f32.vlgmr.msra.gmra.mrb[20].mxu1 %v2914_v14 }
 0xaa9   :  { %5060 = vmatpush1.bf16.msra.mxu0 %v6527_v36  ;;  %5092 = vmatpush1.bf16.msra.mxu1 %v6530_v55 }
 0xaaa   :  { %5062 = vmatprep.subr.bf16.mxu0 %v6535_v44  ;;  %5094 = vmatprep.subr.bf16.mxu1 %v6537_v40 }
 0xaab   :  { %3184 = vmatprep.mubr.f32.mxu0 %v5874_v0  ;;  %3255 = vmatprep.mubr.f32.mxu1 %v5874_v0 }
 0xaad   :  { %5064 = vmatpush1.bf16.msra.mxu0 %v6539_v59  ;;  %5096 = vmatpush1.bf16.msra.mxu1 %v6542_v25 }
 0xaae   :  { %5066 = vmatprep.subr.bf16.mxu0 %v6547_v38  ;;  %5098 = vmatprep.subr.bf16.mxu1 %v6549_v54 }
 0xab1   :  { %5068 = vmatpush1.bf16.msra.mxu0 %v6551_v58  ;;  %5100 = vmatpush1.bf16.msra.mxu1 %v6554_v5 }
 0xab2   :  { %5070 = vmatprep.subr.bf16.mxu0 %v6559_v19  ;;  %5102 = vmatprep.subr.bf16.mxu1 %v6561_v39 }
 0xab5   :  { %5072 = vmatpush1.bf16.msra.mxu0 %v6563_v43  ;;  %5104 = vmatpush1.bf16.msra.mxu1 %v6566_v60 }
 0xab6   :  { %5074 = vmatprep.subr.bf16.mxu0 %v6570_v45  ;;  %5106 = vmatprep.subr.bf16.mxu1 %v6572_v62 }
 0xab9   :  { %5076 = vmatpush1.bf16.msra.mxu0 %v6575_v27  ;;  %5108 = vmatpush1.bf16.msra.mxu1 %v6579_v12 }
 0xaba   :  { %5078 = vmatprep.subr.bf16.mxu0 %v6581_v3  ;;  %5110 = vmatprep.subr.bf16.mxu1 %v6583_v49 }
 0xabd   :  { %5080 = vmatpush1.bf16.msra.mxu0 %v6586_v29  ;;  %5112 = vmatpush1.bf16.msra.mxu1 %v6590_v47 }
 0xabe   :  { %5082 = vmatprep.subr.bf16.mxu0 %v6592_v50  ;;  %5114 = vmatprep.subr.bf16.mxu1 %v6595_v11 }
 0xac1   :  { %5084 = vmatpush1.bf16.msra.mxu0 %v6598_v28  ;;  %5116 = vmatpush1.bf16.msra.mxu1 %v6602_v33 }
 0xac2   :  { %5086 = vmatprep.subr.bf16.mxu0 %v6607_v1  ;;  %5118 = vmatprep.subr.bf16.mxu1 %v6609_v23 }
 0xac5   :  { %5088 = vmatpush1.bf16.msra.mxu0 %v6611_v53  ;;  %5120 = vmatpush1.bf16.msra.mxu1 %v6614_v26 }
 0xac6   :  { %5122 = vmatprep.subr.bf16.mxu0 %v6523_v37  ;;  %5154 = vmatprep.subr.bf16.mxu1 %v6525_v7 }
 0xb7b   :  { %v2986_v8 = vpop.f32.mrb[20].mxu0  ;;  %v3057_v20 = vpop.f32.mrb[20].mxu1 }
 0xb7c   :  { %v5413_v4 = vadd.f32 %v2986_v8, %v6669_v34  ;;  %v5429_v6 = vadd.f32 %v3057_v20, %v6673_v35  ;;  %v2988_v41 = vpop.f32.mrb[21].mxu0  ;;  %v3059_v57 = vpop.f32.mrb[21].mxu1 }
 0xb7d   :  { %v5414_v21 = vadd.f32 %v2988_v41, %v6677_v42  ;;  %v5430_v51 = vadd.f32 %v3059_v57, %v6684_v18 }
 0xb7e   :  { %v4234_v30 = vmul.f32 -1.442695, %v5413_v4  ;;  %v4233_v32 = vmul.f32 -2.0, %v5429_v6 }
 0xb7f   :  { %v4235_v48 = vmul.f32 -1.442695, %v5414_v21  ;;  %v4236_v63 = vmul.f32 -1.442695, %v5430_v51 }
 0xb80   :  { %5691 = vpow2.f32 %v4234_v30  ;;  %v3082_v31 = vmul.f32 1.442695, %v4233_v32 }
 0xb81   :  { %5693 = vpow2.f32 %v4235_v48 }
 0xb82   :  { %5695 = vpow2.f32 %v3082_v31 }
 0xb8a   :  { %v5692_v17 = vpop.eup %5691 }
 0xb8b   :  { %v5694_v9 = vpop.eup %5693  ;;  %v3086_v15 = vadd.f32 1.0, %v5692_v17 }
 0xb8c   :  { %v5696_v22 = vpop.eup %5695  ;;  %v3087_v2 = vadd.f32 1.0, %v5694_v9 }
 0xb8d   :  { %v3088_v61 = vadd.f32 1.0, %v5696_v22 }
 0xb8f   :  { %5697 = vrcp.f32 %v3088_v61 }
 0xb90   :  { %5699 = vpow2.f32 %v4236_v63 }
 0xb91   :  { %5701 = vrcp.f32 %v3087_v2 }
 0xb92   :  { %5703 = vrcp.f32 %v3086_v15 }
 0xb99   :  { %v5698_v24 = vpop.eup %5697 }
 0xb9a   :  { %v5700_v46 = vpop.eup %5699  ;;  %v3100_v52 = vmul.f32 2.0, %v5698_v24 }
 0xb9b   :  { %v5702_v10 = vpop.eup %5701  ;;  %v3089_v14 = vadd.f32 1.0, %v5700_v46 }
 0xb9c   :  { %v4239_v56 = vadd.f32 -1.0, %v3100_v52  ;;  %v5704_v13 = vpop.eup %5703  ;;  %v3110_v20 = vmul.f32 %v5702_v10, %v6729_v16 }
 0xb9d   :  { %5705 = vrcp.f32 %v3089_v14 }
 0xb9e   :  { %v3111_v8 = vmul.f32 %v5704_v13, %v4239_v56 }
 0xba0   :  { %v6771_v4 = vadd.f32 %v3111_v8, %v3110_v20 }
 0xba2   :  { %5707 = vtanh.f32 %v6771_v4 }
 0xba7   :  { %v5706_v6 = vpop.eup %5705 }
 0xbac   :  { %v5708_v41 = vpop.eup %5707 }
 0xbad   :  { %v3114_v57 = vmul.f32 %v5708_v41, %v5706_v6 }
 0xbaf   :  { %3185 = vmatmul.mubr.f32.vlgmr.msra.gmra.mrb[22].mxu0 %v3114_v57  ;;  %3256 = vmatmul.mubr.f32.vlgmr.msra.gmra.mrb[22].mxu1 %v3114_v57 }
 0xbb0   :  { %5124 = vmatpush1.bf16.msra.mxu0 %v6527_v36  ;;  %5156 = vmatpush1.bf16.msra.mxu1 %v6530_v55 }
 0xbb1   :  { %5126 = vmatprep.subr.bf16.mxu0 %v6535_v44  ;;  %5158 = vmatprep.subr.bf16.mxu1 %v6537_v40 }
 0xbb2   :  { %3384 = vmatprep.mubr.f32.mxu0 %v5874_v0  ;;  %3455 = vmatprep.mubr.f32.mxu1 %v5874_v0 }
 0xbb4   :  { %5128 = vmatpush1.bf16.msra.mxu0 %v6539_v59  ;;  %5160 = vmatpush1.bf16.msra.mxu1 %v6542_v25 }
 0xbb5   :  { %5130 = vmatprep.subr.bf16.mxu0 %v6547_v38  ;;  %5162 = vmatprep.subr.bf16.mxu1 %v6549_v54 }
 0xbb8   :  { %5132 = vmatpush1.bf16.msra.mxu0 %v6551_v58  ;;  %5164 = vmatpush1.bf16.msra.mxu1 %v6554_v5 }
 0xbb9   :  { %5134 = vmatprep.subr.bf16.mxu0 %v6559_v19  ;;  %5166 = vmatprep.subr.bf16.mxu1 %v6561_v39 }
 0xbbc   :  { %5136 = vmatpush1.bf16.msra.mxu0 %v6563_v43  ;;  %5168 = vmatpush1.bf16.msra.mxu1 %v6566_v60 }
 0xbbd   :  { %5138 = vmatprep.subr.bf16.mxu0 %v6570_v45  ;;  %5170 = vmatprep.subr.bf16.mxu1 %v6572_v62 }
 0xbc0   :  { %5140 = vmatpush1.bf16.msra.mxu0 %v6575_v27  ;;  %5172 = vmatpush1.bf16.msra.mxu1 %v6579_v12 }
 0xbc1   :  { %5142 = vmatprep.subr.bf16.mxu0 %v6581_v3  ;;  %5174 = vmatprep.subr.bf16.mxu1 %v6583_v49 }
 0xbc4   :  { %5144 = vmatpush1.bf16.msra.mxu0 %v6586_v29  ;;  %5176 = vmatpush1.bf16.msra.mxu1 %v6590_v47 }
 0xbc5   :  { %5146 = vmatprep.subr.bf16.mxu0 %v6592_v50  ;;  %5178 = vmatprep.subr.bf16.mxu1 %v6595_v11 }
 0xbc8   :  { %5148 = vmatpush1.bf16.msra.mxu0 %v6598_v28  ;;  %5180 = vmatpush1.bf16.msra.mxu1 %v6602_v33 }
 0xbc9   :  { %5150 = vmatprep.subr.bf16.mxu0 %v6607_v1  ;;  %5182 = vmatprep.subr.bf16.mxu1 %v6609_v23 }
 0xbcc   :  { %5152 = vmatpush1.bf16.msra.mxu0 %v6611_v53  ;;  %5184 = vmatpush1.bf16.msra.mxu1 %v6614_v26 }
 0xbcd   :  { %5186 = vmatprep.subr.bf16.mxu0 %v6523_v37  ;;  %5218 = vmatprep.subr.bf16.mxu1 %v6525_v7 }
 0xc82   :  { %v3186_v16 = vpop.f32.mrb[22].mxu0  ;;  %v3257_v21 = vpop.f32.mrb[22].mxu1 }
 0xc83   :  { %v5415_v30 = vadd.f32 %v3186_v16, %v6669_v34  ;;  %v5431_v32 = vadd.f32 %v3257_v21, %v6673_v35  ;;  %v3188_v48 = vpop.f32.mrb[23].mxu0  ;;  %v3259_v31 = vpop.f32.mrb[23].mxu1 }
 0xc84   :  { %v5416_v51 = vadd.f32 %v3188_v48, %v6677_v42  ;;  %v5432_v61 = vadd.f32 %v3259_v31, %v6684_v18 }
 0xc85   :  { %v4242_v17 = vmul.f32 -1.442695, %v5415_v30  ;;  %v4241_v9 = vmul.f32 -2.0, %v5431_v32 }
 0xc86   :  { %v4243_v22 = vmul.f32 -1.442695, %v5416_v51  ;;  %v4244_v46 = vmul.f32 -1.442695, %v5432_v61 }
 0xc87   :  { %5709 = vpow2.f32 %v4242_v17  ;;  %v3282_v63 = vmul.f32 1.442695, %v4241_v9 }
 0xc88   :  { %5711 = vpow2.f32 %v4243_v22 }
 0xc89   :  { %5713 = vpow2.f32 %v3282_v63 }
 0xc91   :  { %v5710_v2 = vpop.eup %5709 }
 0xc92   :  { %v5712_v15 = vpop.eup %5711  ;;  %v3286_v56 = vadd.f32 1.0, %v5710_v2 }
 0xc93   :  { %v5714_v24 = vpop.eup %5713  ;;  %v3287_v10 = vadd.f32 1.0, %v5712_v15 }
 0xc94   :  { %v3288_v52 = vadd.f32 1.0, %v5714_v24 }
 0xc96   :  { %5715 = vrcp.f32 %v3288_v52 }
 0xc97   :  { %5717 = vpow2.f32 %v4244_v46 }
 0xc98   :  { %5719 = vrcp.f32 %v3287_v10 }
 0xc99   :  { %5721 = vrcp.f32 %v3286_v56 }
 0xca0   :  { %v5716_v13 = vpop.eup %5715 }
 0xca1   :  { %v5718_v14 = vpop.eup %5717  ;;  %v3300_v8 = vmul.f32 2.0, %v5716_v13 }
 0xca2   :  { %v5720_v20 = vpop.eup %5719  ;;  %v3289_v57 = vadd.f32 1.0, %v5718_v14 }
 0xca3   :  { %v4247_v6 = vadd.f32 -1.0, %v3300_v8  ;;  %v5722_v41 = vpop.eup %5721  ;;  %v3310_v21 = vmul.f32 %v5720_v20, %v6771_v4 }
 0xca4   :  { %5723 = vrcp.f32 %v3289_v57 }
 0xca5   :  { %v3311_v16 = vmul.f32 %v5722_v41, %v4247_v6 }
 0xca7   :  { %v6813_v30 = vadd.f32 %v3311_v16, %v3310_v21 }
 0xca9   :  { %5725 = vtanh.f32 %v6813_v30 }
 0xcae   :  { %v5724_v32 = vpop.eup %5723 }
 0xcb3   :  { %v5726_v48 = vpop.eup %5725 }
 0xcb4   :  { %v3314_v31 = vmul.f32 %v5726_v48, %v5724_v32 }
 0xcb6   :  { %3385 = vmatmul.mubr.f32.vlgmr.msra.gmra.mrb[24].mxu0 %v3314_v31  ;;  %3456 = vmatmul.mubr.f32.vlgmr.msra.gmra.mrb[24].mxu1 %v3314_v31 }
 0xcb7   :  { %5188 = vmatpush1.bf16.msra.mxu0 %v6527_v36  ;;  %5220 = vmatpush1.bf16.msra.mxu1 %v6530_v55 }
 0xcb8   :  { %5190 = vmatprep.subr.bf16.mxu0 %v6535_v44  ;;  %5222 = vmatprep.subr.bf16.mxu1 %v6537_v40 }
 0xcb9   :  { %3584 = vmatprep.mubr.f32.mxu0 %v5874_v0  ;;  %3655 = vmatprep.mubr.f32.mxu1 %v5874_v0 }
 0xcbb   :  { %5192 = vmatpush1.bf16.msra.mxu0 %v6539_v59  ;;  %5224 = vmatpush1.bf16.msra.mxu1 %v6542_v25 }
 0xcbc   :  { %5194 = vmatprep.subr.bf16.mxu0 %v6547_v38  ;;  %5226 = vmatprep.subr.bf16.mxu1 %v6549_v54 }
 0xcbf   :  { %5196 = vmatpush1.bf16.msra.mxu0 %v6551_v58  ;;  %5228 = vmatpush1.bf16.msra.mxu1 %v6554_v5 }
 0xcc0   :  { %5198 = vmatprep.subr.bf16.mxu0 %v6559_v19  ;;  %5230 = vmatprep.subr.bf16.mxu1 %v6561_v39 }
 0xcc3   :  { %5200 = vmatpush1.bf16.msra.mxu0 %v6563_v43  ;;  %5232 = vmatpush1.bf16.msra.mxu1 %v6566_v60 }
 0xcc4   :  { %5202 = vmatprep.subr.bf16.mxu0 %v6570_v45  ;;  %5234 = vmatprep.subr.bf16.mxu1 %v6572_v62 }
 0xcc7   :  { %5204 = vmatpush1.bf16.msra.mxu0 %v6575_v27  ;;  %5236 = vmatpush1.bf16.msra.mxu1 %v6579_v12 }
 0xcc8   :  { %5206 = vmatprep.subr.bf16.mxu0 %v6581_v3  ;;  %5238 = vmatprep.subr.bf16.mxu1 %v6583_v49 }
 0xccb   :  { %5208 = vmatpush1.bf16.msra.mxu0 %v6586_v29  ;;  %5240 = vmatpush1.bf16.msra.mxu1 %v6590_v47 }
 0xccc   :  { %5210 = vmatprep.subr.bf16.mxu0 %v6592_v50  ;;  %5242 = vmatprep.subr.bf16.mxu1 %v6595_v11 }
 0xccf   :  { %5212 = vmatpush1.bf16.msra.mxu0 %v6598_v28  ;;  %5244 = vmatpush1.bf16.msra.mxu1 %v6602_v33 }
 0xcd0   :  { %5214 = vmatprep.subr.bf16.mxu0 %v6607_v1  ;;  %5246 = vmatprep.subr.bf16.mxu1 %v6609_v23 }
 0xcd3   :  { %5216 = vmatpush1.bf16.msra.mxu0 %v6611_v53  ;;  %5248 = vmatpush1.bf16.msra.mxu1 %v6614_v26 }
 0xcd4   :  { %5250 = vmatprep.subr.bf16.mxu0 %v6523_v37  ;;  %5282 = vmatprep.subr.bf16.mxu1 %v6525_v7 }
 0xd89   :  { %v3386_v4 = vpop.f32.mrb[24].mxu0  ;;  %v3457_v51 = vpop.f32.mrb[24].mxu1 }
 0xd8a   :  { %v5417_v17 = vadd.f32 %v3386_v4, %v6669_v34  ;;  %v5433_v9 = vadd.f32 %v3457_v51, %v6673_v35  ;;  %v3388_v22 = vpop.f32.mrb[25].mxu0  ;;  %v3459_v63 = vpop.f32.mrb[25].mxu1 }
 0xd8b   :  { %v5418_v61 = vadd.f32 %v3388_v22, %v6677_v42  ;;  %v5434_v52 = vadd.f32 %v3459_v63, %v6684_v18 }
 0xd8c   :  { %v4250_v2 = vmul.f32 -1.442695, %v5417_v17  ;;  %v4249_v15 = vmul.f32 -2.0, %v5433_v9 }
 0xd8d   :  { %v4251_v24 = vmul.f32 -1.442695, %v5418_v61  ;;  %v4252_v14 = vmul.f32 -1.442695, %v5434_v52 }
 0xd8e   :  { %5727 = vpow2.f32 %v4250_v2  ;;  %v3482_v46 = vmul.f32 1.442695, %v4249_v15 }
 0xd8f   :  { %5729 = vpow2.f32 %v4251_v24 }
 0xd90   :  { %5731 = vpow2.f32 %v3482_v46 }
 0xd98   :  { %v5728_v10 = vpop.eup %5727 }
 0xd99   :  { %v5730_v56 = vpop.eup %5729  ;;  %v3486_v6 = vadd.f32 1.0, %v5728_v10 }
 0xd9a   :  { %v5732_v13 = vpop.eup %5731  ;;  %v3487_v20 = vadd.f32 1.0, %v5730_v56 }
 0xd9b   :  { %v3488_v8 = vadd.f32 1.0, %v5732_v13 }
 0xd9d   :  { %5733 = vrcp.f32 %v3488_v8 }
 0xd9e   :  { %5735 = vpow2.f32 %v4252_v14 }
 0xd9f   :  { %5737 = vrcp.f32 %v3487_v20 }
 0xda0   :  { %5739 = vrcp.f32 %v3486_v6 }
 0xda7   :  { %v5734_v41 = vpop.eup %5733 }
 0xda8   :  { %v5736_v57 = vpop.eup %5735  ;;  %v3500_v16 = vmul.f32 2.0, %v5734_v41 }
 0xda9   :  { %v5738_v21 = vpop.eup %5737  ;;  %v3489_v31 = vadd.f32 1.0, %v5736_v57 }
 0xdaa   :  { %v4255_v32 = vadd.f32 -1.0, %v3500_v16  ;;  %v5740_v48 = vpop.eup %5739  ;;  %v3510_v51 = vmul.f32 %v5738_v21, %v6813_v30 }
 0xdab   :  { %5741 = vrcp.f32 %v3489_v31 }
 0xdac   :  { %v3511_v4 = vmul.f32 %v5740_v48, %v4255_v32 }
 0xdae   :  { %v6855_v17 = vadd.f32 %v3511_v4, %v3510_v51 }
 0xdb0   :  { %5743 = vtanh.f32 %v6855_v17 }
 0xdb5   :  { %v5742_v9 = vpop.eup %5741 }
 0xdba   :  { %v5744_v22 = vpop.eup %5743 }
 0xdbb   :  { %v3514_v63 = vmul.f32 %v5744_v22, %v5742_v9 }
 0xdbd   :  { %3585 = vmatmul.mubr.f32.vlgmr.msra.gmra.mrb[26].mxu0 %v3514_v63  ;;  %4120 = vst [vmem:[%s6960_s7] sm:$0xff] %v3514_v63  ;;  %3656 = vmatmul.mubr.f32.vlgmr.msra.gmra.mrb[26].mxu1 %v3514_v63 }
 0xdbe   :  { %5252 = vmatpush1.bf16.msra.mxu0 %v6527_v36  ;;  %5284 = vmatpush1.bf16.msra.mxu1 %v6530_v55 }
 0xdbf   :  { %5254 = vmatprep.subr.bf16.mxu0 %v6535_v44  ;;  %5286 = vmatprep.subr.bf16.mxu1 %v6537_v40 }
 0xdc0   :  { %3784 = vmatprep.mubr.f32.mxu0 %v5874_v0  ;;  %3855 = vmatprep.mubr.f32.mxu1 %v5874_v0 }
 0xdc2   :  { %5256 = vmatpush1.bf16.msra.mxu0 %v6539_v59  ;;  %5288 = vmatpush1.bf16.msra.mxu1 %v6542_v25 }
 0xdc3   :  { %5258 = vmatprep.subr.bf16.mxu0 %v6547_v38  ;;  %5290 = vmatprep.subr.bf16.mxu1 %v6549_v54 }
 0xdc6   :  { %5260 = vmatpush1.bf16.msra.mxu0 %v6551_v58  ;;  %5292 = vmatpush1.bf16.msra.mxu1 %v6554_v5 }
 0xdc7   :  { %5262 = vmatprep.subr.bf16.mxu0 %v6559_v19  ;;  %5294 = vmatprep.subr.bf16.mxu1 %v6561_v39 }
 0xdca   :  { %5264 = vmatpush1.bf16.msra.mxu0 %v6563_v43  ;;  %5296 = vmatpush1.bf16.msra.mxu1 %v6566_v60 }
 0xdcb   :  { %5266 = vmatprep.subr.bf16.mxu0 %v6570_v45  ;;  %5298 = vmatprep.subr.bf16.mxu1 %v6572_v62 }
 0xdce   :  { %5268 = vmatpush1.bf16.msra.mxu0 %v6575_v27  ;;  %5300 = vmatpush1.bf16.msra.mxu1 %v6579_v12 }
 0xdcf   :  { %5270 = vmatprep.subr.bf16.mxu0 %v6581_v3  ;;  %5302 = vmatprep.subr.bf16.mxu1 %v6583_v49 }
 0xdd2   :  { %5272 = vmatpush1.bf16.msra.mxu0 %v6586_v29  ;;  %5304 = vmatpush1.bf16.msra.mxu1 %v6590_v47 }
 0xdd3   :  { %5274 = vmatprep.subr.bf16.mxu0 %v6592_v50  ;;  %5306 = vmatprep.subr.bf16.mxu1 %v6595_v11 }
 0xdd6   :  { %5276 = vmatpush1.bf16.msra.mxu0 %v6598_v28  ;;  %5308 = vmatpush1.bf16.msra.mxu1 %v6602_v33 }
 0xdd7   :  { %5278 = vmatprep.subr.bf16.mxu0 %v6607_v1  ;;  %5310 = vmatprep.subr.bf16.mxu1 %v6609_v23 }
 0xdda   :  { %5280 = vmatpush1.bf16.msra.mxu0 %v6611_v53  ;;  %5312 = vmatpush1.bf16.msra.mxu1 %v6614_v26 }
 0xddb   :  { %5314 = vmatprep.subr.bf16.mxu0 %v6523_v37  ;;  %5346 = vmatprep.subr.bf16.mxu1 %v6525_v7 }
 0xe90   :  { %v3586_v30 = vpop.f32.mrb[26].mxu0  ;;  %v3657_v61 = vpop.f32.mrb[26].mxu1 }
 0xe91   :  { %v5419_v2 = vadd.f32 %v3586_v30, %v6669_v34  ;;  %v5435_v15 = vadd.f32 %v3657_v61, %v6673_v35  ;;  %v3588_v24 = vpop.f32.mrb[27].mxu0  ;;  %v3659_v46 = vpop.f32.mrb[27].mxu1 }
 0xe92   :  { %v5420_v52 = vadd.f32 %v3588_v24, %v6677_v42  ;;  %v5436_v37 = vadd.f32 %v3659_v46, %v6684_v18 }
 0xe93   :  { %v4258_v10 = vmul.f32 -1.442695, %v5419_v2  ;;  %v4257_v56 = vmul.f32 -2.0, %v5435_v15 }
 0xe94   :  { %v4259_v13 = vmul.f32 -1.442695, %v5420_v52  ;;  %v4260_v6 = vmul.f32 -1.442695, %v5436_v37 }
 0xe95   :  { %5745 = vpow2.f32 %v4258_v10  ;;  %v3682_v14 = vmul.f32 1.442695, %v4257_v56 }
 0xe96   :  { %5747 = vpow2.f32 %v4259_v13 }
 0xe97   :  { %5749 = vpow2.f32 %v3682_v14 }
 0xe9f   :  { %v5746_v7 = vpop.eup %5745 }
 0xea0   :  { %v5748_v8 = vpop.eup %5747  ;;  %v3686_v16 = vadd.f32 1.0, %v5746_v7 }
 0xea1   :  { %v5750_v20 = vpop.eup %5749  ;;  %v3687_v57 = vadd.f32 1.0, %v5748_v8 }
 0xea2   :  { %v3688_v41 = vadd.f32 1.0, %v5750_v20 }
 0xea4   :  { %5751 = vrcp.f32 %v3688_v41 }
 0xea5   :  { %5753 = vpow2.f32 %v4260_v6 }
 0xea6   :  { %5755 = vrcp.f32 %v3687_v57 }
 0xea7   :  { %5757 = vrcp.f32 %v3686_v16 }
 0xeae   :  { %v5752_v21 = vpop.eup %5751 }
 0xeaf   :  { %v5754_v32 = vpop.eup %5753  ;;  %v3700_v48 = vmul.f32 2.0, %v5752_v21 }
 0xeb0   :  { %v5756_v31 = vpop.eup %5755  ;;  %v3689_v9 = vadd.f32 1.0, %v5754_v32 }
 0xeb1   :  { %v4263_v4 = vadd.f32 -1.0, %v3700_v48  ;;  %v5758_v51 = vpop.eup %5757  ;;  %v3710_v63 = vmul.f32 %v5756_v31, %v6855_v17 }
 0xeb2   :  { %5759 = vrcp.f32 %v3689_v9 }
 0xeb3   :  { %v3711_v22 = vmul.f32 %v5758_v51, %v4263_v4 }
 0xeb5   :  { %v6900_v30 = vadd.f32 %v3711_v22, %v3710_v63 }
 0xeb7   :  { %5761 = vtanh.f32 %v6900_v30 }
 0xebc   :  { %v5760_v61 = vpop.eup %5759 }
 0xec1   :  { %v5762_v2 = vpop.eup %5761 }
 0xec2   :  { %v3714_v15 = vmul.f32 %v5762_v2, %v5760_v61 }
 0xec4   :  { %3785 = vmatmul.mubr.f32.vlgmr.msra.gmra.mrb[28].mxu0 %v3714_v15  ;;  %4121 = vst [vmem:[%s6960_s7 + $0x8] sm:$0xff] %v3714_v15  ;;  %3856 = vmatmul.mubr.f32.vlgmr.msra.gmra.mrb[28].mxu1 %v3714_v15 }
 0xec5   :  { %5316 = vmatpush1.bf16.msra.mxu0 %v6527_v36  ;;  %5348 = vmatpush1.bf16.msra.mxu1 %v6530_v55 }
 0xec6   :  { %5318 = vmatprep.subr.bf16.mxu0 %v6535_v44  ;;  %5350 = vmatprep.subr.bf16.mxu1 %v6537_v40 }
 0xec7   :  { %3984 = vmatprep.mubr.f32.mxu0 %v5874_v0  ;;  %4055 = vmatprep.mubr.f32.mxu1 %v5874_v0 }
 0xec9   :  { %5320 = vmatpush1.bf16.msra.mxu0 %v6539_v59  ;;  %5352 = vmatpush1.bf16.msra.mxu1 %v6542_v25 }
 0xeca   :  { %5322 = vmatprep.subr.bf16.mxu0 %v6547_v38  ;;  %5354 = vmatprep.subr.bf16.mxu1 %v6549_v54 }
 0xecd   :  { %5324 = vmatpush1.bf16.msra.mxu0 %v6551_v58  ;;  %5356 = vmatpush1.bf16.msra.mxu1 %v6554_v5 }
 0xece   :  { %5326 = vmatprep.subr.bf16.mxu0 %v6559_v19  ;;  %5358 = vmatprep.subr.bf16.mxu1 %v6561_v39 }
 0xed1   :  { %5328 = vmatpush1.bf16.msra.mxu0 %v6563_v43  ;;  %5360 = vmatpush1.bf16.msra.mxu1 %v6566_v60 }
 0xed2   :  { %5330 = vmatprep.subr.bf16.mxu0 %v6570_v45  ;;  %5362 = vmatprep.subr.bf16.mxu1 %v6572_v62 }
 0xed5   :  { %5332 = vmatpush1.bf16.msra.mxu0 %v6575_v27  ;;  %5364 = vmatpush1.bf16.msra.mxu1 %v6579_v12 }
 0xed6   :  { %5334 = vmatprep.subr.bf16.mxu0 %v6581_v3  ;;  %5366 = vmatprep.subr.bf16.mxu1 %v6583_v49 }
 0xed9   :  { %5336 = vmatpush1.bf16.msra.mxu0 %v6586_v29  ;;  %5368 = vmatpush1.bf16.msra.mxu1 %v6590_v47 }
 0xeda   :  { %5338 = vmatprep.subr.bf16.mxu0 %v6592_v50  ;;  %5370 = vmatprep.subr.bf16.mxu1 %v6595_v11 }
 0xedd   :  { %5340 = vmatpush1.bf16.msra.mxu0 %v6598_v28  ;;  %5372 = vmatpush1.bf16.msra.mxu1 %v6602_v33 }
 0xede   :  { %5342 = vmatprep.subr.bf16.mxu0 %v6607_v1  ;;  %5374 = vmatprep.subr.bf16.mxu1 %v6609_v23 }
 0xee1   :  { %5344 = vmatpush1.bf16.msra.mxu0 %v6611_v53  ;;  %5376 = vmatpush1.bf16.msra.mxu1 %v6614_v26 }
 0xf97   :  { %v3786_v0 = vpop.f32.mrb[28].mxu0  ;;  %v3857_v36 = vpop.f32.mrb[28].mxu1 }
 0xf98   :  { %v5421_v55 = vadd.f32 %v3786_v0, %v6669_v34  ;;  %v5437_v44 = vadd.f32 %v3857_v36, %v6673_v35  ;;  %v3788_v40 = vpop.f32.mrb[29].mxu0  ;;  %v3859_v59 = vpop.f32.mrb[29].mxu1 }
 0xf99   :  { %v5422_v25 = vadd.f32 %v3788_v40, %v6677_v42  ;;  %v5438_v19 = vadd.f32 %v3859_v59, %v6684_v18 }
 0xf9a   :  { %v4266_v38 = vmul.f32 -1.442695, %v5421_v55  ;;  %v4265_v54 = vmul.f32 -2.0, %v5437_v44 }
 0xf9b   :  { %v4267_v58 = vmul.f32 -1.442695, %v5422_v25  ;;  %v4268_v45 = vmul.f32 -1.442695, %v5438_v19 }
 0xf9c   :  { %5763 = vpow2.f32 %v4266_v38  ;;  %v3882_v5 = vmul.f32 1.442695, %v4265_v54 }
 0xf9d   :  { %5765 = vpow2.f32 %v4267_v58 }
 0xf9e   :  { %5767 = vpow2.f32 %v3882_v5 }
 0xfa6   :  { %v5764_v39 = vpop.eup %5763 }
 0xfa7   :  { %v5766_v43 = vpop.eup %5765  ;;  %v3886_v12 = vadd.f32 1.0, %v5764_v39 }
 0xfa8   :  { %v5768_v60 = vpop.eup %5767  ;;  %v3887_v27 = vadd.f32 1.0, %v5766_v43 }
 0xfa9   :  { %v3888_v62 = vadd.f32 1.0, %v5768_v60 }
 0xfab   :  { %5769 = vrcp.f32 %v3888_v62 }
 0xfac   :  { %5771 = vpow2.f32 %v4268_v45 }
 0xfad   :  { %5773 = vrcp.f32 %v3887_v27 }
 0xfae   :  { %5775 = vrcp.f32 %v3886_v12 }
 0xfb5   :  { %v5770_v3 = vpop.eup %5769 }
 0xfb6   :  { %v5772_v49 = vpop.eup %5771  ;;  %v3900_v29 = vmul.f32 2.0, %v5770_v3 }
 0xfb7   :  { %v5774_v47 = vpop.eup %5773  ;;  %v3889_v28 = vadd.f32 1.0, %v5772_v49 }
 0xfb8   :  { %v4271_v50 = vadd.f32 -1.0, %v3900_v29  ;;  %v5776_v11 = vpop.eup %5775  ;;  %v3910_v1 = vmul.f32 %v5774_v47, %v6900_v30 }
 0xfb9   :  { %5777 = vrcp.f32 %v3889_v28 }
 0xfba   :  { %v3911_v33 = vmul.f32 %v5776_v11, %v4271_v50 }
 0xfbc   :  { %v3912_v23 = vadd.f32 %v3911_v33, %v3910_v1 }
 0xfbe   :  { %5779 = vtanh.f32 %v3912_v23 }
 0xfc3   :  { %v5778_v53 = vpop.eup %5777 }
 0xfc8   :  { %v5780_v26 = vpop.eup %5779 }
 0xfc9   :  { %v3914_v17 = vmul.f32 %v5780_v26, %v5778_v53 }
 0xfcb   :  { %3985 = vmatmul.mubr.f32.vlgmr.msra.gmra.mrb[30].mxu0 %v3914_v17  ;;  %4122 = vst [vmem:[%s6960_s7 + $0x10] sm:$0xff] %v3914_v17  ;;  %4056 = vmatmul.mubr.f32.vlgmr.msra.gmra.mrb[30].mxu1 %v3914_v17 }
0x109e   :  { %v3986_v24 = vpop.f32.mrb[30].mxu0  ;;  %v4057_v46 = vpop.f32.mrb[30].mxu1 }
0x109f   :  { %v5423_v52 = vadd.f32 %v3986_v24, %v6669_v34  ;;  %v5439_v10 = vadd.f32 %v4057_v46, %v6673_v35  ;;  %v3988_v56 = vpop.f32.mrb[31].mxu0  ;;  %v4059_v13 = vpop.f32.mrb[31].mxu1 }
0x10a0   :  { %v5424_v14 = vadd.f32 %v3988_v56, %v6677_v42  ;;  %v5440_v6 = vadd.f32 %v4059_v13, %v6684_v18 }
0x10a1   :  { %v4274_v37 = vmul.f32 -1.442695, %v5423_v52  ;;  %v4273_v7 = vmul.f32 -2.0, %v5439_v10 }
0x10a2   :  { %v4275_v8 = vmul.f32 -1.442695, %v5424_v14  ;;  %v4276_v21 = vmul.f32 -1.442695, %v5440_v6 }
0x10a3   :  { %5781 = vpow2.f32 %v4274_v37  ;;  %v4082_v20 = vmul.f32 1.442695, %v4273_v7 }
0x10a4   :  { %5783 = vpow2.f32 %v4275_v8 }
0x10a5   :  { %5785 = vpow2.f32 %v4082_v20 }
0x10ad   :  { %v5782_v41 = vpop.eup %5781 }
0x10ae   :  { %v5784_v57 = vpop.eup %5783  ;;  %v4086_v35 = vadd.f32 1.0, %v5782_v41 }
0x10af   :  { %v5786_v16 = vpop.eup %5785  ;;  %v4087_v32 = vadd.f32 1.0, %v5784_v57 }
0x10b0   :  { %v4088_v34 = vadd.f32 1.0, %v5786_v16 }
0x10b2   :  { %5787 = vrcp.f32 %v4088_v34 }
0x10b3   :  { %5789 = vpow2.f32 %v4276_v21 }
0x10b4   :  { %5791 = vrcp.f32 %v4087_v32 }
0x10b5   :  { %5793 = vrcp.f32 %v4086_v35 }
0x10bc   :  { %v5788_v42 = vpop.eup %5787 }
0x10bd   :  { %v5790_v48 = vpop.eup %5789  ;;  %v4100_v31 = vmul.f32 2.0, %v5788_v42 }
0x10be   :  { %v5792_v4 = vpop.eup %5791  ;;  %v4089_v22 = vadd.f32 1.0, %v5790_v48 }
0x10bf   :  { %v4279_v51 = vadd.f32 -1.0, %v4100_v31  ;;  %v5794_v9 = vpop.eup %5793  ;;  %v4110_v18 = vmul.f32 %v5792_v4, %v3912_v23 }
0x10c0   :  { %5795 = vrcp.f32 %v4089_v22 }
0x10c1   :  { %v4111_v63 = vmul.f32 %v5794_v9, %v4279_v51 }
0x10c3   :  { %v4112_v30 = vadd.f32 %v4111_v63, %v4110_v18 }
0x10c5   :  { %5797 = vtanh.f32 %v4112_v30 }
0x10ca   :  { %v5796_v61 = vpop.eup %5795 }
0x10cf   :  { %v5798_v2 = vpop.eup %5797 }
0x10d0   :  { %v4114_v15 = vmul.f32 %v5798_v2, %v5796_v61 }
0x10d2   :  { %4123 = vst [vmem:[%s6960_s7 + $0x18] sm:$0xff] %v4114_v15 }
0x10d3   :  { %4128 = vsyncpa [#allocation5], 1 }
0x10d4   :  { %4129 = vsyncpa [#allocation7], 1 }

</bundles_post_ra>
